<compile_context>
chip_gen: v6e
topology: v6e:2x2x1
jax: 0.10.0
libtpu: 0.0.40
codegen_flags: <defaults>
</compile_context>

<pallas_src>
import functools

import jax
import jax.numpy as jnp
from jax import lax
from jax.experimental import pallas as pl
from jax.experimental.pallas import tpu as pltpu


# ----------------------------- small helpers --------------------------------

def _vmem_budget_bytes():
    """Scoped-VMEM budget per chip generation (v7x: ~42 MiB of 64; v5e/v6e: ~85 of 128)."""
    try:
        cap = int(pltpu.get_tpu_info().vmem_capacity_bytes)
    except Exception:
        cap = 64 * 1024 * 1024
    return int(max(32 * 1024 * 1024, min(2 * cap // 3, 96 * 1024 * 1024)))


def _flat_halo(dilation, padding, H, W):
    """Max |flattened-index offset| of any 3x3x3 tap for this (dilation, padding)."""
    m = max(padding, abs(2 * dilation - padding))
    return m * (H * W + W + 1)


def _round_up(v, m):
    return ((v + m - 1) // m) * m


def _make_coords(D, H, W):
    """(3, M) int32 table of (z, y, x) per flattened position, used for tap boundary masks."""
    idx = jnp.arange(D * H * W, dtype=jnp.int32)
    return jnp.stack([idx // (H * W), (idx // W) % H, idx % W], axis=0)


def _choose_tm(M, bytes_per_m, budget):
    """Largest multiple-of-128 divisor of M whose double-buffered tile fits `budget`."""
    if M % 128 != 0:
        return M
    cap = max(128, (budget // max(bytes_per_m, 1)) // 128 * 128)
    if M <= cap:
        return M
    best, t = 128, 128
    while t <= M:
        if M % t == 0 and t <= cap:
            best = t
        t += 128
    return best


# ----------------------------- in-kernel conv taps ---------------------------

def _dilated_conv3x3x3(xpad, w_ref, cz, cy, cx, D, H, W, dilation, padding, pad):
    """Streamed dilated 3x3x3 conv over a flat-padded resident tile.

    xpad:  (Cin, pad + M + pad) value; real data lives at [:, pad:pad+M].
    w_ref: (27, Cout, Cin) ref (tap-major weight).
    cz/cy/cx: (1, M) int32 coordinate rows (for boundary masks).
    Returns (Cout, M) f32.
    """
    M = D * H * W
    HW = H * W
    acc = None
    for kd in range(3):
        dz = kd * dilation - padding
        for kh in range(3):
            dy = kh * dilation - padding
            for kw in range(3):
                dx = kw * dilation - padding
                t = (kd * 3 + kh) * 3 + kw
                start = pad + dz * HW + dy * W + dx
                tap = xpad[:, start:start + M]                      # lane-window slice
                conds = []
                if dz != 0:
                    conds.append(((cz + dz) >= 0) & ((cz + dz) < D))
                if dy != 0:
                    conds.append(((cy + dy) >= 0) & ((cy + dy) < H))
                if dx != 0:
                    conds.append(((cx + dx) >= 0) & ((cx + dx) < W))
                if conds:
                    valid = conds[0]
                    for c in conds[1:]:
                        valid = valid & c
                    tap = jnp.where(valid, tap, 0.0)                # mask BEFORE the dot
                term = jnp.dot(w_ref[t], tap, preferred_element_type=jnp.float32)
                acc = term if acc is None else acc + term
    return acc


# ----------------------------- Pallas kernels --------------------------------

def _conv1_kernel(x_ref, coords_ref, w_ref, b_ref, y_ref, sum_ref, ssq_ref, xpad_ref,
                  *, dims, dilation, padding, pad):
    """conv1 (d=2, p=2) streamed from a resident tile + fused bias + BN partial stats."""
    D, H, W = dims
    M = D * H * W
    cz = coords_ref[0:1, :]
    cy = coords_ref[1:2, :]
    cx = coords_ref[2:3, :]
    xpad_ref[...] = jnp.zeros_like(xpad_ref)
    xpad_ref[:, pad:pad + M] = x_ref[0]
    acc = _dilated_conv3x3x3(xpad_ref[...], w_ref, cz, cy, cx, D, H, W, dilation, padding, pad)
    acc = acc + b_ref[...]
    y_ref[0] = acc.astype(y_ref.dtype)
    sum_ref[0] = jnp.sum(acc, axis=1, keepdims=True)
    ssq_ref[0] = jnp.sum(acc * acc, axis=1, keepdims=True)


def _branches_attention_kernel(y1_ref, coords_ref, s1_ref, t1_ref, w2_ref, b2_ref,
                               wa1_ref, ba1_ref, wa2_ref, ba2_ref,
                               y2_ref, sum2_ref, ssq2_ref, att_ref, hpad_ref,
                               *, dims, dilations, paddings, pad):
    """bn1 affine+ReLU -> attention logits + every dilated conv2 branch, all off one h tile."""
    D, H, W = dims
    M = D * H * W
    cz = coords_ref[0:1, :]
    cy = coords_ref[1:2, :]
    cx = coords_ref[2:3, :]
    # bn1 affine + ReLU fused here -> h never round-trips through HBM.
    h = jnp.maximum(y1_ref[0] * s1_ref[...] + t1_ref[...], 0.0)      # (C1, M)
    hpad_ref[...] = jnp.zeros_like(hpad_ref)
    hpad_ref[:, pad:pad + M] = h
    hp = hpad_ref[...]
    # attention head: 3x3x3 conv (d=1, p=1) + ReLU, then 1x1x1 channel mix as one MXU dot.
    a = _dilated_conv3x3x3(hp, wa1_ref, cz, cy, cx, D, H, W, 1, 1, pad) + ba1_ref[...]
    a = jnp.maximum(a, 0.0)
    logits = jnp.dot(wa2_ref[...], a, preferred_element_type=jnp.float32) + ba2_ref[...]
    att_ref[0] = logits.astype(att_ref.dtype)
    # all dilated conv2 branches (shared weight, different dilation/padding).
    for b, (d_, p_) in enumerate(zip(dilations, paddings)):
        acc = _dilated_conv3x3x3(hp, w2_ref, cz, cy, cx, D, H, W, d_, p_, pad)
        if b == 0:
            acc = acc + b2_ref[...]                                  # only conv2 itself has a bias
        y2_ref[0, b] = acc.astype(y2_ref.dtype)
        sum2_ref[0, b] = jnp.sum(acc, axis=1, keepdims=True)
        ssq2_ref[0, b] = jnp.sum(acc * acc, axis=1, keepdims=True)


def _combine_kernel(y_ref, att_ref, s_ref, t_ref, r_ref, o_ref, *, num_branches):
    """Per-branch BN affine + softmax-over-branches weighting + residual + ReLU."""
    logits = att_ref[0]                                              # (B, TM), branches on sublanes
    m = jnp.max(logits, axis=0, keepdims=True)
    e = jnp.exp(logits - m)
    denom = jnp.sum(e, axis=0, keepdims=True)
    inv = pl.reciprocal(denom, approx=True)                          # EUP slot
    inv = inv * (2.0 - denom * inv)                                  # one Newton step -> f32
    s = s_ref[...]
    t = t_ref[...]
    acc = r_ref[0]
    for i in range(num_branches):
        y = y_ref[0, i] * s[i] + t[i]                                # (C, TM) BN affine
        acc = acc + y * (e[i:i + 1, :] * inv)
    o_ref[0] = jnp.maximum(acc, 0.0).astype(o_ref.dtype)


# ------------------------------ wrappers -------------------------------------

def conv1_streamed(x_flat, coords, weight, bias, dilation, padding, dims, vmem_limit):
    """x_flat: (N, Cin, M) -> y (N, Cout, M), per-(n, channel) sum / sum-of-squares."""
    N, Cin, M = x_flat.shape
    Cout = weight.shape[0]
    D, H, W = dims
    pad = _round_up(_flat_halo(dilation, padding, H, W), 128)
    w_t = jnp.transpose(weight, (2, 3, 4, 0, 1)).reshape(27, Cout, Cin)
    kern = functools.partial(_conv1_kernel, dims=dims, dilation=dilation,
                             padding=padding, pad=pad)
    y, s, q = pl.pallas_call(
        kern,
        out_shape=(jax.ShapeDtypeStruct((N, Cout, M), jnp.float32),
                   jax.ShapeDtypeStruct((N, Cout, 1), jnp.float32),
                   jax.ShapeDtypeStruct((N, Cout, 1), jnp.float32)),
        grid_spec=pltpu.PrefetchScalarGridSpec(
            num_scalar_prefetch=0,
            grid=(N,),
            in_specs=[pl.BlockSpec((1, Cin, M), lambda n: (n, 0, 0)),
                      pl.BlockSpec((3, M), lambda n: (0, 0)),
                      pl.BlockSpec((27, Cout, Cin), lambda n: (0, 0, 0)),
                      pl.BlockSpec((Cout, 1), lambda n: (0, 0))],
            out_specs=(pl.BlockSpec((1, Cout, M), lambda n: (n, 0, 0)),
                       pl.BlockSpec((1, Cout, 1), lambda n: (n, 0, 0)),
                       pl.BlockSpec((1, Cout, 1), lambda n: (n, 0, 0))),
            scratch_shapes=[pltpu.VMEM((Cin, M + 2 * pad), jnp.float32)]),
        compiler_params=pltpu.CompilerParams(
            dimension_semantics=("parallel",),
            vmem_limit_bytes=vmem_limit),
    )(x_flat, coords, w_t, bias.reshape(Cout, 1).astype(jnp.float32))
    return y, s[..., 0], q[..., 0]


def branches_and_attention(y1, scale1, shift1, coords, conv2_w, conv2_b,
                           att1_w, att1_b, att2_w, att2_b,
                           dilations, paddings, dims, vmem_limit):
    """One kernel: bn1+ReLU -> attention logits + all dilated conv2 branches (+ BN partials)."""
    N, C1, M = y1.shape
    D, H, W = dims
    C2 = conv2_w.shape[0]
    Ch = att1_w.shape[0]
    Bn = att2_w.shape[0]
    Bv = len(dilations)
    pad = _round_up(max([_flat_halo(1, 1, H, W)] +
                        [_flat_halo(d, p, H, W) for d, p in zip(dilations, paddings)]), 128)
    w2t = jnp.transpose(conv2_w, (2, 3, 4, 0, 1)).reshape(27, C2, C1)
    wa1t = jnp.transpose(att1_w, (2, 3, 4, 0, 1)).reshape(27, Ch, C1)
    wa2 = att2_w.reshape(Bn, Ch)
    kern = functools.partial(_branches_attention_kernel, dims=dims,
                             dilations=tuple(dilations), paddings=tuple(paddings), pad=pad)
    return pl.pallas_call(
        kern,
        out_shape=(jax.ShapeDtypeStruct((N, Bv, C2, M), jnp.float32),
                   jax.ShapeDtypeStruct((N, Bv, C2, 1), jnp.float32),
                   jax.ShapeDtypeStruct((N, Bv, C2, 1), jnp.float32),
                   jax.ShapeDtypeStruct((N, Bn, M), jnp.float32)),
        grid_spec=pltpu.PrefetchScalarGridSpec(
            num_scalar_prefetch=0,
            grid=(N,),
            in_specs=[pl.BlockSpec((1, C1, M), lambda n: (n, 0, 0)),
                      pl.BlockSpec((3, M), lambda n: (0, 0)),
                      pl.BlockSpec((C1, 1), lambda n: (0, 0)),
                      pl.BlockSpec((C1, 1), lambda n: (0, 0)),
                      pl.BlockSpec((27, C2, C1), lambda n: (0, 0, 0)),
                      pl.BlockSpec((C2, 1), lambda n: (0, 0)),
                      pl.BlockSpec((27, Ch, C1), lambda n: (0, 0, 0)),
                      pl.BlockSpec((Ch, 1), lambda n: (0, 0)),
                      pl.BlockSpec((Bn, Ch), lambda n: (0, 0)),
                      pl.BlockSpec((Bn, 1), lambda n: (0, 0))],
            out_specs=(pl.BlockSpec((1, Bv, C2, M), lambda n: (n, 0, 0, 0)),
                       pl.BlockSpec((1, Bv, C2, 1), lambda n: (n, 0, 0, 0)),
                       pl.BlockSpec((1, Bv, C2, 1), lambda n: (n, 0, 0, 0)),
                       pl.BlockSpec((1, Bn, M), lambda n: (n, 0, 0))),
            scratch_shapes=[pltpu.VMEM((C1, M + 2 * pad), jnp.float32)]),
        compiler_params=pltpu.CompilerParams(
            dimension_semantics=("parallel",),
            vmem_limit_bytes=vmem_limit),
    )(y1, coords,
      scale1.reshape(C1, 1).astype(jnp.float32),
      shift1.reshape(C1, 1).astype(jnp.float32),
      w2t, conv2_b.reshape(C2, 1).astype(jnp.float32),
      wa1t, att1_b.reshape(Ch, 1).astype(jnp.float32),
      wa2, att2_b.reshape(Bn, 1).astype(jnp.float32))


def combine_branches(ys, att_logits, scales, shifts, residual, vmem_limit):
    """relu(sum_i BN_i(branch_i) * softmax(att)[i] + residual). ys: (N, B, C, M)."""
    N, Bn, C, M = ys.shape
    Cr = residual.shape[1]
    bytes_per_m = 2 * 4 * (Bn * C + Bn + Cr + C)       # double-buffered f32 in+out per lane column
    TM = _choose_tm(M, bytes_per_m, vmem_limit // 2)
    Mt = M // TM
    return pl.pallas_call(
        functools.partial(_combine_kernel, num_branches=Bn),
        out_shape=jax.ShapeDtypeStruct((N, C, M), residual.dtype),
        grid_spec=pl.GridSpec(
            grid=(N, Mt),
            in_specs=[pl.BlockSpec((1, Bn, C, TM), lambda n, m: (n, 0, 0, m)),
                      pl.BlockSpec((1, Bn, TM), lambda n, m: (n, 0, m)),
                      pl.BlockSpec((Bn, C, 1), lambda n, m: (0, 0, 0)),
                      pl.BlockSpec((Bn, C, 1), lambda n, m: (0, 0, 0)),
                      pl.BlockSpec((1, C, TM), lambda n, m: (n, 0, m))],
            out_specs=pl.BlockSpec((1, C, TM), lambda n, m: (n, 0, m))),
        compiler_params=pltpu.CompilerParams(
            dimension_semantics=("parallel", "parallel"),
            vmem_limit_bytes=vmem_limit),
    )(ys, att_logits,
      scales.reshape(Bn, C, 1).astype(jnp.float32),
      shifts.reshape(Bn, C, 1).astype(jnp.float32),
      residual)


def _bn_affine_from_stats(sums, sumsqs, count, eps=1e-5):
    """Training-mode BatchNorm3d affine (gamma=1, beta=0) from per-sample partial sums."""
    total = jnp.sum(sums, axis=0)
    total_sq = jnp.sum(sumsqs, axis=0)
    mean = total / count
    var = total_sq / count - mean * mean              # biased (single-pass) variance
    scale = lax.rsqrt(var + eps)
    return scale, -mean * scale


# --------------------------- module forward ----------------------------------

def autofocus_single_forward(x, params, padding_list, dilation_list, num_branches):
    """x: (N, Cin, D, H, W), PyTorch NCDHW layout. Mirrors Autofocus_single.forward."""
    N, Cin, D, H, W = x.shape
    M = D * H * W
    dims = (D, H, W)
    K = params["conv1_w"].shape[2]
    if K != 3:
        raise ValueError("streamed tap kernels assume kernel_size == 3")
    vmem_limit = _vmem_budget_bytes()

    dils = [dilation_list[i] for i in range(num_branches)]
    pads = [2] + [padding_list[i] for i in range(1, num_branches)]   # module hardcodes pad=2 on conv2
    for d_, p_ in [(2, 2), (1, 1)] + list(zip(dils, pads)):
        if 2 * p_ != d_ * (K - 1):
            raise ValueError("padding/dilation combination does not preserve spatial size")

    x_flat = x.reshape(N, Cin, M)
    coords = _make_coords(D, H, W)

    # conv1 (k=3, d=2, p=2) streamed, with fused bias + BN batch-stat partials.
    y1, s1, q1 = conv1_streamed(x_flat, coords, params["conv1_w"], params["conv1_b"],
                                2, 2, dims, vmem_limit)
    scale1, shift1 = _bn_affine_from_stats(s1, q1, N * M)

    # ONE kernel: bn1 affine+ReLU -> attention logits + every dilated conv2 branch (+ stats).
    y2, s2, q2, att_logits = branches_and_attention(
        y1, scale1, shift1, coords, params["conv2_w"], params["conv2_b"],
        params["att1_w"], params["att1_b"], params["att2_w"], params["att2_b"],
        dils, pads, dims, vmem_limit)
    scale2, shift2 = _bn_affine_from_stats(s2, q2, N * M)             # (Bv, C2)

    out = combine_branches(y2, att_logits, scale2, shift2, x_flat, vmem_limit)
    return out.reshape(N, -1, D, H, W)


# --------------------------- pure-JAX reference -------------------------------

def _conv3d_ref(x_ncdhw, w_oidhw, b, dilation, padding):
    out = lax.conv_general_dilated(
        x_ncdhw, w_oidhw, window_strides=(1, 1, 1),
        padding=[(padding, padding)] * 3, rhs_dilation=(dilation,) * 3,
        dimension_numbers=("NCDHW", "OIDHW", "NCDHW"))
    if b is not None:
        out = out + b.reshape(1, -1, 1, 1, 1)
    return out


def _bn_ref(x_ncdhw):
    m = jnp.mean(x_ncdhw, axis=(0, 2, 3, 4), keepdims=True)
    v = jnp.mean((x_ncdhw - m) ** 2, axis=(0, 2, 3, 4), keepdims=True)
    return (x_ncdhw - m) / jnp.sqrt(v + 1e-5)


def reference_forward(x_ncdhw, params, padding_list, dilation_list, num_branches):
    residual = x_ncdhw
    h = _conv3d_ref(x_ncdhw, params["conv1_w"], params["conv1_b"], 2, 2)
    h = jnp.maximum(_bn_ref(h), 0.0)
    a = jnp.maximum(_conv3d_ref(h, params["att1_w"], params["att1_b"], 1, 1), 0.0)
    att = jax.nn.softmax(_conv3d_ref(a, params["att2_w"], params["att2_b"], 1, 0), axis=1)
    x1 = _conv3d_ref(h, params["conv2_w"], params["conv2_b"], dilation_list[0], 2)
    x1 = _bn_ref(x1) * att[:, 0:1]
    for i in range(1, num_branches):
        x2 = _conv3d_ref(h, params["conv2_w"], None, dilation_list[i], padding_list[i])
        x1 = x1 + _bn_ref(x2) * att[:, i:i + 1]
    return jnp.maximum(x1 + residual, 0.0)


# ------------------------------- main -----------------------------------------

if __name__ == "__main__":
    # Module config: inplanes1 == outplanes2 (residual add requires it), even outplanes1.
    inplanes1, outplanes1, outplanes2 = 4, 4, 4
    num_branches = 2
    padding_list = [2, 4]
    dilation_list = [2, 4]
    K = 3
    N, D, H, W = 2, 8, 8, 8

    key = jax.random.PRNGKey(0)
    ks = jax.random.split(key, 9)
    # Weights stored in PyTorch (Cout, Cin, Kd, Kh, Kw) layout.
    params = {
        "conv1_w": 0.01 * jax.random.normal(ks[0], (outplanes1, inplanes1, K, K, K), jnp.float32),
        "conv1_b": 0.05 * jax.random.normal(ks[1], (outplanes1,), jnp.float32),
        "conv2_w": 0.01 * jax.random.normal(ks[2], (outplanes2, outplanes1, K, K, K), jnp.float32),
        "conv2_b": 0.05 * jax.random.normal(ks[3], (outplanes2,), jnp.float32),
        "att1_w": 0.01 * jax.random.normal(ks[4], (outplanes1 // 2, outplanes1, K, K, K), jnp.float32),
        "att1_b": 0.05 * jax.random.normal(ks[5], (outplanes1 // 2,), jnp.float32),
        "att2_w": 0.01 * jax.random.normal(ks[6], (num_branches, outplanes1 // 2, 1, 1, 1), jnp.float32),
        "att2_b": 0.05 * jax.random.normal(ks[7], (num_branches,), jnp.float32),
    }

    x_ncdhw = jax.random.normal(ks[8], (N, inplanes1, D, H, W), jnp.float32)

    out = autofocus_single_forward(x_ncdhw, params, padding_list, dilation_list, num_branches)
    out = jax.block_until_ready(out)

    ref = reference_forward(x_ncdhw, params, padding_list, dilation_list, num_branches)

    err = float(jnp.max(jnp.abs(out - ref)))
    # 5e-4: headroom for the EUP approx-reciprocal (+Newton) softmax denominator and the
    # single-pass E[x^2]-E[x]^2 BatchNorm variance.
    assert err < 5e-4, f"max abs error too large: {err}"
    print("KERNEL_OK")
</pallas_src>

<mosaic_0001>
module attributes {stable_mosaic.version = 11 : i64} {
  func.func @_conv1_kernel(%arg0: i32, %arg1: memref<1x4x512xf32, #tpu.memory_space<vmem>>, %arg2: memref<3x512xi32, #tpu.memory_space<vmem>>, %arg3: memref<27x4x4xf32, #tpu.memory_space<vmem>>, %arg4: memref<4x1xf32, #tpu.memory_space<vmem>>, %arg5: memref<1x4x512xf32, #tpu.memory_space<vmem>>, %arg6: memref<1x4x1xf32, #tpu.memory_space<vmem>>, %arg7: memref<1x4x1xf32, #tpu.memory_space<vmem>>, %arg8: memref<4x1024xf32, #tpu.memory_space<vmem>>) attributes {dimension_semantics = [#tpu.dimension_semantics<parallel>], iteration_bounds = array<i64: 2>, scalar_prefetch = 0 : i64, scratch_operands = 1 : i64, tpu.core_type = #tpu.core_type<tc>, window_params = [{transform_indices = @transform_0, window_bounds = array<i64: 1, 4, 512>}, {pipeline_mode = #tpu.pipeline_mode<synchronous>, transform_indices = @transform_1, window_bounds = array<i64: 3, 512>}, {pipeline_mode = #tpu.pipeline_mode<synchronous>, transform_indices = @transform_2, window_bounds = array<i64: 27, 4, 4>}, {pipeline_mode = #tpu.pipeline_mode<synchronous>, transform_indices = @transform_3, window_bounds = array<i64: 4, 1>}, {transform_indices = @transform_4, window_bounds = array<i64: 1, 4, 512>}, {transform_indices = @transform_5, window_bounds = array<i64: 1, 4, 1>}, {transform_indices = @transform_6, window_bounds = array<i64: 1, 4, 1>}]} {
    %c0 = arith.constant 0 : index
    %c0_0 = arith.constant 0 : index
    %0 = vector.load %arg2[%c0, %c0_0] : memref<3x512xi32, #tpu.memory_space<vmem>>, vector<1x512xi32>
    %c1 = arith.constant 1 : index
    %c0_1 = arith.constant 0 : index
    %1 = vector.load %arg2[%c1, %c0_1] : memref<3x512xi32, #tpu.memory_space<vmem>>, vector<1x512xi32>
    %c2 = arith.constant 2 : index
    %c0_2 = arith.constant 0 : index
    %2 = vector.load %arg2[%c2, %c0_2] : memref<3x512xi32, #tpu.memory_space<vmem>>, vector<1x512xi32>
    %cst = arith.constant 0.000000e+00 : f32
    %3 = vector.broadcast %cst : f32 to vector<4x1024xf32>
    %c0_3 = arith.constant 0 : index
    %c0_4 = arith.constant 0 : index
    %4 = vector.load %arg8[%c0_3, %c0_4] : memref<4x1024xf32, #tpu.memory_space<vmem>>, vector<4x1024xf32>
    tpu.vector_store %arg8[%c0_3, %c0_4], %3 {strides = array<i32>} : memref<4x1024xf32, #tpu.memory_space<vmem>>, vector<4x1024xf32>,
    %c0_5 = arith.constant 0 : index
    %c0_6 = arith.constant 0 : index
    %c0_7 = arith.constant 0 : index
    %5 = vector.load %arg1[%c0_5, %c0_6, %c0_7] : memref<1x4x512xf32, #tpu.memory_space<vmem>>, vector<1x4x512xf32>
    %6 = vector.shape_cast %5 : vector<1x4x512xf32> to vector<4x512xf32>
    %c0_8 = arith.constant 0 : index
    %c256 = arith.constant 256 : index
    %7 = vector.load %arg8[%c0_8, %c256] : memref<4x1024xf32, #tpu.memory_space<vmem>>, vector<4x512xf32>
    tpu.vector_store %arg8[%c0_8, %c256], %6 {strides = array<i32>} : memref<4x1024xf32, #tpu.memory_space<vmem>>, vector<4x512xf32>,
    %c0_9 = arith.constant 0 : index
    %c0_10 = arith.constant 0 : index
    %8 = vector.load %arg8[%c0_9, %c0_10] : memref<4x1024xf32, #tpu.memory_space<vmem>>, vector<4x1024xf32>
    %9 = vector.extract_strided_slice %8 {offsets = [0, 110], sizes = [4, 512], strides = [1, 1]} : vector<4x1024xf32> to vector<4x512xf32>
    %c-2_i32 = arith.constant -2 : i32
    %10 = vector.broadcast %c-2_i32 : i32 to vector<1x512xi32>
    %11 = arith.addi %0, %10 : vector<1x512xi32>
    %c0_i32 = arith.constant 0 : i32
    %12 = vector.broadcast %c0_i32 : i32 to vector<1x512xi32>
    %13 = arith.cmpi sge, %11, %12 : vector<1x512xi32>
    %c-2_i32_11 = arith.constant -2 : i32
    %14 = vector.broadcast %c-2_i32_11 : i32 to vector<1x512xi32>
    %15 = arith.addi %0, %14 : vector<1x512xi32>
    %c8_i32 = arith.constant 8 : i32
    %16 = vector.broadcast %c8_i32 : i32 to vector<1x512xi32>
    %17 = arith.cmpi slt, %15, %16 : vector<1x512xi32>
    %18 = arith.andi %13, %17 : vector<1x512xi1>
    %c-2_i32_12 = arith.constant -2 : i32
    %19 = vector.broadcast %c-2_i32_12 : i32 to vector<1x512xi32>
    %20 = arith.addi %1, %19 : vector<1x512xi32>
    %c0_i32_13 = arith.constant 0 : i32
    %21 = vector.broadcast %c0_i32_13 : i32 to vector<1x512xi32>
    %22 = arith.cmpi sge, %20, %21 : vector<1x512xi32>
    %c-2_i32_14 = arith.constant -2 : i32
    %23 = vector.broadcast %c-2_i32_14 : i32 to vector<1x512xi32>
    %24 = arith.addi %1, %23 : vector<1x512xi32>
    %c8_i32_15 = arith.constant 8 : i32
    %25 = vector.broadcast %c8_i32_15 : i32 to vector<1x512xi32>
    %26 = arith.cmpi slt, %24, %25 : vector<1x512xi32>
    %27 = arith.andi %22, %26 : vector<1x512xi1>
    %c-2_i32_16 = arith.constant -2 : i32
    %28 = vector.broadcast %c-2_i32_16 : i32 to vector<1x512xi32>
    %29 = arith.addi %2, %28 : vector<1x512xi32>
    %c0_i32_17 = arith.constant 0 : i32
    %30 = vector.broadcast %c0_i32_17 : i32 to vector<1x512xi32>
    %31 = arith.cmpi sge, %29, %30 : vector<1x512xi32>
    %c-2_i32_18 = arith.constant -2 : i32
    %32 = vector.broadcast %c-2_i32_18 : i32 to vector<1x512xi32>
    %33 = arith.addi %2, %32 : vector<1x512xi32>
    %c8_i32_19 = arith.constant 8 : i32
    %34 = vector.broadcast %c8_i32_19 : i32 to vector<1x512xi32>
    %35 = arith.cmpi slt, %33, %34 : vector<1x512xi32>
    %36 = arith.andi %31, %35 : vector<1x512xi1>
    %37 = arith.andi %18, %27 : vector<1x512xi1>
    %38 = arith.andi %37, %36 : vector<1x512xi1>
    %cst_20 = arith.constant 0.000000e+00 : f32
    %39 = vector.shape_cast %38 : vector<1x512xi1> to vector<1x512xi1>
    %40 = vector.broadcast %39 : vector<1x512xi1> to vector<4x512xi1>
    %41 = vector.broadcast %cst_20 : f32 to vector<4x512xf32>
    %42 = arith.select %40, %9, %41 : vector<4x512xi1>, vector<4x512xf32>
    %c0_21 = arith.constant 0 : index
    %c0_22 = arith.constant 0 : index
    %c0_23 = arith.constant 0 : index
    %43 = vector.load %arg3[%c0_21, %c0_22, %c0_23] : memref<27x4x4xf32, #tpu.memory_space<vmem>>, vector<1x4x4xf32>
    %44 = vector.shape_cast %43 : vector<1x4x4xf32> to vector<4x4xf32>
    %cst_24 = arith.constant dense<0.000000e+00> : vector<4x512xf32>
    %45 = tpu.matmul %44, %42, %cst_24 {dimension_numbers = #tpu.dot_dimension_numbers<[1], [0], [0], [1], [0, 0, 1, 1], [], []>} : vector<4x4xf32>, vector<4x512xf32>, vector<4x512xf32> -> vector<4x512xf32>
    %46 = vector.extract_strided_slice %8 {offsets = [0, 112], sizes = [4, 512], strides = [1, 1]} : vector<4x1024xf32> to vector<4x512xf32>
    %c-2_i32_25 = arith.constant -2 : i32
    %47 = vector.broadcast %c-2_i32_25 : i32 to vector<1x512xi32>
    %48 = arith.addi %0, %47 : vector<1x512xi32>
    %c0_i32_26 = arith.constant 0 : i32
    %49 = vector.broadcast %c0_i32_26 : i32 to vector<1x512xi32>
    %50 = arith.cmpi sge, %48, %49 : vector<1x512xi32>
    %c-2_i32_27 = arith.constant -2 : i32
    %51 = vector.broadcast %c-2_i32_27 : i32 to vector<1x512xi32>
    %52 = arith.addi %0, %51 : vector<1x512xi32>
    %c8_i32_28 = arith.constant 8 : i32
    %53 = vector.broadcast %c8_i32_28 : i32 to vector<1x512xi32>
    %54 = arith.cmpi slt, %52, %53 : vector<1x512xi32>
    %55 = arith.andi %50, %54 : vector<1x512xi1>
    %c-2_i32_29 = arith.constant -2 : i32
    %56 = vector.broadcast %c-2_i32_29 : i32 to vector<1x512xi32>
    %57 = arith.addi %1, %56 : vector<1x512xi32>
    %c0_i32_30 = arith.constant 0 : i32
    %58 = vector.broadcast %c0_i32_30 : i32 to vector<1x512xi32>
    %59 = arith.cmpi sge, %57, %58 : vector<1x512xi32>
    %c-2_i32_31 = arith.constant -2 : i32
    %60 = vector.broadcast %c-2_i32_31 : i32 to vector<1x512xi32>
    %61 = arith.addi %1, %60 : vector<1x512xi32>
    %c8_i32_32 = arith.constant 8 : i32
    %62 = vector.broadcast %c8_i32_32 : i32 to vector<1x512xi32>
    %63 = arith.cmpi slt, %61, %62 : vector<1x512xi32>
    %64 = arith.andi %59, %63 : vector<1x512xi1>
    %65 = arith.andi %55, %64 : vector<1x512xi1>
    %cst_33 = arith.constant 0.000000e+00 : f32
    %66 = vector.shape_cast %65 : vector<1x512xi1> to vector<1x512xi1>
    %67 = vector.broadcast %66 : vector<1x512xi1> to vector<4x512xi1>
    %68 = vector.broadcast %cst_33 : f32 to vector<4x512xf32>
    %69 = arith.select %67, %46, %68 : vector<4x512xi1>, vector<4x512xf32>
    %c1_34 = arith.constant 1 : index
    %c0_35 = arith.constant 0 : index
    %c0_36 = arith.constant 0 : index
    %70 = vector.load %arg3[%c1_34, %c0_35, %c0_36] : memref<27x4x4xf32, #tpu.memory_space<vmem>>, vector<1x4x4xf32>
    %71 = vector.shape_cast %70 : vector<1x4x4xf32> to vector<4x4xf32>
    %cst_37 = arith.constant dense<0.000000e+00> : vector<4x512xf32>
    %72 = tpu.matmul %71, %69, %cst_37 {dimension_numbers = #tpu.dot_dimension_numbers<[1], [0], [0], [1], [0, 0, 1, 1], [], []>} : vector<4x4xf32>, vector<4x512xf32>, vector<4x512xf32> -> vector<4x512xf32>
    %73 = arith.addf %45, %72 : vector<4x512xf32>
    %74 = vector.extract_strided_slice %8 {offsets = [0, 114], sizes = [4, 512], strides = [1, 1]} : vector<4x1024xf32> to vector<4x512xf32>
    %c-2_i32_38 = arith.constant -2 : i32
    %75 = vector.broadcast %c-2_i32_38 : i32 to vector<1x512xi32>
    %76 = arith.addi %0, %75 : vector<1x512xi32>
    %c0_i32_39 = arith.constant 0 : i32
    %77 = vector.broadcast %c0_i32_39 : i32 to vector<1x512xi32>
    %78 = arith.cmpi sge, %76, %77 : vector<1x512xi32>
    %c-2_i32_40 = arith.constant -2 : i32
    %79 = vector.broadcast %c-2_i32_40 : i32 to vector<1x512xi32>
    %80 = arith.addi %0, %79 : vector<1x512xi32>
    %c8_i32_41 = arith.constant 8 : i32
    %81 = vector.broadcast %c8_i32_41 : i32 to vector<1x512xi32>
    %82 = arith.cmpi slt, %80, %81 : vector<1x512xi32>
    %83 = arith.andi %78, %82 : vector<1x512xi1>
    %c-2_i32_42 = arith.constant -2 : i32
    %84 = vector.broadcast %c-2_i32_42 : i32 to vector<1x512xi32>
    %85 = arith.addi %1, %84 : vector<1x512xi32>
    %c0_i32_43 = arith.constant 0 : i32
    %86 = vector.broadcast %c0_i32_43 : i32 to vector<1x512xi32>
    %87 = arith.cmpi sge, %85, %86 : vector<1x512xi32>
    %c-2_i32_44 = arith.constant -2 : i32
    %88 = vector.broadcast %c-2_i32_44 : i32 to vector<1x512xi32>
    %89 = arith.addi %1, %88 : vector<1x512xi32>
    %c8_i32_45 = arith.constant 8 : i32
    %90 = vector.broadcast %c8_i32_45 : i32 to vector<1x512xi32>
    %91 = arith.cmpi slt, %89, %90 : vector<1x512xi32>
    %92 = arith.andi %87, %91 : vector<1x512xi1>
    %c2_i32 = arith.constant 2 : i32
    %93 = vector.broadcast %c2_i32 : i32 to vector<1x512xi32>
    %94 = arith.addi %2, %93 : vector<1x512xi32>
    %c0_i32_46 = arith.constant 0 : i32
    %95 = vector.broadcast %c0_i32_46 : i32 to vector<1x512xi32>
    %96 = arith.cmpi sge, %94, %95 : vector<1x512xi32>
    %c2_i32_47 = arith.constant 2 : i32
    %97 = vector.broadcast %c2_i32_47 : i32 to vector<1x512xi32>
    %98 = arith.addi %2, %97 : vector<1x512xi32>
    %c8_i32_48 = arith.constant 8 : i32
    %99 = vector.broadcast %c8_i32_48 : i32 to vector<1x512xi32>
    %100 = arith.cmpi slt, %98, %99 : vector<1x512xi32>
    %101 = arith.andi %96, %100 : vector<1x512xi1>
    %102 = arith.andi %83, %92 : vector<1x512xi1>
    %103 = arith.andi %102, %101 : vector<1x512xi1>
    %cst_49 = arith.constant 0.000000e+00 : f32
    %104 = vector.shape_cast %103 : vector<1x512xi1> to vector<1x512xi1>
    %105 = vector.broadcast %104 : vector<1x512xi1> to vector<4x512xi1>
    %106 = vector.broadcast %cst_49 : f32 to vector<4x512xf32>
    %107 = arith.select %105, %74, %106 : vector<4x512xi1>, vector<4x512xf32>
    %c2_50 = arith.constant 2 : index
    %c0_51 = arith.constant 0 : index
    %c0_52 = arith.constant 0 : index
    %108 = vector.load %arg3[%c2_50, %c0_51, %c0_52] : memref<27x4x4xf32, #tpu.memory_space<vmem>>, vector<1x4x4xf32>
    %109 = vector.shape_cast %108 : vector<1x4x4xf32> to vector<4x4xf32>
    %cst_53 = arith.constant dense<0.000000e+00> : vector<4x512xf32>
    %110 = tpu.matmul %109, %107, %cst_53 {dimension_numbers = #tpu.dot_dimension_numbers<[1], [0], [0], [1], [0, 0, 1, 1], [], []>} : vector<4x4xf32>, vector<4x512xf32>, vector<4x512xf32> -> vector<4x512xf32>
    %111 = arith.addf %73, %110 : vector<4x512xf32>
    %112 = vector.extract_strided_slice %8 {offsets = [0, 126], sizes = [4, 512], strides = [1, 1]} : vector<4x1024xf32> to vector<4x512xf32>
    %c-2_i32_54 = arith.constant -2 : i32
    %113 = vector.broadcast %c-2_i32_54 : i32 to vector<1x512xi32>
    %114 = arith.addi %0, %113 : vector<1x512xi32>
    %c0_i32_55 = arith.constant 0 : i32
    %115 = vector.broadcast %c0_i32_55 : i32 to vector<1x512xi32>
    %116 = arith.cmpi sge, %114, %115 : vector<1x512xi32>
    %c-2_i32_56 = arith.constant -2 : i32
    %117 = vector.broadcast %c-2_i32_56 : i32 to vector<1x512xi32>
    %118 = arith.addi %0, %117 : vector<1x512xi32>
    %c8_i32_57 = arith.constant 8 : i32
    %119 = vector.broadcast %c8_i32_57 : i32 to vector<1x512xi32>
    %120 = arith.cmpi slt, %118, %119 : vector<1x512xi32>
    %121 = arith.andi %116, %120 : vector<1x512xi1>
    %c-2_i32_58 = arith.constant -2 : i32
    %122 = vector.broadcast %c-2_i32_58 : i32 to vector<1x512xi32>
    %123 = arith.addi %2, %122 : vector<1x512xi32>
    %c0_i32_59 = arith.constant 0 : i32
    %124 = vector.broadcast %c0_i32_59 : i32 to vector<1x512xi32>
    %125 = arith.cmpi sge, %123, %124 : vector<1x512xi32>
    %c-2_i32_60 = arith.constant -2 : i32
    %126 = vector.broadcast %c-2_i32_60 : i32 to vector<1x512xi32>
    %127 = arith.addi %2, %126 : vector<1x512xi32>
    %c8_i32_61 = arith.constant 8 : i32
    %128 = vector.broadcast %c8_i32_61 : i32 to vector<1x512xi32>
    %129 = arith.cmpi slt, %127, %128 : vector<1x512xi32>
    %130 = arith.andi %125, %129 : vector<1x512xi1>
    %131 = arith.andi %121, %130 : vector<1x512xi1>
    %cst_62 = arith.constant 0.000000e+00 : f32
    %132 = vector.shape_cast %131 : vector<1x512xi1> to vector<1x512xi1>
    %133 = vector.broadcast %132 : vector<1x512xi1> to vector<4x512xi1>
    %134 = vector.broadcast %cst_62 : f32 to vector<4x512xf32>
    %135 = arith.select %133, %112, %134 : vector<4x512xi1>, vector<4x512xf32>
    %c3 = arith.constant 3 : index
    %c0_63 = arith.constant 0 : index
    %c0_64 = arith.constant 0 : index
    %136 = vector.load %arg3[%c3, %c0_63, %c0_64] : memref<27x4x4xf32, #tpu.memory_space<vmem>>, vector<1x4x4xf32>
    %137 = vector.shape_cast %136 : vector<1x4x4xf32> to vector<4x4xf32>
    %cst_65 = arith.constant dense<0.000000e+00> : vector<4x512xf32>
    %138 = tpu.matmul %137, %135, %cst_65 {dimension_numbers = #tpu.dot_dimension_numbers<[1], [0], [0], [1], [0, 0, 1, 1], [], []>} : vector<4x4xf32>, vector<4x512xf32>, vector<4x512xf32> -> vector<4x512xf32>
    %139 = arith.addf %111, %138 : vector<4x512xf32>
    %140 = vector.extract_strided_slice %8 {offsets = [0, 128], sizes = [4, 512], strides = [1, 1]} : vector<4x1024xf32> to vector<4x512xf32>
    %c-2_i32_66 = arith.constant -2 : i32
    %141 = vector.broadcast %c-2_i32_66 : i32 to vector<1x512xi32>
    %142 = arith.addi %0, %141 : vector<1x512xi32>
    %c0_i32_67 = arith.constant 0 : i32
    %143 = vector.broadcast %c0_i32_67 : i32 to vector<1x512xi32>
    %144 = arith.cmpi sge, %142, %143 : vector<1x512xi32>
    %c-2_i32_68 = arith.constant -2 : i32
    %145 = vector.broadcast %c-2_i32_68 : i32 to vector<1x512xi32>
    %146 = arith.addi %0, %145 : vector<1x512xi32>
    %c8_i32_69 = arith.constant 8 : i32
    %147 = vector.broadcast %c8_i32_69 : i32 to vector<1x512xi32>
    %148 = arith.cmpi slt, %146, %147 : vector<1x512xi32>
    %149 = arith.andi %144, %148 : vector<1x512xi1>
    %cst_70 = arith.constant 0.000000e+00 : f32
    %150 = vector.shape_cast %149 : vector<1x512xi1> to vector<1x512xi1>
    %151 = vector.broadcast %150 : vector<1x512xi1> to vector<4x512xi1>
    %152 = vector.broadcast %cst_70 : f32 to vector<4x512xf32>
    %153 = arith.select %151, %140, %152 : vector<4x512xi1>, vector<4x512xf32>
    %c4 = arith.constant 4 : index
    %c0_71 = arith.constant 0 : index
    %c0_72 = arith.constant 0 : index
    %154 = vector.load %arg3[%c4, %c0_71, %c0_72] : memref<27x4x4xf32, #tpu.memory_space<vmem>>, vector<1x4x4xf32>
    %155 = vector.shape_cast %154 : vector<1x4x4xf32> to vector<4x4xf32>
    %cst_73 = arith.constant dense<0.000000e+00> : vector<4x512xf32>
    %156 = tpu.matmul %155, %153, %cst_73 {dimension_numbers = #tpu.dot_dimension_numbers<[1], [0], [0], [1], [0, 0, 1, 1], [], []>} : vector<4x4xf32>, vector<4x512xf32>, vector<4x512xf32> -> vector<4x512xf32>
    %157 = arith.addf %139, %156 : vector<4x512xf32>
    %158 = vector.extract_strided_slice %8 {offsets = [0, 130], sizes = [4, 512], strides = [1, 1]} : vector<4x1024xf32> to vector<4x512xf32>
    %c-2_i32_74 = arith.constant -2 : i32
    %159 = vector.broadcast %c-2_i32_74 : i32 to vector<1x512xi32>
    %160 = arith.addi %0, %159 : vector<1x512xi32>
    %c0_i32_75 = arith.constant 0 : i32
    %161 = vector.broadcast %c0_i32_75 : i32 to vector<1x512xi32>
    %162 = arith.cmpi sge, %160, %161 : vector<1x512xi32>
    %c-2_i32_76 = arith.constant -2 : i32
    %163 = vector.broadcast %c-2_i32_76 : i32 to vector<1x512xi32>
    %164 = arith.addi %0, %163 : vector<1x512xi32>
    %c8_i32_77 = arith.constant 8 : i32
    %165 = vector.broadcast %c8_i32_77 : i32 to vector<1x512xi32>
    %166 = arith.cmpi slt, %164, %165 : vector<1x512xi32>
    %167 = arith.andi %162, %166 : vector<1x512xi1>
    %c2_i32_78 = arith.constant 2 : i32
    %168 = vector.broadcast %c2_i32_78 : i32 to vector<1x512xi32>
    %169 = arith.addi %2, %168 : vector<1x512xi32>
    %c0_i32_79 = arith.constant 0 : i32
    %170 = vector.broadcast %c0_i32_79 : i32 to vector<1x512xi32>
    %171 = arith.cmpi sge, %169, %170 : vector<1x512xi32>
    %c2_i32_80 = arith.constant 2 : i32
    %172 = vector.broadcast %c2_i32_80 : i32 to vector<1x512xi32>
    %173 = arith.addi %2, %172 : vector<1x512xi32>
    %c8_i32_81 = arith.constant 8 : i32
    %174 = vector.broadcast %c8_i32_81 : i32 to vector<1x512xi32>
    %175 = arith.cmpi slt, %173, %174 : vector<1x512xi32>
    %176 = arith.andi %171, %175 : vector<1x512xi1>
    %177 = arith.andi %167, %176 : vector<1x512xi1>
    %cst_82 = arith.constant 0.000000e+00 : f32
    %178 = vector.shape_cast %177 : vector<1x512xi1> to vector<1x512xi1>
    %179 = vector.broadcast %178 : vector<1x512xi1> to vector<4x512xi1>
    %180 = vector.broadcast %cst_82 : f32 to vector<4x512xf32>
    %181 = arith.select %179, %158, %180 : vector<4x512xi1>, vector<4x512xf32>
    %c5 = arith.constant 5 : index
    %c0_83 = arith.constant 0 : index
    %c0_84 = arith.constant 0 : index
    %182 = vector.load %arg3[%c5, %c0_83, %c0_84] : memref<27x4x4xf32, #tpu.memory_space<vmem>>, vector<1x4x4xf32>
    %183 = vector.shape_cast %182 : vector<1x4x4xf32> to vector<4x4xf32>
    %cst_85 = arith.constant dense<0.000000e+00> : vector<4x512xf32>
    %184 = tpu.matmul %183, %181, %cst_85 {dimension_numbers = #tpu.dot_dimension_numbers<[1], [0], [0], [1], [0, 0, 1, 1], [], []>} : vector<4x4xf32>, vector<4x512xf32>, vector<4x512xf32> -> vector<4x512xf32>
    %185 = arith.addf %157, %184 : vector<4x512xf32>
    %186 = vector.extract_strided_slice %8 {offsets = [0, 142], sizes = [4, 512], strides = [1, 1]} : vector<4x1024xf32> to vector<4x512xf32>
    %c-2_i32_86 = arith.constant -2 : i32
    %187 = vector.broadcast %c-2_i32_86 : i32 to vector<1x512xi32>
    %188 = arith.addi %0, %187 : vector<1x512xi32>
    %c0_i32_87 = arith.constant 0 : i32
    %189 = vector.broadcast %c0_i32_87 : i32 to vector<1x512xi32>
    %190 = arith.cmpi sge, %188, %189 : vector<1x512xi32>
    %c-2_i32_88 = arith.constant -2 : i32
    %191 = vector.broadcast %c-2_i32_88 : i32 to vector<1x512xi32>
    %192 = arith.addi %0, %191 : vector<1x512xi32>
    %c8_i32_89 = arith.constant 8 : i32
    %193 = vector.broadcast %c8_i32_89 : i32 to vector<1x512xi32>
    %194 = arith.cmpi slt, %192, %193 : vector<1x512xi32>
    %195 = arith.andi %190, %194 : vector<1x512xi1>
    %c2_i32_90 = arith.constant 2 : i32
    %196 = vector.broadcast %c2_i32_90 : i32 to vector<1x512xi32>
    %197 = arith.addi %1, %196 : vector<1x512xi32>
    %c0_i32_91 = arith.constant 0 : i32
    %198 = vector.broadcast %c0_i32_91 : i32 to vector<1x512xi32>
    %199 = arith.cmpi sge, %197, %198 : vector<1x512xi32>
    %c2_i32_92 = arith.constant 2 : i32
    %200 = vector.broadcast %c2_i32_92 : i32 to vector<1x512xi32>
    %201 = arith.addi %1, %200 : vector<1x512xi32>
    %c8_i32_93 = arith.constant 8 : i32
    %202 = vector.broadcast %c8_i32_93 : i32 to vector<1x512xi32>
    %203 = arith.cmpi slt, %201, %202 : vector<1x512xi32>
    %204 = arith.andi %199, %203 : vector<1x512xi1>
    %c-2_i32_94 = arith.constant -2 : i32
    %205 = vector.broadcast %c-2_i32_94 : i32 to vector<1x512xi32>
    %206 = arith.addi %2, %205 : vector<1x512xi32>
    %c0_i32_95 = arith.constant 0 : i32
    %207 = vector.broadcast %c0_i32_95 : i32 to vector<1x512xi32>
    %208 = arith.cmpi sge, %206, %207 : vector<1x512xi32>
    %c-2_i32_96 = arith.constant -2 : i32
    %209 = vector.broadcast %c-2_i32_96 : i32 to vector<1x512xi32>
    %210 = arith.addi %2, %209 : vector<1x512xi32>
    %c8_i32_97 = arith.constant 8 : i32
    %211 = vector.broadcast %c8_i32_97 : i32 to vector<1x512xi32>
    %212 = arith.cmpi slt, %210, %211 : vector<1x512xi32>
    %213 = arith.andi %208, %212 : vector<1x512xi1>
    %214 = arith.andi %195, %204 : vector<1x512xi1>
    %215 = arith.andi %214, %213 : vector<1x512xi1>
    %cst_98 = arith.constant 0.000000e+00 : f32
    %216 = vector.shape_cast %215 : vector<1x512xi1> to vector<1x512xi1>
    %217 = vector.broadcast %216 : vector<1x512xi1> to vector<4x512xi1>
    %218 = vector.broadcast %cst_98 : f32 to vector<4x512xf32>
    %219 = arith.select %217, %186, %218 : vector<4x512xi1>, vector<4x512xf32>
    %c6 = arith.constant 6 : index
    %c0_99 = arith.constant 0 : index
    %c0_100 = arith.constant 0 : index
    %220 = vector.load %arg3[%c6, %c0_99, %c0_100] : memref<27x4x4xf32, #tpu.memory_space<vmem>>, vector<1x4x4xf32>
    %221 = vector.shape_cast %220 : vector<1x4x4xf32> to vector<4x4xf32>
    %cst_101 = arith.constant dense<0.000000e+00> : vector<4x512xf32>
    %222 = tpu.matmul %221, %219, %cst_101 {dimension_numbers = #tpu.dot_dimension_numbers<[1], [0], [0], [1], [0, 0, 1, 1], [], []>} : vector<4x4xf32>, vector<4x512xf32>, vector<4x512xf32> -> vector<4x512xf32>
    %223 = arith.addf %185, %222 : vector<4x512xf32>
    %224 = vector.extract_strided_slice %8 {offsets = [0, 144], sizes = [4, 512], strides = [1, 1]} : vector<4x1024xf32> to vector<4x512xf32>
    %c-2_i32_102 = arith.constant -2 : i32
    %225 = vector.broadcast %c-2_i32_102 : i32 to vector<1x512xi32>
    %226 = arith.addi %0, %225 : vector<1x512xi32>
    %c0_i32_103 = arith.constant 0 : i32
    %227 = vector.broadcast %c0_i32_103 : i32 to vector<1x512xi32>
    %228 = arith.cmpi sge, %226, %227 : vector<1x512xi32>
    %c-2_i32_104 = arith.constant -2 : i32
    %229 = vector.broadcast %c-2_i32_104 : i32 to vector<1x512xi32>
    %230 = arith.addi %0, %229 : vector<1x512xi32>
    %c8_i32_105 = arith.constant 8 : i32
    %231 = vector.broadcast %c8_i32_105 : i32 to vector<1x512xi32>
    %232 = arith.cmpi slt, %230, %231 : vector<1x512xi32>
    %233 = arith.andi %228, %232 : vector<1x512xi1>
    %c2_i32_106 = arith.constant 2 : i32
    %234 = vector.broadcast %c2_i32_106 : i32 to vector<1x512xi32>
    %235 = arith.addi %1, %234 : vector<1x512xi32>
    %c0_i32_107 = arith.constant 0 : i32
    %236 = vector.broadcast %c0_i32_107 : i32 to vector<1x512xi32>
    %237 = arith.cmpi sge, %235, %236 : vector<1x512xi32>
    %c2_i32_108 = arith.constant 2 : i32
    %238 = vector.broadcast %c2_i32_108 : i32 to vector<1x512xi32>
    %239 = arith.addi %1, %238 : vector<1x512xi32>
    %c8_i32_109 = arith.constant 8 : i32
    %240 = vector.broadcast %c8_i32_109 : i32 to vector<1x512xi32>
    %241 = arith.cmpi slt, %239, %240 : vector<1x512xi32>
    %242 = arith.andi %237, %241 : vector<1x512xi1>
    %243 = arith.andi %233, %242 : vector<1x512xi1>
    %cst_110 = arith.constant 0.000000e+00 : f32
    %244 = vector.shape_cast %243 : vector<1x512xi1> to vector<1x512xi1>
    %245 = vector.broadcast %244 : vector<1x512xi1> to vector<4x512xi1>
    %246 = vector.broadcast %cst_110 : f32 to vector<4x512xf32>
    %247 = arith.select %245, %224, %246 : vector<4x512xi1>, vector<4x512xf32>
    %c7 = arith.constant 7 : index
    %c0_111 = arith.constant 0 : index
    %c0_112 = arith.constant 0 : index
    %248 = vector.load %arg3[%c7, %c0_111, %c0_112] : memref<27x4x4xf32, #tpu.memory_space<vmem>>, vector<1x4x4xf32>
    %249 = vector.shape_cast %248 : vector<1x4x4xf32> to vector<4x4xf32>
    %cst_113 = arith.constant dense<0.000000e+00> : vector<4x512xf32>
    %250 = tpu.matmul %249, %247, %cst_113 {dimension_numbers = #tpu.dot_dimension_numbers<[1], [0], [0], [1], [0, 0, 1, 1], [], []>} : vector<4x4xf32>, vector<4x512xf32>, vector<4x512xf32> -> vector<4x512xf32>
    %251 = arith.addf %223, %250 : vector<4x512xf32>
    %252 = vector.extract_strided_slice %8 {offsets = [0, 146], sizes = [4, 512], strides = [1, 1]} : vector<4x1024xf32> to vector<4x512xf32>
    %c-2_i32_114 = arith.constant -2 : i32
    %253 = vector.broadcast %c-2_i32_114 : i32 to vector<1x512xi32>
    %254 = arith.addi %0, %253 : vector<1x512xi32>
    %c0_i32_115 = arith.constant 0 : i32
    %255 = vector.broadcast %c0_i32_115 : i32 to vector<1x512xi32>
    %256 = arith.cmpi sge, %254, %255 : vector<1x512xi32>
    %c-2_i32_116 = arith.constant -2 : i32
    %257 = vector.broadcast %c-2_i32_116 : i32 to vector<1x512xi32>
    %258 = arith.addi %0, %257 : vector<1x512xi32>
    %c8_i32_117 = arith.constant 8 : i32
    %259 = vector.broadcast %c8_i32_117 : i32 to vector<1x512xi32>
    %260 = arith.cmpi slt, %258, %259 : vector<1x512xi32>
    %261 = arith.andi %256, %260 : vector<1x512xi1>
    %c2_i32_118 = arith.constant 2 : i32
    %262 = vector.broadcast %c2_i32_118 : i32 to vector<1x512xi32>
    %263 = arith.addi %1, %262 : vector<1x512xi32>
    %c0_i32_119 = arith.constant 0 : i32
    %264 = vector.broadcast %c0_i32_119 : i32 to vector<1x512xi32>
    %265 = arith.cmpi sge, %263, %264 : vector<1x512xi32>
    %c2_i32_120 = arith.constant 2 : i32
    %266 = vector.broadcast %c2_i32_120 : i32 to vector<1x512xi32>
    %267 = arith.addi %1, %266 : vector<1x512xi32>
    %c8_i32_121 = arith.constant 8 : i32
    %268 = vector.broadcast %c8_i32_121 : i32 to vector<1x512xi32>
    %269 = arith.cmpi slt, %267, %268 : vector<1x512xi32>
    %270 = arith.andi %265, %269 : vector<1x512xi1>
    %c2_i32_122 = arith.constant 2 : i32
    %271 = vector.broadcast %c2_i32_122 : i32 to vector<1x512xi32>
    %272 = arith.addi %2, %271 : vector<1x512xi32>
    %c0_i32_123 = arith.constant 0 : i32
    %273 = vector.broadcast %c0_i32_123 : i32 to vector<1x512xi32>
    %274 = arith.cmpi sge, %272, %273 : vector<1x512xi32>
    %c2_i32_124 = arith.constant 2 : i32
    %275 = vector.broadcast %c2_i32_124 : i32 to vector<1x512xi32>
    %276 = arith.addi %2, %275 : vector<1x512xi32>
    %c8_i32_125 = arith.constant 8 : i32
    %277 = vector.broadcast %c8_i32_125 : i32 to vector<1x512xi32>
    %278 = arith.cmpi slt, %276, %277 : vector<1x512xi32>
    %279 = arith.andi %274, %278 : vector<1x512xi1>
    %280 = arith.andi %261, %270 : vector<1x512xi1>
    %281 = arith.andi %280, %279 : vector<1x512xi1>
    %cst_126 = arith.constant 0.000000e+00 : f32
    %282 = vector.shape_cast %281 : vector<1x512xi1> to vector<1x512xi1>
    %283 = vector.broadcast %282 : vector<1x512xi1> to vector<4x512xi1>
    %284 = vector.broadcast %cst_126 : f32 to vector<4x512xf32>
    %285 = arith.select %283, %252, %284 : vector<4x512xi1>, vector<4x512xf32>
    %c8 = arith.constant 8 : index
    %c0_127 = arith.constant 0 : index
    %c0_128 = arith.constant 0 : index
    %286 = vector.load %arg3[%c8, %c0_127, %c0_128] : memref<27x4x4xf32, #tpu.memory_space<vmem>>, vector<1x4x4xf32>
    %287 = vector.shape_cast %286 : vector<1x4x4xf32> to vector<4x4xf32>
    %cst_129 = arith.constant dense<0.000000e+00> : vector<4x512xf32>
    %288 = tpu.matmul %287, %285, %cst_129 {dimension_numbers = #tpu.dot_dimension_numbers<[1], [0], [0], [1], [0, 0, 1, 1], [], []>} : vector<4x4xf32>, vector<4x512xf32>, vector<4x512xf32> -> vector<4x512xf32>
    %289 = arith.addf %251, %288 : vector<4x512xf32>
    %290 = vector.extract_strided_slice %8 {offsets = [0, 238], sizes = [4, 512], strides = [1, 1]} : vector<4x1024xf32> to vector<4x512xf32>
    %c-2_i32_130 = arith.constant -2 : i32
    %291 = vector.broadcast %c-2_i32_130 : i32 to vector<1x512xi32>
    %292 = arith.addi %1, %291 : vector<1x512xi32>
    %c0_i32_131 = arith.constant 0 : i32
    %293 = vector.broadcast %c0_i32_131 : i32 to vector<1x512xi32>
    %294 = arith.cmpi sge, %292, %293 : vector<1x512xi32>
    %c-2_i32_132 = arith.constant -2 : i32
    %295 = vector.broadcast %c-2_i32_132 : i32 to vector<1x512xi32>
    %296 = arith.addi %1, %295 : vector<1x512xi32>
    %c8_i32_133 = arith.constant 8 : i32
    %297 = vector.broadcast %c8_i32_133 : i32 to vector<1x512xi32>
    %298 = arith.cmpi slt, %296, %297 : vector<1x512xi32>
    %299 = arith.andi %294, %298 : vector<1x512xi1>
    %c-2_i32_134 = arith.constant -2 : i32
    %300 = vector.broadcast %c-2_i32_134 : i32 to vector<1x512xi32>
    %301 = arith.addi %2, %300 : vector<1x512xi32>
    %c0_i32_135 = arith.constant 0 : i32
    %302 = vector.broadcast %c0_i32_135 : i32 to vector<1x512xi32>
    %303 = arith.cmpi sge, %301, %302 : vector<1x512xi32>
    %c-2_i32_136 = arith.constant -2 : i32
    %304 = vector.broadcast %c-2_i32_136 : i32 to vector<1x512xi32>
    %305 = arith.addi %2, %304 : vector<1x512xi32>
    %c8_i32_137 = arith.constant 8 : i32
    %306 = vector.broadcast %c8_i32_137 : i32 to vector<1x512xi32>
    %307 = arith.cmpi slt, %305, %306 : vector<1x512xi32>
    %308 = arith.andi %303, %307 : vector<1x512xi1>
    %309 = arith.andi %299, %308 : vector<1x512xi1>
    %cst_138 = arith.constant 0.000000e+00 : f32
    %310 = vector.shape_cast %309 : vector<1x512xi1> to vector<1x512xi1>
    %311 = vector.broadcast %310 : vector<1x512xi1> to vector<4x512xi1>
    %312 = vector.broadcast %cst_138 : f32 to vector<4x512xf32>
    %313 = arith.select %311, %290, %312 : vector<4x512xi1>, vector<4x512xf32>
    %c9 = arith.constant 9 : index
    %c0_139 = arith.constant 0 : index
    %c0_140 = arith.constant 0 : index
    %314 = vector.load %arg3[%c9, %c0_139, %c0_140] : memref<27x4x4xf32, #tpu.memory_space<vmem>>, vector<1x4x4xf32>
    %315 = vector.shape_cast %314 : vector<1x4x4xf32> to vector<4x4xf32>
    %cst_141 = arith.constant dense<0.000000e+00> : vector<4x512xf32>
    %316 = tpu.matmul %315, %313, %cst_141 {dimension_numbers = #tpu.dot_dimension_numbers<[1], [0], [0], [1], [0, 0, 1, 1], [], []>} : vector<4x4xf32>, vector<4x512xf32>, vector<4x512xf32> -> vector<4x512xf32>
    %317 = arith.addf %289, %316 : vector<4x512xf32>
    %318 = vector.extract_strided_slice %8 {offsets = [0, 240], sizes = [4, 512], strides = [1, 1]} : vector<4x1024xf32> to vector<4x512xf32>
    %c-2_i32_142 = arith.constant -2 : i32
    %319 = vector.broadcast %c-2_i32_142 : i32 to vector<1x512xi32>
    %320 = arith.addi %1, %319 : vector<1x512xi32>
    %c0_i32_143 = arith.constant 0 : i32
    %321 = vector.broadcast %c0_i32_143 : i32 to vector<1x512xi32>
    %322 = arith.cmpi sge, %320, %321 : vector<1x512xi32>
    %c-2_i32_144 = arith.constant -2 : i32
    %323 = vector.broadcast %c-2_i32_144 : i32 to vector<1x512xi32>
    %324 = arith.addi %1, %323 : vector<1x512xi32>
    %c8_i32_145 = arith.constant 8 : i32
    %325 = vector.broadcast %c8_i32_145 : i32 to vector<1x512xi32>
    %326 = arith.cmpi slt, %324, %325 : vector<1x512xi32>
    %327 = arith.andi %322, %326 : vector<1x512xi1>
    %cst_146 = arith.constant 0.000000e+00 : f32
    %328 = vector.shape_cast %327 : vector<1x512xi1> to vector<1x512xi1>
    %329 = vector.broadcast %328 : vector<1x512xi1> to vector<4x512xi1>
    %330 = vector.broadcast %cst_146 : f32 to vector<4x512xf32>
    %331 = arith.select %329, %318, %330 : vector<4x512xi1>, vector<4x512xf32>
    %c10 = arith.constant 10 : index
    %c0_147 = arith.constant 0 : index
    %c0_148 = arith.constant 0 : index
    %332 = vector.load %arg3[%c10, %c0_147, %c0_148] : memref<27x4x4xf32, #tpu.memory_space<vmem>>, vector<1x4x4xf32>
    %333 = vector.shape_cast %332 : vector<1x4x4xf32> to vector<4x4xf32>
    %cst_149 = arith.constant dense<0.000000e+00> : vector<4x512xf32>
    %334 = tpu.matmul %333, %331, %cst_149 {dimension_numbers = #tpu.dot_dimension_numbers<[1], [0], [0], [1], [0, 0, 1, 1], [], []>} : vector<4x4xf32>, vector<4x512xf32>, vector<4x512xf32> -> vector<4x512xf32>
    %335 = arith.addf %317, %334 : vector<4x512xf32>
    %336 = vector.extract_strided_slice %8 {offsets = [0, 242], sizes = [4, 512], strides = [1, 1]} : vector<4x1024xf32> to vector<4x512xf32>
    %c-2_i32_150 = arith.constant -2 : i32
    %337 = vector.broadcast %c-2_i32_150 : i32 to vector<1x512xi32>
    %338 = arith.addi %1, %337 : vector<1x512xi32>
    %c0_i32_151 = arith.constant 0 : i32
    %339 = vector.broadcast %c0_i32_151 : i32 to vector<1x512xi32>
    %340 = arith.cmpi sge, %338, %339 : vector<1x512xi32>
    %c-2_i32_152 = arith.constant -2 : i32
    %341 = vector.broadcast %c-2_i32_152 : i32 to vector<1x512xi32>
    %342 = arith.addi %1, %341 : vector<1x512xi32>
    %c8_i32_153 = arith.constant 8 : i32
    %343 = vector.broadcast %c8_i32_153 : i32 to vector<1x512xi32>
    %344 = arith.cmpi slt, %342, %343 : vector<1x512xi32>
    %345 = arith.andi %340, %344 : vector<1x512xi1>
    %c2_i32_154 = arith.constant 2 : i32
    %346 = vector.broadcast %c2_i32_154 : i32 to vector<1x512xi32>
    %347 = arith.addi %2, %346 : vector<1x512xi32>
    %c0_i32_155 = arith.constant 0 : i32
    %348 = vector.broadcast %c0_i32_155 : i32 to vector<1x512xi32>
    %349 = arith.cmpi sge, %347, %348 : vector<1x512xi32>
    %c2_i32_156 = arith.constant 2 : i32
    %350 = vector.broadcast %c2_i32_156 : i32 to vector<1x512xi32>
    %351 = arith.addi %2, %350 : vector<1x512xi32>
    %c8_i32_157 = arith.constant 8 : i32
    %352 = vector.broadcast %c8_i32_157 : i32 to vector<1x512xi32>
    %353 = arith.cmpi slt, %351, %352 : vector<1x512xi32>
    %354 = arith.andi %349, %353 : vector<1x512xi1>
    %355 = arith.andi %345, %354 : vector<1x512xi1>
    %cst_158 = arith.constant 0.000000e+00 : f32
    %356 = vector.shape_cast %355 : vector<1x512xi1> to vector<1x512xi1>
    %357 = vector.broadcast %356 : vector<1x512xi1> to vector<4x512xi1>
    %358 = vector.broadcast %cst_158 : f32 to vector<4x512xf32>
    %359 = arith.select %357, %336, %358 : vector<4x512xi1>, vector<4x512xf32>
    %c11 = arith.constant 11 : index
    %c0_159 = arith.constant 0 : index
    %c0_160 = arith.constant 0 : index
    %360 = vector.load %arg3[%c11, %c0_159, %c0_160] : memref<27x4x4xf32, #tpu.memory_space<vmem>>, vector<1x4x4xf32>
    %361 = vector.shape_cast %360 : vector<1x4x4xf32> to vector<4x4xf32>
    %cst_161 = arith.constant dense<0.000000e+00> : vector<4x512xf32>
    %362 = tpu.matmul %361, %359, %cst_161 {dimension_numbers = #tpu.dot_dimension_numbers<[1], [0], [0], [1], [0, 0, 1, 1], [], []>} : vector<4x4xf32>, vector<4x512xf32>, vector<4x512xf32> -> vector<4x512xf32>
    %363 = arith.addf %335, %362 : vector<4x512xf32>
    %364 = vector.extract_strided_slice %8 {offsets = [0, 254], sizes = [4, 512], strides = [1, 1]} : vector<4x1024xf32> to vector<4x512xf32>
    %c-2_i32_162 = arith.constant -2 : i32
    %365 = vector.broadcast %c-2_i32_162 : i32 to vector<1x512xi32>
    %366 = arith.addi %2, %365 : vector<1x512xi32>
    %c0_i32_163 = arith.constant 0 : i32
    %367 = vector.broadcast %c0_i32_163 : i32 to vector<1x512xi32>
    %368 = arith.cmpi sge, %366, %367 : vector<1x512xi32>
    %c-2_i32_164 = arith.constant -2 : i32
    %369 = vector.broadcast %c-2_i32_164 : i32 to vector<1x512xi32>
    %370 = arith.addi %2, %369 : vector<1x512xi32>
    %c8_i32_165 = arith.constant 8 : i32
    %371 = vector.broadcast %c8_i32_165 : i32 to vector<1x512xi32>
    %372 = arith.cmpi slt, %370, %371 : vector<1x512xi32>
    %373 = arith.andi %368, %372 : vector<1x512xi1>
    %cst_166 = arith.constant 0.000000e+00 : f32
    %374 = vector.shape_cast %373 : vector<1x512xi1> to vector<1x512xi1>
    %375 = vector.broadcast %374 : vector<1x512xi1> to vector<4x512xi1>
    %376 = vector.broadcast %cst_166 : f32 to vector<4x512xf32>
    %377 = arith.select %375, %364, %376 : vector<4x512xi1>, vector<4x512xf32>
    %c12 = arith.constant 12 : index
    %c0_167 = arith.constant 0 : index
    %c0_168 = arith.constant 0 : index
    %378 = vector.load %arg3[%c12, %c0_167, %c0_168] : memref<27x4x4xf32, #tpu.memory_space<vmem>>, vector<1x4x4xf32>
    %379 = vector.shape_cast %378 : vector<1x4x4xf32> to vector<4x4xf32>
    %cst_169 = arith.constant dense<0.000000e+00> : vector<4x512xf32>
    %380 = tpu.matmul %379, %377, %cst_169 {dimension_numbers = #tpu.dot_dimension_numbers<[1], [0], [0], [1], [0, 0, 1, 1], [], []>} : vector<4x4xf32>, vector<4x512xf32>, vector<4x512xf32> -> vector<4x512xf32>
    %381 = arith.addf %363, %380 : vector<4x512xf32>
    %382 = vector.extract_strided_slice %8 {offsets = [0, 256], sizes = [4, 512], strides = [1, 1]} : vector<4x1024xf32> to vector<4x512xf32>
    %c13 = arith.constant 13 : index
    %c0_170 = arith.constant 0 : index
    %c0_171 = arith.constant 0 : index
    %383 = vector.load %arg3[%c13, %c0_170, %c0_171] : memref<27x4x4xf32, #tpu.memory_space<vmem>>, vector<1x4x4xf32>
    %384 = vector.shape_cast %383 : vector<1x4x4xf32> to vector<4x4xf32>
    %cst_172 = arith.constant dense<0.000000e+00> : vector<4x512xf32>
    %385 = tpu.matmul %384, %382, %cst_172 {dimension_numbers = #tpu.dot_dimension_numbers<[1], [0], [0], [1], [0, 0, 1, 1], [], []>} : vector<4x4xf32>, vector<4x512xf32>, vector<4x512xf32> -> vector<4x512xf32>
    %386 = arith.addf %381, %385 : vector<4x512xf32>
    %387 = vector.extract_strided_slice %8 {offsets = [0, 258], sizes = [4, 512], strides = [1, 1]} : vector<4x1024xf32> to vector<4x512xf32>
    %c2_i32_173 = arith.constant 2 : i32
    %388 = vector.broadcast %c2_i32_173 : i32 to vector<1x512xi32>
    %389 = arith.addi %2, %388 : vector<1x512xi32>
    %c0_i32_174 = arith.constant 0 : i32
    %390 = vector.broadcast %c0_i32_174 : i32 to vector<1x512xi32>
    %391 = arith.cmpi sge, %389, %390 : vector<1x512xi32>
    %c2_i32_175 = arith.constant 2 : i32
    %392 = vector.broadcast %c2_i32_175 : i32 to vector<1x512xi32>
    %393 = arith.addi %2, %392 : vector<1x512xi32>
    %c8_i32_176 = arith.constant 8 : i32
    %394 = vector.broadcast %c8_i32_176 : i32 to vector<1x512xi32>
    %395 = arith.cmpi slt, %393, %394 : vector<1x512xi32>
    %396 = arith.andi %391, %395 : vector<1x512xi1>
    %cst_177 = arith.constant 0.000000e+00 : f32
    %397 = vector.shape_cast %396 : vector<1x512xi1> to vector<1x512xi1>
    %398 = vector.broadcast %397 : vector<1x512xi1> to vector<4x512xi1>
    %399 = vector.broadcast %cst_177 : f32 to vector<4x512xf32>
    %400 = arith.select %398, %387, %399 : vector<4x512xi1>, vector<4x512xf32>
    %c14 = arith.constant 14 : index
    %c0_178 = arith.constant 0 : index
    %c0_179 = arith.constant 0 : index
    %401 = vector.load %arg3[%c14, %c0_178, %c0_179] : memref<27x4x4xf32, #tpu.memory_space<vmem>>, vector<1x4x4xf32>
    %402 = vector.shape_cast %401 : vector<1x4x4xf32> to vector<4x4xf32>
    %cst_180 = arith.constant dense<0.000000e+00> : vector<4x512xf32>
    %403 = tpu.matmul %402, %400, %cst_180 {dimension_numbers = #tpu.dot_dimension_numbers<[1], [0], [0], [1], [0, 0, 1, 1], [], []>} : vector<4x4xf32>, vector<4x512xf32>, vector<4x512xf32> -> vector<4x512xf32>
    %404 = arith.addf %386, %403 : vector<4x512xf32>
    %405 = vector.extract_strided_slice %8 {offsets = [0, 270], sizes = [4, 512], strides = [1, 1]} : vector<4x1024xf32> to vector<4x512xf32>
    %c2_i32_181 = arith.constant 2 : i32
    %406 = vector.broadcast %c2_i32_181 : i32 to vector<1x512xi32>
    %407 = arith.addi %1, %406 : vector<1x512xi32>
    %c0_i32_182 = arith.constant 0 : i32
    %408 = vector.broadcast %c0_i32_182 : i32 to vector<1x512xi32>
    %409 = arith.cmpi sge, %407, %408 : vector<1x512xi32>
    %c2_i32_183 = arith.constant 2 : i32
    %410 = vector.broadcast %c2_i32_183 : i32 to vector<1x512xi32>
    %411 = arith.addi %1, %410 : vector<1x512xi32>
    %c8_i32_184 = arith.constant 8 : i32
    %412 = vector.broadcast %c8_i32_184 : i32 to vector<1x512xi32>
    %413 = arith.cmpi slt, %411, %412 : vector<1x512xi32>
    %414 = arith.andi %409, %413 : vector<1x512xi1>
    %c-2_i32_185 = arith.constant -2 : i32
    %415 = vector.broadcast %c-2_i32_185 : i32 to vector<1x512xi32>
    %416 = arith.addi %2, %415 : vector<1x512xi32>
    %c0_i32_186 = arith.constant 0 : i32
    %417 = vector.broadcast %c0_i32_186 : i32 to vector<1x512xi32>
    %418 = arith.cmpi sge, %416, %417 : vector<1x512xi32>
    %c-2_i32_187 = arith.constant -2 : i32
    %419 = vector.broadcast %c-2_i32_187 : i32 to vector<1x512xi32>
    %420 = arith.addi %2, %419 : vector<1x512xi32>
    %c8_i32_188 = arith.constant 8 : i32
    %421 = vector.broadcast %c8_i32_188 : i32 to vector<1x512xi32>
    %422 = arith.cmpi slt, %420, %421 : vector<1x512xi32>
    %423 = arith.andi %418, %422 : vector<1x512xi1>
    %424 = arith.andi %414, %423 : vector<1x512xi1>
    %cst_189 = arith.constant 0.000000e+00 : f32
    %425 = vector.shape_cast %424 : vector<1x512xi1> to vector<1x512xi1>
    %426 = vector.broadcast %425 : vector<1x512xi1> to vector<4x512xi1>
    %427 = vector.broadcast %cst_189 : f32 to vector<4x512xf32>
    %428 = arith.select %426, %405, %427 : vector<4x512xi1>, vector<4x512xf32>
    %c15 = arith.constant 15 : index
    %c0_190 = arith.constant 0 : index
    %c0_191 = arith.constant 0 : index
    %429 = vector.load %arg3[%c15, %c0_190, %c0_191] : memref<27x4x4xf32, #tpu.memory_space<vmem>>, vector<1x4x4xf32>
    %430 = vector.shape_cast %429 : vector<1x4x4xf32> to vector<4x4xf32>
    %cst_192 = arith.constant dense<0.000000e+00> : vector<4x512xf32>
    %431 = tpu.matmul %430, %428, %cst_192 {dimension_numbers = #tpu.dot_dimension_numbers<[1], [0], [0], [1], [0, 0, 1, 1], [], []>} : vector<4x4xf32>, vector<4x512xf32>, vector<4x512xf32> -> vector<4x512xf32>
    %432 = arith.addf %404, %431 : vector<4x512xf32>
    %433 = vector.extract_strided_slice %8 {offsets = [0, 272], sizes = [4, 512], strides = [1, 1]} : vector<4x1024xf32> to vector<4x512xf32>
    %c2_i32_193 = arith.constant 2 : i32
    %434 = vector.broadcast %c2_i32_193 : i32 to vector<1x512xi32>
    %435 = arith.addi %1, %434 : vector<1x512xi32>
    %c0_i32_194 = arith.constant 0 : i32
    %436 = vector.broadcast %c0_i32_194 : i32 to vector<1x512xi32>
    %437 = arith.cmpi sge, %435, %436 : vector<1x512xi32>
    %c2_i32_195 = arith.constant 2 : i32
    %438 = vector.broadcast %c2_i32_195 : i32 to vector<1x512xi32>
    %439 = arith.addi %1, %438 : vector<1x512xi32>
    %c8_i32_196 = arith.constant 8 : i32
    %440 = vector.broadcast %c8_i32_196 : i32 to vector<1x512xi32>
    %441 = arith.cmpi slt, %439, %440 : vector<1x512xi32>
    %442 = arith.andi %437, %441 : vector<1x512xi1>
    %cst_197 = arith.constant 0.000000e+00 : f32
    %443 = vector.shape_cast %442 : vector<1x512xi1> to vector<1x512xi1>
    %444 = vector.broadcast %443 : vector<1x512xi1> to vector<4x512xi1>
    %445 = vector.broadcast %cst_197 : f32 to vector<4x512xf32>
    %446 = arith.select %444, %433, %445 : vector<4x512xi1>, vector<4x512xf32>
    %c16 = arith.constant 16 : index
    %c0_198 = arith.constant 0 : index
    %c0_199 = arith.constant 0 : index
    %447 = vector.load %arg3[%c16, %c0_198, %c0_199] : memref<27x4x4xf32, #tpu.memory_space<vmem>>, vector<1x4x4xf32>
    %448 = vector.shape_cast %447 : vector<1x4x4xf32> to vector<4x4xf32>
    %cst_200 = arith.constant dense<0.000000e+00> : vector<4x512xf32>
    %449 = tpu.matmul %448, %446, %cst_200 {dimension_numbers = #tpu.dot_dimension_numbers<[1], [0], [0], [1], [0, 0, 1, 1], [], []>} : vector<4x4xf32>, vector<4x512xf32>, vector<4x512xf32> -> vector<4x512xf32>
    %450 = arith.addf %432, %449 : vector<4x512xf32>
    %451 = vector.extract_strided_slice %8 {offsets = [0, 274], sizes = [4, 512], strides = [1, 1]} : vector<4x1024xf32> to vector<4x512xf32>
    %c2_i32_201 = arith.constant 2 : i32
    %452 = vector.broadcast %c2_i32_201 : i32 to vector<1x512xi32>
    %453 = arith.addi %1, %452 : vector<1x512xi32>
    %c0_i32_202 = arith.constant 0 : i32
    %454 = vector.broadcast %c0_i32_202 : i32 to vector<1x512xi32>
    %455 = arith.cmpi sge, %453, %454 : vector<1x512xi32>
    %c2_i32_203 = arith.constant 2 : i32
    %456 = vector.broadcast %c2_i32_203 : i32 to vector<1x512xi32>
    %457 = arith.addi %1, %456 : vector<1x512xi32>
    %c8_i32_204 = arith.constant 8 : i32
    %458 = vector.broadcast %c8_i32_204 : i32 to vector<1x512xi32>
    %459 = arith.cmpi slt, %457, %458 : vector<1x512xi32>
    %460 = arith.andi %455, %459 : vector<1x512xi1>
    %c2_i32_205 = arith.constant 2 : i32
    %461 = vector.broadcast %c2_i32_205 : i32 to vector<1x512xi32>
    %462 = arith.addi %2, %461 : vector<1x512xi32>
    %c0_i32_206 = arith.constant 0 : i32
    %463 = vector.broadcast %c0_i32_206 : i32 to vector<1x512xi32>
    %464 = arith.cmpi sge, %462, %463 : vector<1x512xi32>
    %c2_i32_207 = arith.constant 2 : i32
    %465 = vector.broadcast %c2_i32_207 : i32 to vector<1x512xi32>
    %466 = arith.addi %2, %465 : vector<1x512xi32>
    %c8_i32_208 = arith.constant 8 : i32
    %467 = vector.broadcast %c8_i32_208 : i32 to vector<1x512xi32>
    %468 = arith.cmpi slt, %466, %467 : vector<1x512xi32>
    %469 = arith.andi %464, %468 : vector<1x512xi1>
    %470 = arith.andi %460, %469 : vector<1x512xi1>
    %cst_209 = arith.constant 0.000000e+00 : f32
    %471 = vector.shape_cast %470 : vector<1x512xi1> to vector<1x512xi1>
    %472 = vector.broadcast %471 : vector<1x512xi1> to vector<4x512xi1>
    %473 = vector.broadcast %cst_209 : f32 to vector<4x512xf32>
    %474 = arith.select %472, %451, %473 : vector<4x512xi1>, vector<4x512xf32>
    %c17 = arith.constant 17 : index
    %c0_210 = arith.constant 0 : index
    %c0_211 = arith.constant 0 : index
    %475 = vector.load %arg3[%c17, %c0_210, %c0_211] : memref<27x4x4xf32, #tpu.memory_space<vmem>>, vector<1x4x4xf32>
    %476 = vector.shape_cast %475 : vector<1x4x4xf32> to vector<4x4xf32>
    %cst_212 = arith.constant dense<0.000000e+00> : vector<4x512xf32>
    %477 = tpu.matmul %476, %474, %cst_212 {dimension_numbers = #tpu.dot_dimension_numbers<[1], [0], [0], [1], [0, 0, 1, 1], [], []>} : vector<4x4xf32>, vector<4x512xf32>, vector<4x512xf32> -> vector<4x512xf32>
    %478 = arith.addf %450, %477 : vector<4x512xf32>
    %479 = vector.extract_strided_slice %8 {offsets = [0, 366], sizes = [4, 512], strides = [1, 1]} : vector<4x1024xf32> to vector<4x512xf32>
    %c2_i32_213 = arith.constant 2 : i32
    %480 = vector.broadcast %c2_i32_213 : i32 to vector<1x512xi32>
    %481 = arith.addi %0, %480 : vector<1x512xi32>
    %c0_i32_214 = arith.constant 0 : i32
    %482 = vector.broadcast %c0_i32_214 : i32 to vector<1x512xi32>
    %483 = arith.cmpi sge, %481, %482 : vector<1x512xi32>
    %c2_i32_215 = arith.constant 2 : i32
    %484 = vector.broadcast %c2_i32_215 : i32 to vector<1x512xi32>
    %485 = arith.addi %0, %484 : vector<1x512xi32>
    %c8_i32_216 = arith.constant 8 : i32
    %486 = vector.broadcast %c8_i32_216 : i32 to vector<1x512xi32>
    %487 = arith.cmpi slt, %485, %486 : vector<1x512xi32>
    %488 = arith.andi %483, %487 : vector<1x512xi1>
    %c-2_i32_217 = arith.constant -2 : i32
    %489 = vector.broadcast %c-2_i32_217 : i32 to vector<1x512xi32>
    %490 = arith.addi %1, %489 : vector<1x512xi32>
    %c0_i32_218 = arith.constant 0 : i32
    %491 = vector.broadcast %c0_i32_218 : i32 to vector<1x512xi32>
    %492 = arith.cmpi sge, %490, %491 : vector<1x512xi32>
    %c-2_i32_219 = arith.constant -2 : i32
    %493 = vector.broadcast %c-2_i32_219 : i32 to vector<1x512xi32>
    %494 = arith.addi %1, %493 : vector<1x512xi32>
    %c8_i32_220 = arith.constant 8 : i32
    %495 = vector.broadcast %c8_i32_220 : i32 to vector<1x512xi32>
    %496 = arith.cmpi slt, %494, %495 : vector<1x512xi32>
    %497 = arith.andi %492, %496 : vector<1x512xi1>
    %c-2_i32_221 = arith.constant -2 : i32
    %498 = vector.broadcast %c-2_i32_221 : i32 to vector<1x512xi32>
    %499 = arith.addi %2, %498 : vector<1x512xi32>
    %c0_i32_222 = arith.constant 0 : i32
    %500 = vector.broadcast %c0_i32_222 : i32 to vector<1x512xi32>
    %501 = arith.cmpi sge, %499, %500 : vector<1x512xi32>
    %c-2_i32_223 = arith.constant -2 : i32
    %502 = vector.broadcast %c-2_i32_223 : i32 to vector<1x512xi32>
    %503 = arith.addi %2, %502 : vector<1x512xi32>
    %c8_i32_224 = arith.constant 8 : i32
    %504 = vector.broadcast %c8_i32_224 : i32 to vector<1x512xi32>
    %505 = arith.cmpi slt, %503, %504 : vector<1x512xi32>
    %506 = arith.andi %501, %505 : vector<1x512xi1>
    %507 = arith.andi %488, %497 : vector<1x512xi1>
    %508 = arith.andi %507, %506 : vector<1x512xi1>
    %cst_225 = arith.constant 0.000000e+00 : f32
    %509 = vector.shape_cast %508 : vector<1x512xi1> to vector<1x512xi1>
    %510 = vector.broadcast %509 : vector<1x512xi1> to vector<4x512xi1>
    %511 = vector.broadcast %cst_225 : f32 to vector<4x512xf32>
    %512 = arith.select %510, %479, %511 : vector<4x512xi1>, vector<4x512xf32>
    %c18 = arith.constant 18 : index
    %c0_226 = arith.constant 0 : index
    %c0_227 = arith.constant 0 : index
    %513 = vector.load %arg3[%c18, %c0_226, %c0_227] : memref<27x4x4xf32, #tpu.memory_space<vmem>>, vector<1x4x4xf32>
    %514 = vector.shape_cast %513 : vector<1x4x4xf32> to vector<4x4xf32>
    %cst_228 = arith.constant dense<0.000000e+00> : vector<4x512xf32>
    %515 = tpu.matmul %514, %512, %cst_228 {dimension_numbers = #tpu.dot_dimension_numbers<[1], [0], [0], [1], [0, 0, 1, 1], [], []>} : vector<4x4xf32>, vector<4x512xf32>, vector<4x512xf32> -> vector<4x512xf32>
    %516 = arith.addf %478, %515 : vector<4x512xf32>
    %517 = vector.extract_strided_slice %8 {offsets = [0, 368], sizes = [4, 512], strides = [1, 1]} : vector<4x1024xf32> to vector<4x512xf32>
    %c2_i32_229 = arith.constant 2 : i32
    %518 = vector.broadcast %c2_i32_229 : i32 to vector<1x512xi32>
    %519 = arith.addi %0, %518 : vector<1x512xi32>
    %c0_i32_230 = arith.constant 0 : i32
    %520 = vector.broadcast %c0_i32_230 : i32 to vector<1x512xi32>
    %521 = arith.cmpi sge, %519, %520 : vector<1x512xi32>
    %c2_i32_231 = arith.constant 2 : i32
    %522 = vector.broadcast %c2_i32_231 : i32 to vector<1x512xi32>
    %523 = arith.addi %0, %522 : vector<1x512xi32>
    %c8_i32_232 = arith.constant 8 : i32
    %524 = vector.broadcast %c8_i32_232 : i32 to vector<1x512xi32>
    %525 = arith.cmpi slt, %523, %524 : vector<1x512xi32>
    %526 = arith.andi %521, %525 : vector<1x512xi1>
    %c-2_i32_233 = arith.constant -2 : i32
    %527 = vector.broadcast %c-2_i32_233 : i32 to vector<1x512xi32>
    %528 = arith.addi %1, %527 : vector<1x512xi32>
    %c0_i32_234 = arith.constant 0 : i32
    %529 = vector.broadcast %c0_i32_234 : i32 to vector<1x512xi32>
    %530 = arith.cmpi sge, %528, %529 : vector<1x512xi32>
    %c-2_i32_235 = arith.constant -2 : i32
    %531 = vector.broadcast %c-2_i32_235 : i32 to vector<1x512xi32>
    %532 = arith.addi %1, %531 : vector<1x512xi32>
    %c8_i32_236 = arith.constant 8 : i32
    %533 = vector.broadcast %c8_i32_236 : i32 to vector<1x512xi32>
    %534 = arith.cmpi slt, %532, %533 : vector<1x512xi32>
    %535 = arith.andi %530, %534 : vector<1x512xi1>
    %536 = arith.andi %526, %535 : vector<1x512xi1>
    %cst_237 = arith.constant 0.000000e+00 : f32
    %537 = vector.shape_cast %536 : vector<1x512xi1> to vector<1x512xi1>
    %538 = vector.broadcast %537 : vector<1x512xi1> to vector<4x512xi1>
    %539 = vector.broadcast %cst_237 : f32 to vector<4x512xf32>
    %540 = arith.select %538, %517, %539 : vector<4x512xi1>, vector<4x512xf32>
    %c19 = arith.constant 19 : index
    %c0_238 = arith.constant 0 : index
    %c0_239 = arith.constant 0 : index
    %541 = vector.load %arg3[%c19, %c0_238, %c0_239] : memref<27x4x4xf32, #tpu.memory_space<vmem>>, vector<1x4x4xf32>
    %542 = vector.shape_cast %541 : vector<1x4x4xf32> to vector<4x4xf32>
    %cst_240 = arith.constant dense<0.000000e+00> : vector<4x512xf32>
    %543 = tpu.matmul %542, %540, %cst_240 {dimension_numbers = #tpu.dot_dimension_numbers<[1], [0], [0], [1], [0, 0, 1, 1], [], []>} : vector<4x4xf32>, vector<4x512xf32>, vector<4x512xf32> -> vector<4x512xf32>
    %544 = arith.addf %516, %543 : vector<4x512xf32>
    %545 = vector.extract_strided_slice %8 {offsets = [0, 370], sizes = [4, 512], strides = [1, 1]} : vector<4x1024xf32> to vector<4x512xf32>
    %c2_i32_241 = arith.constant 2 : i32
    %546 = vector.broadcast %c2_i32_241 : i32 to vector<1x512xi32>
    %547 = arith.addi %0, %546 : vector<1x512xi32>
    %c0_i32_242 = arith.constant 0 : i32
    %548 = vector.broadcast %c0_i32_242 : i32 to vector<1x512xi32>
    %549 = arith.cmpi sge, %547, %548 : vector<1x512xi32>
    %c2_i32_243 = arith.constant 2 : i32
    %550 = vector.broadcast %c2_i32_243 : i32 to vector<1x512xi32>
    %551 = arith.addi %0, %550 : vector<1x512xi32>
    %c8_i32_244 = arith.constant 8 : i32
    %552 = vector.broadcast %c8_i32_244 : i32 to vector<1x512xi32>
    %553 = arith.cmpi slt, %551, %552 : vector<1x512xi32>
    %554 = arith.andi %549, %553 : vector<1x512xi1>
    %c-2_i32_245 = arith.constant -2 : i32
    %555 = vector.broadcast %c-2_i32_245 : i32 to vector<1x512xi32>
    %556 = arith.addi %1, %555 : vector<1x512xi32>
    %c0_i32_246 = arith.constant 0 : i32
    %557 = vector.broadcast %c0_i32_246 : i32 to vector<1x512xi32>
    %558 = arith.cmpi sge, %556, %557 : vector<1x512xi32>
    %c-2_i32_247 = arith.constant -2 : i32
    %559 = vector.broadcast %c-2_i32_247 : i32 to vector<1x512xi32>
    %560 = arith.addi %1, %559 : vector<1x512xi32>
    %c8_i32_248 = arith.constant 8 : i32
    %561 = vector.broadcast %c8_i32_248 : i32 to vector<1x512xi32>
    %562 = arith.cmpi slt, %560, %561 : vector<1x512xi32>
    %563 = arith.andi %558, %562 : vector<1x512xi1>
    %c2_i32_249 = arith.constant 2 : i32
    %564 = vector.broadcast %c2_i32_249 : i32 to vector<1x512xi32>
    %565 = arith.addi %2, %564 : vector<1x512xi32>
    %c0_i32_250 = arith.constant 0 : i32
    %566 = vector.broadcast %c0_i32_250 : i32 to vector<1x512xi32>
    %567 = arith.cmpi sge, %565, %566 : vector<1x512xi32>
    %c2_i32_251 = arith.constant 2 : i32
    %568 = vector.broadcast %c2_i32_251 : i32 to vector<1x512xi32>
    %569 = arith.addi %2, %568 : vector<1x512xi32>
    %c8_i32_252 = arith.constant 8 : i32
    %570 = vector.broadcast %c8_i32_252 : i32 to vector<1x512xi32>
    %571 = arith.cmpi slt, %569, %570 : vector<1x512xi32>
    %572 = arith.andi %567, %571 : vector<1x512xi1>
    %573 = arith.andi %554, %563 : vector<1x512xi1>
    %574 = arith.andi %573, %572 : vector<1x512xi1>
    %cst_253 = arith.constant 0.000000e+00 : f32
    %575 = vector.shape_cast %574 : vector<1x512xi1> to vector<1x512xi1>
    %576 = vector.broadcast %575 : vector<1x512xi1> to vector<4x512xi1>
    %577 = vector.broadcast %cst_253 : f32 to vector<4x512xf32>
    %578 = arith.select %576, %545, %577 : vector<4x512xi1>, vector<4x512xf32>
    %c20 = arith.constant 20 : index
    %c0_254 = arith.constant 0 : index
    %c0_255 = arith.constant 0 : index
    %579 = vector.load %arg3[%c20, %c0_254, %c0_255] : memref<27x4x4xf32, #tpu.memory_space<vmem>>, vector<1x4x4xf32>
    %580 = vector.shape_cast %579 : vector<1x4x4xf32> to vector<4x4xf32>
    %cst_256 = arith.constant dense<0.000000e+00> : vector<4x512xf32>
    %581 = tpu.matmul %580, %578, %cst_256 {dimension_numbers = #tpu.dot_dimension_numbers<[1], [0], [0], [1], [0, 0, 1, 1], [], []>} : vector<4x4xf32>, vector<4x512xf32>, vector<4x512xf32> -> vector<4x512xf32>
    %582 = arith.addf %544, %581 : vector<4x512xf32>
    %583 = vector.extract_strided_slice %8 {offsets = [0, 382], sizes = [4, 512], strides = [1, 1]} : vector<4x1024xf32> to vector<4x512xf32>
    %c2_i32_257 = arith.constant 2 : i32
    %584 = vector.broadcast %c2_i32_257 : i32 to vector<1x512xi32>
    %585 = arith.addi %0, %584 : vector<1x512xi32>
    %c0_i32_258 = arith.constant 0 : i32
    %586 = vector.broadcast %c0_i32_258 : i32 to vector<1x512xi32>
    %587 = arith.cmpi sge, %585, %586 : vector<1x512xi32>
    %c2_i32_259 = arith.constant 2 : i32
    %588 = vector.broadcast %c2_i32_259 : i32 to vector<1x512xi32>
    %589 = arith.addi %0, %588 : vector<1x512xi32>
    %c8_i32_260 = arith.constant 8 : i32
    %590 = vector.broadcast %c8_i32_260 : i32 to vector<1x512xi32>
    %591 = arith.cmpi slt, %589, %590 : vector<1x512xi32>
    %592 = arith.andi %587, %591 : vector<1x512xi1>
    %c-2_i32_261 = arith.constant -2 : i32
    %593 = vector.broadcast %c-2_i32_261 : i32 to vector<1x512xi32>
    %594 = arith.addi %2, %593 : vector<1x512xi32>
    %c0_i32_262 = arith.constant 0 : i32
    %595 = vector.broadcast %c0_i32_262 : i32 to vector<1x512xi32>
    %596 = arith.cmpi sge, %594, %595 : vector<1x512xi32>
    %c-2_i32_263 = arith.constant -2 : i32
    %597 = vector.broadcast %c-2_i32_263 : i32 to vector<1x512xi32>
    %598 = arith.addi %2, %597 : vector<1x512xi32>
    %c8_i32_264 = arith.constant 8 : i32
    %599 = vector.broadcast %c8_i32_264 : i32 to vector<1x512xi32>
    %600 = arith.cmpi slt, %598, %599 : vector<1x512xi32>
    %601 = arith.andi %596, %600 : vector<1x512xi1>
    %602 = arith.andi %592, %601 : vector<1x512xi1>
    %cst_265 = arith.constant 0.000000e+00 : f32
    %603 = vector.shape_cast %602 : vector<1x512xi1> to vector<1x512xi1>
    %604 = vector.broadcast %603 : vector<1x512xi1> to vector<4x512xi1>
    %605 = vector.broadcast %cst_265 : f32 to vector<4x512xf32>
    %606 = arith.select %604, %583, %605 : vector<4x512xi1>, vector<4x512xf32>
    %c21 = arith.constant 21 : index
    %c0_266 = arith.constant 0 : index
    %c0_267 = arith.constant 0 : index
    %607 = vector.load %arg3[%c21, %c0_266, %c0_267] : memref<27x4x4xf32, #tpu.memory_space<vmem>>, vector<1x4x4xf32>
    %608 = vector.shape_cast %607 : vector<1x4x4xf32> to vector<4x4xf32>
    %cst_268 = arith.constant dense<0.000000e+00> : vector<4x512xf32>
    %609 = tpu.matmul %608, %606, %cst_268 {dimension_numbers = #tpu.dot_dimension_numbers<[1], [0], [0], [1], [0, 0, 1, 1], [], []>} : vector<4x4xf32>, vector<4x512xf32>, vector<4x512xf32> -> vector<4x512xf32>
    %610 = arith.addf %582, %609 : vector<4x512xf32>
    %611 = vector.extract_strided_slice %8 {offsets = [0, 384], sizes = [4, 512], strides = [1, 1]} : vector<4x1024xf32> to vector<4x512xf32>
    %c2_i32_269 = arith.constant 2 : i32
    %612 = vector.broadcast %c2_i32_269 : i32 to vector<1x512xi32>
    %613 = arith.addi %0, %612 : vector<1x512xi32>
    %c0_i32_270 = arith.constant 0 : i32
    %614 = vector.broadcast %c0_i32_270 : i32 to vector<1x512xi32>
    %615 = arith.cmpi sge, %613, %614 : vector<1x512xi32>
    %c2_i32_271 = arith.constant 2 : i32
    %616 = vector.broadcast %c2_i32_271 : i32 to vector<1x512xi32>
    %617 = arith.addi %0, %616 : vector<1x512xi32>
    %c8_i32_272 = arith.constant 8 : i32
    %618 = vector.broadcast %c8_i32_272 : i32 to vector<1x512xi32>
    %619 = arith.cmpi slt, %617, %618 : vector<1x512xi32>
    %620 = arith.andi %615, %619 : vector<1x512xi1>
    %cst_273 = arith.constant 0.000000e+00 : f32
    %621 = vector.shape_cast %620 : vector<1x512xi1> to vector<1x512xi1>
    %622 = vector.broadcast %621 : vector<1x512xi1> to vector<4x512xi1>
    %623 = vector.broadcast %cst_273 : f32 to vector<4x512xf32>
    %624 = arith.select %622, %611, %623 : vector<4x512xi1>, vector<4x512xf32>
    %c22 = arith.constant 22 : index
    %c0_274 = arith.constant 0 : index
    %c0_275 = arith.constant 0 : index
    %625 = vector.load %arg3[%c22, %c0_274, %c0_275] : memref<27x4x4xf32, #tpu.memory_space<vmem>>, vector<1x4x4xf32>
    %626 = vector.shape_cast %625 : vector<1x4x4xf32> to vector<4x4xf32>
    %cst_276 = arith.constant dense<0.000000e+00> : vector<4x512xf32>
    %627 = tpu.matmul %626, %624, %cst_276 {dimension_numbers = #tpu.dot_dimension_numbers<[1], [0], [0], [1], [0, 0, 1, 1], [], []>} : vector<4x4xf32>, vector<4x512xf32>, vector<4x512xf32> -> vector<4x512xf32>
    %628 = arith.addf %610, %627 : vector<4x512xf32>
    %629 = vector.extract_strided_slice %8 {offsets = [0, 386], sizes = [4, 512], strides = [1, 1]} : vector<4x1024xf32> to vector<4x512xf32>
    %c2_i32_277 = arith.constant 2 : i32
    %630 = vector.broadcast %c2_i32_277 : i32 to vector<1x512xi32>
    %631 = arith.addi %0, %630 : vector<1x512xi32>
    %c0_i32_278 = arith.constant 0 : i32
    %632 = vector.broadcast %c0_i32_278 : i32 to vector<1x512xi32>
    %633 = arith.cmpi sge, %631, %632 : vector<1x512xi32>
    %c2_i32_279 = arith.constant 2 : i32
    %634 = vector.broadcast %c2_i32_279 : i32 to vector<1x512xi32>
    %635 = arith.addi %0, %634 : vector<1x512xi32>
    %c8_i32_280 = arith.constant 8 : i32
    %636 = vector.broadcast %c8_i32_280 : i32 to vector<1x512xi32>
    %637 = arith.cmpi slt, %635, %636 : vector<1x512xi32>
    %638 = arith.andi %633, %637 : vector<1x512xi1>
    %c2_i32_281 = arith.constant 2 : i32
    %639 = vector.broadcast %c2_i32_281 : i32 to vector<1x512xi32>
    %640 = arith.addi %2, %639 : vector<1x512xi32>
    %c0_i32_282 = arith.constant 0 : i32
    %641 = vector.broadcast %c0_i32_282 : i32 to vector<1x512xi32>
    %642 = arith.cmpi sge, %640, %641 : vector<1x512xi32>
    %c2_i32_283 = arith.constant 2 : i32
    %643 = vector.broadcast %c2_i32_283 : i32 to vector<1x512xi32>
    %644 = arith.addi %2, %643 : vector<1x512xi32>
    %c8_i32_284 = arith.constant 8 : i32
    %645 = vector.broadcast %c8_i32_284 : i32 to vector<1x512xi32>
    %646 = arith.cmpi slt, %644, %645 : vector<1x512xi32>
    %647 = arith.andi %642, %646 : vector<1x512xi1>
    %648 = arith.andi %638, %647 : vector<1x512xi1>
    %cst_285 = arith.constant 0.000000e+00 : f32
    %649 = vector.shape_cast %648 : vector<1x512xi1> to vector<1x512xi1>
    %650 = vector.broadcast %649 : vector<1x512xi1> to vector<4x512xi1>
    %651 = vector.broadcast %cst_285 : f32 to vector<4x512xf32>
    %652 = arith.select %650, %629, %651 : vector<4x512xi1>, vector<4x512xf32>
    %c23 = arith.constant 23 : index
    %c0_286 = arith.constant 0 : index
    %c0_287 = arith.constant 0 : index
    %653 = vector.load %arg3[%c23, %c0_286, %c0_287] : memref<27x4x4xf32, #tpu.memory_space<vmem>>, vector<1x4x4xf32>
    %654 = vector.shape_cast %653 : vector<1x4x4xf32> to vector<4x4xf32>
    %cst_288 = arith.constant dense<0.000000e+00> : vector<4x512xf32>
    %655 = tpu.matmul %654, %652, %cst_288 {dimension_numbers = #tpu.dot_dimension_numbers<[1], [0], [0], [1], [0, 0, 1, 1], [], []>} : vector<4x4xf32>, vector<4x512xf32>, vector<4x512xf32> -> vector<4x512xf32>
    %656 = arith.addf %628, %655 : vector<4x512xf32>
    %657 = vector.extract_strided_slice %8 {offsets = [0, 398], sizes = [4, 512], strides = [1, 1]} : vector<4x1024xf32> to vector<4x512xf32>
    %c2_i32_289 = arith.constant 2 : i32
    %658 = vector.broadcast %c2_i32_289 : i32 to vector<1x512xi32>
    %659 = arith.addi %0, %658 : vector<1x512xi32>
    %c0_i32_290 = arith.constant 0 : i32
    %660 = vector.broadcast %c0_i32_290 : i32 to vector<1x512xi32>
    %661 = arith.cmpi sge, %659, %660 : vector<1x512xi32>
    %c2_i32_291 = arith.constant 2 : i32
    %662 = vector.broadcast %c2_i32_291 : i32 to vector<1x512xi32>
    %663 = arith.addi %0, %662 : vector<1x512xi32>
    %c8_i32_292 = arith.constant 8 : i32
    %664 = vector.broadcast %c8_i32_292 : i32 to vector<1x512xi32>
    %665 = arith.cmpi slt, %663, %664 : vector<1x512xi32>
    %666 = arith.andi %661, %665 : vector<1x512xi1>
    %c2_i32_293 = arith.constant 2 : i32
    %667 = vector.broadcast %c2_i32_293 : i32 to vector<1x512xi32>
    %668 = arith.addi %1, %667 : vector<1x512xi32>
    %c0_i32_294 = arith.constant 0 : i32
    %669 = vector.broadcast %c0_i32_294 : i32 to vector<1x512xi32>
    %670 = arith.cmpi sge, %668, %669 : vector<1x512xi32>
    %c2_i32_295 = arith.constant 2 : i32
    %671 = vector.broadcast %c2_i32_295 : i32 to vector<1x512xi32>
    %672 = arith.addi %1, %671 : vector<1x512xi32>
    %c8_i32_296 = arith.constant 8 : i32
    %673 = vector.broadcast %c8_i32_296 : i32 to vector<1x512xi32>
    %674 = arith.cmpi slt, %672, %673 : vector<1x512xi32>
    %675 = arith.andi %670, %674 : vector<1x512xi1>
    %c-2_i32_297 = arith.constant -2 : i32
    %676 = vector.broadcast %c-2_i32_297 : i32 to vector<1x512xi32>
    %677 = arith.addi %2, %676 : vector<1x512xi32>
    %c0_i32_298 = arith.constant 0 : i32
    %678 = vector.broadcast %c0_i32_298 : i32 to vector<1x512xi32>
    %679 = arith.cmpi sge, %677, %678 : vector<1x512xi32>
    %c-2_i32_299 = arith.constant -2 : i32
    %680 = vector.broadcast %c-2_i32_299 : i32 to vector<1x512xi32>
    %681 = arith.addi %2, %680 : vector<1x512xi32>
    %c8_i32_300 = arith.constant 8 : i32
    %682 = vector.broadcast %c8_i32_300 : i32 to vector<1x512xi32>
    %683 = arith.cmpi slt, %681, %682 : vector<1x512xi32>
    %684 = arith.andi %679, %683 : vector<1x512xi1>
    %685 = arith.andi %666, %675 : vector<1x512xi1>
    %686 = arith.andi %685, %684 : vector<1x512xi1>
    %cst_301 = arith.constant 0.000000e+00 : f32
    %687 = vector.shape_cast %686 : vector<1x512xi1> to vector<1x512xi1>
    %688 = vector.broadcast %687 : vector<1x512xi1> to vector<4x512xi1>
    %689 = vector.broadcast %cst_301 : f32 to vector<4x512xf32>
    %690 = arith.select %688, %657, %689 : vector<4x512xi1>, vector<4x512xf32>
    %c24 = arith.constant 24 : index
    %c0_302 = arith.constant 0 : index
    %c0_303 = arith.constant 0 : index
    %691 = vector.load %arg3[%c24, %c0_302, %c0_303] : memref<27x4x4xf32, #tpu.memory_space<vmem>>, vector<1x4x4xf32>
    %692 = vector.shape_cast %691 : vector<1x4x4xf32> to vector<4x4xf32>
    %cst_304 = arith.constant dense<0.000000e+00> : vector<4x512xf32>
    %693 = tpu.matmul %692, %690, %cst_304 {dimension_numbers = #tpu.dot_dimension_numbers<[1], [0], [0], [1], [0, 0, 1, 1], [], []>} : vector<4x4xf32>, vector<4x512xf32>, vector<4x512xf32> -> vector<4x512xf32>
    %694 = arith.addf %656, %693 : vector<4x512xf32>
    %695 = vector.extract_strided_slice %8 {offsets = [0, 400], sizes = [4, 512], strides = [1, 1]} : vector<4x1024xf32> to vector<4x512xf32>
    %c2_i32_305 = arith.constant 2 : i32
    %696 = vector.broadcast %c2_i32_305 : i32 to vector<1x512xi32>
    %697 = arith.addi %0, %696 : vector<1x512xi32>
    %c0_i32_306 = arith.constant 0 : i32
    %698 = vector.broadcast %c0_i32_306 : i32 to vector<1x512xi32>
    %699 = arith.cmpi sge, %697, %698 : vector<1x512xi32>
    %c2_i32_307 = arith.constant 2 : i32
    %700 = vector.broadcast %c2_i32_307 : i32 to vector<1x512xi32>
    %701 = arith.addi %0, %700 : vector<1x512xi32>
    %c8_i32_308 = arith.constant 8 : i32
    %702 = vector.broadcast %c8_i32_308 : i32 to vector<1x512xi32>
    %703 = arith.cmpi slt, %701, %702 : vector<1x512xi32>
    %704 = arith.andi %699, %703 : vector<1x512xi1>
    %c2_i32_309 = arith.constant 2 : i32
    %705 = vector.broadcast %c2_i32_309 : i32 to vector<1x512xi32>
    %706 = arith.addi %1, %705 : vector<1x512xi32>
    %c0_i32_310 = arith.constant 0 : i32
    %707 = vector.broadcast %c0_i32_310 : i32 to vector<1x512xi32>
    %708 = arith.cmpi sge, %706, %707 : vector<1x512xi32>
    %c2_i32_311 = arith.constant 2 : i32
    %709 = vector.broadcast %c2_i32_311 : i32 to vector<1x512xi32>
    %710 = arith.addi %1, %709 : vector<1x512xi32>
    %c8_i32_312 = arith.constant 8 : i32
    %711 = vector.broadcast %c8_i32_312 : i32 to vector<1x512xi32>
    %712 = arith.cmpi slt, %710, %711 : vector<1x512xi32>
    %713 = arith.andi %708, %712 : vector<1x512xi1>
    %714 = arith.andi %704, %713 : vector<1x512xi1>
    %cst_313 = arith.constant 0.000000e+00 : f32
    %715 = vector.shape_cast %714 : vector<1x512xi1> to vector<1x512xi1>
    %716 = vector.broadcast %715 : vector<1x512xi1> to vector<4x512xi1>
    %717 = vector.broadcast %cst_313 : f32 to vector<4x512xf32>
    %718 = arith.select %716, %695, %717 : vector<4x512xi1>, vector<4x512xf32>
    %c25 = arith.constant 25 : index
    %c0_314 = arith.constant 0 : index
    %c0_315 = arith.constant 0 : index
    %719 = vector.load %arg3[%c25, %c0_314, %c0_315] : memref<27x4x4xf32, #tpu.memory_space<vmem>>, vector<1x4x4xf32>
    %720 = vector.shape_cast %719 : vector<1x4x4xf32> to vector<4x4xf32>
    %cst_316 = arith.constant dense<0.000000e+00> : vector<4x512xf32>
    %721 = tpu.matmul %720, %718, %cst_316 {dimension_numbers = #tpu.dot_dimension_numbers<[1], [0], [0], [1], [0, 0, 1, 1], [], []>} : vector<4x4xf32>, vector<4x512xf32>, vector<4x512xf32> -> vector<4x512xf32>
    %722 = arith.addf %694, %721 : vector<4x512xf32>
    %723 = vector.extract_strided_slice %8 {offsets = [0, 402], sizes = [4, 512], strides = [1, 1]} : vector<4x1024xf32> to vector<4x512xf32>
    %c2_i32_317 = arith.constant 2 : i32
    %724 = vector.broadcast %c2_i32_317 : i32 to vector<1x512xi32>
    %725 = arith.addi %0, %724 : vector<1x512xi32>
    %c0_i32_318 = arith.constant 0 : i32
    %726 = vector.broadcast %c0_i32_318 : i32 to vector<1x512xi32>
    %727 = arith.cmpi sge, %725, %726 : vector<1x512xi32>
    %c2_i32_319 = arith.constant 2 : i32
    %728 = vector.broadcast %c2_i32_319 : i32 to vector<1x512xi32>
    %729 = arith.addi %0, %728 : vector<1x512xi32>
    %c8_i32_320 = arith.constant 8 : i32
    %730 = vector.broadcast %c8_i32_320 : i32 to vector<1x512xi32>
    %731 = arith.cmpi slt, %729, %730 : vector<1x512xi32>
    %732 = arith.andi %727, %731 : vector<1x512xi1>
    %c2_i32_321 = arith.constant 2 : i32
    %733 = vector.broadcast %c2_i32_321 : i32 to vector<1x512xi32>
    %734 = arith.addi %1, %733 : vector<1x512xi32>
    %c0_i32_322 = arith.constant 0 : i32
    %735 = vector.broadcast %c0_i32_322 : i32 to vector<1x512xi32>
    %736 = arith.cmpi sge, %734, %735 : vector<1x512xi32>
    %c2_i32_323 = arith.constant 2 : i32
    %737 = vector.broadcast %c2_i32_323 : i32 to vector<1x512xi32>
    %738 = arith.addi %1, %737 : vector<1x512xi32>
    %c8_i32_324 = arith.constant 8 : i32
    %739 = vector.broadcast %c8_i32_324 : i32 to vector<1x512xi32>
    %740 = arith.cmpi slt, %738, %739 : vector<1x512xi32>
    %741 = arith.andi %736, %740 : vector<1x512xi1>
    %c2_i32_325 = arith.constant 2 : i32
    %742 = vector.broadcast %c2_i32_325 : i32 to vector<1x512xi32>
    %743 = arith.addi %2, %742 : vector<1x512xi32>
    %c0_i32_326 = arith.constant 0 : i32
    %744 = vector.broadcast %c0_i32_326 : i32 to vector<1x512xi32>
    %745 = arith.cmpi sge, %743, %744 : vector<1x512xi32>
    %c2_i32_327 = arith.constant 2 : i32
    %746 = vector.broadcast %c2_i32_327 : i32 to vector<1x512xi32>
    %747 = arith.addi %2, %746 : vector<1x512xi32>
    %c8_i32_328 = arith.constant 8 : i32
    %748 = vector.broadcast %c8_i32_328 : i32 to vector<1x512xi32>
    %749 = arith.cmpi slt, %747, %748 : vector<1x512xi32>
    %750 = arith.andi %745, %749 : vector<1x512xi1>
    %751 = arith.andi %732, %741 : vector<1x512xi1>
    %752 = arith.andi %751, %750 : vector<1x512xi1>
    %cst_329 = arith.constant 0.000000e+00 : f32
    %753 = vector.shape_cast %752 : vector<1x512xi1> to vector<1x512xi1>
    %754 = vector.broadcast %753 : vector<1x512xi1> to vector<4x512xi1>
    %755 = vector.broadcast %cst_329 : f32 to vector<4x512xf32>
    %756 = arith.select %754, %723, %755 : vector<4x512xi1>, vector<4x512xf32>
    %c26 = arith.constant 26 : index
    %c0_330 = arith.constant 0 : index
    %c0_331 = arith.constant 0 : index
    %757 = vector.load %arg3[%c26, %c0_330, %c0_331] : memref<27x4x4xf32, #tpu.memory_space<vmem>>, vector<1x4x4xf32>
    %758 = vector.shape_cast %757 : vector<1x4x4xf32> to vector<4x4xf32>
    %cst_332 = arith.constant dense<0.000000e+00> : vector<4x512xf32>
    %759 = tpu.matmul %758, %756, %cst_332 {dimension_numbers = #tpu.dot_dimension_numbers<[1], [0], [0], [1], [0, 0, 1, 1], [], []>} : vector<4x4xf32>, vector<4x512xf32>, vector<4x512xf32> -> vector<4x512xf32>
    %760 = arith.addf %722, %759 : vector<4x512xf32>
    %c0_333 = arith.constant 0 : index
    %c0_334 = arith.constant 0 : index
    %761 = vector.load %arg4[%c0_333, %c0_334] : memref<4x1xf32, #tpu.memory_space<vmem>>, vector<4x1xf32>
    %762 = vector.broadcast %761 : vector<4x1xf32> to vector<4x512xf32>
    %763 = arith.addf %760, %762 : vector<4x512xf32>
    %c0_335 = arith.constant 0 : index
    %c0_336 = arith.constant 0 : index
    %c0_337 = arith.constant 0 : index
    %764 = vector.load %arg5[%c0_335, %c0_336, %c0_337] : memref<1x4x512xf32, #tpu.memory_space<vmem>>, vector<1x4x512xf32>
    %765 = vector.shape_cast %764 : vector<1x4x512xf32> to vector<4x512xf32>
    %766 = vector.shape_cast %763 : vector<4x512xf32> to vector<1x4x512xf32>
    tpu.vector_store %arg5[%c0_335, %c0_336, %c0_337], %766 {strides = array<i32>} : memref<1x4x512xf32, #tpu.memory_space<vmem>>, vector<1x4x512xf32>,
    %cst_338 = arith.constant dense<0.000000e+00> : vector<4xf32>
    %767 = vector.multi_reduction <add>, %763, %cst_338 [1] : vector<4x512xf32> to vector<4xf32>
    %768 = vector.shape_cast %767 : vector<4xf32> to vector<4x1xf32>
    %c0_339 = arith.constant 0 : index
    %c0_340 = arith.constant 0 : index
    %c0_341 = arith.constant 0 : index
    %769 = vector.load %arg6[%c0_339, %c0_340, %c0_341] : memref<1x4x1xf32, #tpu.memory_space<vmem>>, vector<1x4x1xf32>
    %770 = vector.shape_cast %769 : vector<1x4x1xf32> to vector<4x1xf32>
    %771 = vector.shape_cast %768 : vector<4x1xf32> to vector<1x4x1xf32>
    tpu.vector_store %arg6[%c0_339, %c0_340, %c0_341], %771 {strides = array<i32>} : memref<1x4x1xf32, #tpu.memory_space<vmem>>, vector<1x4x1xf32>,
    %772 = arith.mulf %763, %763 : vector<4x512xf32>
    %cst_342 = arith.constant dense<0.000000e+00> : vector<4xf32>
    %773 = vector.multi_reduction <add>, %772, %cst_342 [1] : vector<4x512xf32> to vector<4xf32>
    %774 = vector.shape_cast %773 : vector<4xf32> to vector<4x1xf32>
    %c0_343 = arith.constant 0 : index
    %c0_344 = arith.constant 0 : index
    %c0_345 = arith.constant 0 : index
    %775 = vector.load %arg7[%c0_343, %c0_344, %c0_345] : memref<1x4x1xf32, #tpu.memory_space<vmem>>, vector<1x4x1xf32>
    %776 = vector.shape_cast %775 : vector<1x4x1xf32> to vector<4x1xf32>
    %777 = vector.shape_cast %774 : vector<4x1xf32> to vector<1x4x1xf32>
    tpu.vector_store %arg7[%c0_343, %c0_344, %c0_345], %777 {strides = array<i32>} : memref<1x4x1xf32, #tpu.memory_space<vmem>>, vector<1x4x1xf32>,
    return
  }
  func.func @transform_0(%arg0: i32) -> (i32, i32, i32) {
    %c0_i32 = arith.constant 0 : i32
    %c0_i32_0 = arith.constant 0 : i32
    %c0_i32_1 = arith.constant 0 : i32
    return %arg0, %c0_i32, %c0_i32_0 : i32, i32, i32
  }
  func.func @transform_1(%arg0: i32) -> (i32, i32) {
    %c0_i32 = arith.constant 0 : i32
    %c0_i32_0 = arith.constant 0 : i32
    %c0_i32_1 = arith.constant 0 : i32
    return %c0_i32, %c0_i32_0 : i32, i32
  }
  func.func @transform_2(%arg0: i32) -> (i32, i32, i32) {
    %c0_i32 = arith.constant 0 : i32
    %c0_i32_0 = arith.constant 0 : i32
    %c0_i32_1 = arith.constant 0 : i32
    %c0_i32_2 = arith.constant 0 : i32
    return %c0_i32, %c0_i32_0, %c0_i32_1 : i32, i32, i32
  }
  func.func @transform_3(%arg0: i32) -> (i32, i32) {
    %c0_i32 = arith.constant 0 : i32
    %c0_i32_0 = arith.constant 0 : i32
    %c0_i32_1 = arith.constant 0 : i32
    return %c0_i32, %c0_i32_0 : i32, i32
  }
  func.func @transform_4(%arg0: i32) -> (i32, i32, i32) {
    %c0_i32 = arith.constant 0 : i32
    %c0_i32_0 = arith.constant 0 : i32
    %c0_i32_1 = arith.constant 0 : i32
    return %arg0, %c0_i32, %c0_i32_0 : i32, i32, i32
  }
  func.func @transform_5(%arg0: i32) -> (i32, i32, i32) {
    %c0_i32 = arith.constant 0 : i32
    %c0_i32_0 = arith.constant 0 : i32
    %c0_i32_1 = arith.constant 0 : i32
    return %arg0, %c0_i32, %c0_i32_0 : i32, i32, i32
  }
  func.func @transform_6(%arg0: i32) -> (i32, i32, i32) {
    %c0_i32 = arith.constant 0 : i32
    %c0_i32_0 = arith.constant 0 : i32
    %c0_i32_1 = arith.constant 0 : i32
    return %arg0, %c0_i32, %c0_i32_0 : i32, i32, i32
  }
}

</mosaic_0001>

<bundles_post_ra>
// kernel: tpu_custom_call.1
= control target key start
LH: loop header
LB: loop body
LE: loop exit
PB: predicated region body
PF: predicated region fallthrough
CT: control target
= control target key end

     0   :  { %12 = vsyncpa [#allocation4], 0  ;;  %s8256_s0 = inlined_call_operand.vmem [shape: f32[2,4,512], index: 0, kind: input, shape index: {}]   ;;  %s8257_s1 = inlined_call_operand.vmem [shape: s32[3,512], index: 1, kind: input, shape index: {}]   ;;  %s8258_s2 = inlined_call_operand.vmem [shape: f32[27,4,4], index: 2, kind: input, shape index: {}]   ;;  %s8259_s3 = inlined_call_operand.vmem [shape: f32[4,1], index: 3, kind: input, shape index: {}]   ;;  %s8260_s4 = inlined_call_operand.hbm [shape: f32[2,4,512], index: 4, kind: output, shape index: {0}]   ;;  %s8261_s5 = inlined_call_operand.vmem [shape: f32[2,4,1], index: 5, kind: output, shape index: {1}]   ;;  %s8262_s6 = inlined_call_operand.vmem [shape: f32[2,4,1], index: 6, kind: output, shape index: {2}]  }
   0x1   :  { %14 = vsyncpa [#allocation4 + $0x1], 0  ;;  %s6177_s21 = smov 0   ;;  %s6179_s22 = smov 0  }
   0x2   :  { %s6181_s23 = smov 0   ;;  %s6183_s24 = smov 0  }
   0x3 LB: > { %s6198_s25 = sadd.s32 4294967295, %s6128_s24   ;;  %s5780_s26 = sadd.s32 4294967294, %s6128_s24   ;;  %s6128_s24 = sphi %s6183_s24, %s8864_s24   ;;  %s6124_s23 = sphi %s6181_s23, %s8863_s23   ;;  %s6120_s22 = sphi %s6179_s22, %s8862_s22   ;;  %s6116_s21 = sphi %s6177_s21, %s8861_s21  }
   0x4   : > { %s6202_s27 = sadd.s32 1, %s6128_s24   ;;  %s116_s28 = sadd.s32 1, %s6124_s23 }
   0x5   : > { %s113_s29 = ssub.s32 %s6128_s24, %s6202_s27  ;;  %p126_p0 = scmp.ne.s32.totalorder %s6124_s23, %s6120_s22 }
   0x6   : > { %p114_p1 = scmp.eq.s32.totalorder %s113_s29, 0  ;;  %p127_p2 = scmp.eq.s32.totalorder %s6198_s25, 1 }
   0x7   : > { %p132_p3 = scmp.ne.s32.totalorder %s6120_s22, %s6116_s21  ;;  %p133_p4 = scmp.eq.s32.totalorder %s5780_s26, 1 }
   0x8   : > { %s6213_s30 = scalar_select %p114_p1, %s6124_s23, %s116_s28  }
   0x9   : > { %p6215_p5 = por %p127_p2, %p126_p0  ;;  %p6219_p6 = por %p133_p4, %p132_p3 }
   0xa   : > { %p5783_p7 = scmp.ge.s32.totalorder %s6128_s24, 1  ;;  %p220_p8 = scmp.lt.s32.totalorder %s6128_s24, 3 }
   0xc   : > { %p221_p9 = pnand %p5783_p7, %p220_p8 }
   0xe   : > { %224 = sbr.rel (%p221_p9) target bundleno = 649 (0x289), region = 36 }
  0x13   : > { %v8285_v0 = vmov 0.0   ;;  %p258_p10 = scmp.lt.s32.totalorder %s6198_s25, 1  ;;  %v5789_v2 = vld [vmem:[%s8257_s1 + $0x1] ss:$4 sm:$0xf]  ;;  %v8280_v3 = vmov 0   ;;  %v303_v24 = vlaneseq }
  0x14   : > { %v6227_v1 = vcombine.high %v8285_v0, %v8285_v0  ;;  %479 = vmatprep.mubr.f32.mxu0 %v8285_v0  ;;  %550 = vmatprep.mubr.f32.mxu1 %v8285_v0  ;;  %v5790_v5 = vld [vmem:[%s8257_s1 + $0x2] ss:$4 sm:$0xf]  ;;  %v6247_v6 = vld [vmem:[%s8257_s1] ss:$4 sm:$0xf] }
  0x15   : > { %6063 = vset.pattern.permute.xlu0 %v8280_v3  ;;  %s6239_s11 = scalar_select %p258_p10, %s6198_s25, 1  ;;  %v292_v7 = vadd.s32 4294967294, %v5789_v2  ;;  %v296_v8 = vadd.s32 4294967294, %v5790_v5  ;;  %v3861_v9 = vadd.s32 2, %v6247_v6  ;;  %v8339_v13 = vmov 0 }
  0x16   : > { %v6048_v4 = vpack.i.bf16 %v8285_v0, %v6227_v1  ;;  %s6132_s16 = smov 18   ;;  %s6133_s17 = smov 16   ;;  %v8343_v15 = vmov 0  ;;  %v714_v17 = vadd.s32 2, %v5790_v5  ;;  %v1533_v19 = vadd.s32 2, %v5789_v2 }
  0x17   : > { %s5984_s18 = sshll.u32 %s6239_s11, 4  ;;  %vm293_vm0 = vcmp.ge.s32.totalorder %v292_v7, 0  ;;  %vm294_vm1 = vcmp.lt.s32.totalorder %v292_v7, 8  ;;  %vm297_vm2 = vcmp.ge.s32.totalorder %v296_v8, 0  ;;  %vm298_vm3 = vcmp.lt.s32.totalorder %v296_v8, 8  ;;  %s6134_s28 = smov 14  }
  0x18   : > { %6049 = vrot.lane.b32.xlu1 %v6048_v4, %s6132_s16  ;;  %6044 = vrot.lane.b32.xlu0 %v6048_v4, %s6133_s17  ;;  %s6256_s26 = scalar_lea.vmem %s8256_s0, %s5984_s18  ;;  %vm3862_vm4 = vcmp.ge.s32.totalorder %v3861_v9, 0  ;;  %vm3863_vm5 = vcmp.lt.s32.totalorder %v3861_v9, 8  ;;  %vm6272_vm6 = vmand %vm293_vm0, %vm294_vm1  ;;  %vm715_vm12 = vcmp.ge.s32.totalorder %v714_v17, 0  ;;  %vm716_vm13 = vcmp.lt.s32.totalorder %v714_v17, 8  ;;  %s6135_s29 = smov 2  }
  0x19   : > { %v6259_v10 = vld [vmem:[%s6256_s26] sm:$0xff]  ;;  %v6270_v12 = vld [vmem:[%s6256_s26 + $0x8] sm:$0xff]  ;;  %v8340_v13 = vsel %vm6272_vm6, 4294967295, %v8339_v13  ;;  %vm6276_vm7 = vmand %vm297_vm2, %vm298_vm3  ;;  %vm1534_vm1 = vcmp.ge.s32.totalorder %v1533_v19, 0  ;;  %vm1535_vm2 = vcmp.lt.s32.totalorder %v1533_v19, 8  ;;  %s6136_s9 = smov 126  }
  0x1a   : > { %v6267_v11 = vcombine.high %v6259_v10, %v6259_v10  ;;  %vm6280_vm8 = vmand %vm3862_vm4, %vm3863_vm5  ;;  %v8350_v20 = vmov 0  ;;  %v8352_v21 = vmov 0  ;;  %v6360_v22 = vcombine.high %v6270_v12, %v6270_v12  ;;  %s6137_s10 = smov 114   ;;  %s6138_s12 = smov 112   ;;  %v5791_v8 = vld [vmem:[%s8258_s2 + $0x4] sm:$0xf] }
  0x1b   : > { %v8344_v15 = vsel %vm6280_vm8, 4294967295, %v8343_v15  ;;  %vm6292_vm9 = vmand %vm6280_vm8, %vm6272_vm6  ;;  %s6139_s13 = smov 110   ;;  %v288_v23 = vadd.s32 4294967294, %v6247_v6  ;;  %v304_v27 = vshrl.u32 %v303_v24, 7  ;;  %v6436_v28 = vsel %vm6272_vm6, 1, %v8280_v3  ;;  %v7577_v18 = vld [vmem:[%s6256_s26 + $0x8] sm:$0xff] }
  0x1c   : > { %332 = vrot.lane.b32.xlu1 %v6259_v10, %s6132_s16  ;;  %377 = vrot.lane.b32.xlu0 %v6259_v10, %s6133_s17  ;;  %8345 = vst [vmem:[#allocation6_spill] sm:$0xff] %v8344_v15  ;;  %vm6311_vm14 = vmand %vm715_vm12, %vm716_vm13  ;;  %v6463_v42 = vsel %vm6292_vm9, 1, %v8280_v3  ;;  %v8361_v50 = vmov 0  ;;  %v8380_v19 = vmov 0  ;;  %v8491_v25 = vmov 0  ;;  %s5985_s18 = sshll.u32 %s6198_s25, 8 }
  0x1d   : > { %vm6338_vm3 = vmand %vm1534_vm1, %vm1535_vm2  ;;  %vm289_vm13 = vcmp.ge.s32.totalorder %v288_v23, 0  ;;  %vm290_vm1 = vcmp.lt.s32.totalorder %v288_v23, 8  ;;  %v6438_v29 = vsub.s32 2, %v304_v27  ;;  %v6440_v30 = vsub.s32 0, %v304_v27  ;;  %8358 = vst [vmem:[#allocation7_spill] sm:$0xff] %v6463_v42 }
  0x1e   : > { %v8351_v20 = vsel %vm6338_vm3, 4294967295, %v8350_v20  ;;  %vm6346_vm4 = vmand %vm6280_vm8, %vm6338_vm3  ;;  %v6442_v31 = vsub.s32 1, %v304_v27  ;;  %v6452_v35 = vsub.s32 3, %v304_v27 }
  0x1f   : > { %v8353_v21 = vsel %vm6346_vm4, 4294967295, %v8352_v21  ;;  %vm6417_vm2 = vmand %vm289_vm13, %vm290_vm1  ;;  %v2358_v34 = vrot.slane %v6436_v28, %v6440_v30  ;;  %v2366_v36 = vrot.slane %v6436_v28, %v6438_v29  ;;  %vm8271_vm1 = vcmask 130048  }
  0x20   : > { %381 = vrot.lane.b32.xlu1 %v6270_v12, %s6133_s17  ;;  %379 = vrot.lane.b32.xlu0 %v6267_v11, %s6133_s17  ;;  %vm6425_vm12 = vmand %vm6417_vm2, %vm6272_vm6  ;;  %v4063_v55 = vrot.slane %v6463_v42, %v6440_v30  ;;  %v4067_v61 = vrot.slane %v6463_v42, %v6442_v31  ;;  %vm8373_vm4 = vcmask 146432  }
  0x21   : > { %vm301_vm5 = vmand %vm6425_vm12, %vm6276_vm7  ;;  %v352_v32 = vsel %vm6425_vm12, 1, %v8280_v3  ;;  %vm6467_vm11 = vcmp.eq.s32.totalorder %v2358_v34, 1  ;;  %vm6472_vm15 = vcmp.eq.s32.totalorder %v2366_v36, 1 }
  0x22   : > { %v6448_v33 = vsel %vm301_vm5, 1, %v8280_v3  ;;  %v360_v38 = vrot.slane %v352_v32, %v6442_v31  ;;  %v356_v39 = vrot.slane %v352_v32, %v6440_v30  ;;  %v368_v47 = vrot.slane %v352_v32, %v6452_v35  ;;  %vm8371_vm6 = vmand %vm6292_vm9, %vm6276_vm7 }
  0x23   : > { %v310_v37 = vrot.slane %v6448_v33, %v6442_v31  ;;  %v306_v43 = vrot.slane %v6448_v33, %v6440_v30  ;;  %v8362_v50 = vsel %vm6472_vm15, 4294967295, %v8361_v50  ;;  %v364_v51 = vrot.slane %v352_v32, %v6438_v29  ;;  %vm8376_vm8 = vmmov %vm8373_vm4 }
  0x24   : > { %336 = vrot.lane.b32.xlu1 %v6270_v12, %s6132_s16  ;;  %334 = vrot.lane.b32.xlu0 %v6267_v11, %s6132_s16  ;;  %vm6481_vm5 = vcmp.eq.s32.totalorder %v360_v38, 1  ;;  %vm6485_vm13 = vcmp.eq.s32.totalorder %v356_v39, 1  ;;  %v6502_v60 = vsel %vm8371_vm6, 1, %v8280_v3  ;;  %vm6512_vm3 = vcmp.eq.s32.totalorder %v368_v47, 1 }
  0x25   : > { %vm6477_vm0 = vcmp.eq.s32.totalorder %v310_v37, 1  ;;  %vm6492_vm10 = vcmp.eq.s32.totalorder %v306_v43, 1  ;;  %8372 = vst [vmem:[#allocation8_spill] sm:$0xff] %v6502_v60  ;;  %vm6528_vm6 = vcmp.eq.s32.totalorder %v364_v51, 1  ;;  %v3871_v23 = vrot.slane %v6502_v60, %v6440_v30 }
  0x26   : > { %v318_v24 = vrot.slane %v6448_v33, %v6452_v35  ;;  %v3875_v36 = vrot.slane %v6502_v60, %v6442_v31  ;;  %v8383_v37 = vmov 0 }
  0x28   : > { %744 = vrot.lane.b32.xlu1 %v6259_v10, %s6134_s28  ;;  %6054 = vrot.lane.b32.xlu0 %v6048_v4, %s6134_s28 }
  0x2c   : > { %748 = vrot.lane.b32.xlu1 %v6270_v12, %s6134_s28  ;;  %746 = vrot.lane.b32.xlu0 %v6267_v11, %s6134_s28 }
  0x30   : > { %952 = vrot.lane.b32.xlu1 %v6259_v10, %s6135_s29  ;;  %6059 = vrot.lane.b32.xlu0 %v6048_v4, %s6135_s29  ;;  %v314_v4 = vrot.slane %v6448_v33, %v6438_v29 }
  0x34   : > { %956 = vrot.lane.b32.xlu1 %v6270_v12, %s6135_s29  ;;  %954 = vrot.lane.b32.xlu0 %v6267_v11, %s6135_s29 }
  0x38   : > { %1351 = vrot.lane.b32.xlu1 %v6267_v11, %s6136_s9  ;;  %1349 = vrot.lane.b32.xlu0 %v6259_v10, %s6136_s9 }
  0x3c   : > { %1353 = vrot.lane.b32.xlu1 %v6270_v12, %s6136_s9  ;;  %1347 = vrot.lane.b32.xlu0 %v6227_v1, %s6136_s9 }
  0x40   : > { %1562 = vrot.lane.b32.xlu1 %v6259_v10, %s6137_s10  ;;  %1355 = vrot.lane.b32.xlu0 %v6360_v22, %s6136_s9 }
  0x44   : > { %1560 = vrot.lane.b32.xlu1 %v6227_v1, %s6137_s10  ;;  %1564 = vrot.lane.b32.xlu0 %v6267_v11, %s6137_s10 }
  0x48   : > { %1568 = vrot.lane.b32.xlu1 %v6360_v22, %s6137_s10  ;;  %1566 = vrot.lane.b32.xlu0 %v6270_v12, %s6137_s10 }
  0x4c   : > { %1771 = vrot.lane.b32.xlu1 %v6267_v11, %s6138_s12  ;;  %1769 = vrot.lane.b32.xlu0 %v6259_v10, %s6138_s12 }
  0x50   : > { %1773 = vrot.lane.b32.xlu1 %v6270_v12, %s6138_s12  ;;  %1767 = vrot.lane.b32.xlu0 %v6227_v1, %s6138_s12 }
  0x54   : > { %1977 = vrot.lane.b32.xlu1 %v6259_v10, %s6139_s13  ;;  %1775 = vrot.lane.b32.xlu0 %v6360_v22, %s6138_s12 }
  0x58   : > { %1975 = vrot.lane.b32.xlu1 %v6227_v1, %s6139_s13  ;;  %1979 = vrot.lane.b32.xlu0 %v6267_v11, %s6139_s13 }
  0x5c   : > { %1983 = vrot.lane.b32.xlu1 %v6360_v22, %s6139_s13  ;;  %1981 = vrot.lane.b32.xlu0 %v6270_v12, %s6139_s13 }
  0x60   : > { %2375 = vrot.lane.b32.xlu1 %v6360_v22, %s6133_s17  ;;  %2183 = vrot.lane.b32.xlu0 %v6360_v22, %s6132_s16 }
  0x64   : > { %2760 = vrot.lane.b32.xlu1 %v6360_v22, %s6135_s29  ;;  %2568 = vrot.lane.b32.xlu0 %v6360_v22, %s6134_s28 }
  0x68   : > { %3305 = vrot.lane.b32.xlu1 %v8285_v0, %s6137_s10  ;;  %3112 = vrot.lane.b32.xlu0 %v8285_v0, %s6136_s9 }
  0x6c   : > { %3690 = vrot.lane.b32.xlu1 %v8285_v0, %s6139_s13  ;;  %3497 = vrot.lane.b32.xlu0 %v8285_v0, %s6138_s12 }
  0x70   : > { %4080 = vrot.lane.b32.xlu1 %v8285_v0, %s6133_s17  ;;  %3888 = vrot.lane.b32.xlu0 %v8285_v0, %s6132_s16  ;;  %s243_s16 = sand.u32 1, %s6120_s22  }
  0x71   : > { %s5784_s17 = sshll.u32 %s243_s16, 4 }
  0x74   : > { %4466 = vrot.lane.b32.xlu1 %v8285_v0, %s6135_s29  ;;  %4273 = vrot.lane.b32.xlu0 %v8285_v0, %s6134_s28  ;;  %s5665_s29 = scalar_lea.hbm %s8260_s4, %s5985_s18 }
  0x78   : > { %5043 = vrot.lane.b32.xlu1 %v6227_v1, %s6137_s10  ;;  %4849 = vrot.lane.b32.xlu0 %v6227_v1, %s6136_s9  ;;  %s5645_s9 = scalar_lea.sflag [#allocation4], %s243_s16 }
  0x7c   : > { %5235 = vrot.lane.b32.xlu0 %v6227_v1, %s6138_s12  ;;  %5428 = vrot.lane.b32.xlu1 %v6227_v1, %s6139_s13  ;;  %s6141_s12 = smov [#allocation3]  }
  0x7d   : > { %s6072_s13 = sshll.u32 %s6141_s12, 4  ;;  %s6073_s13 = int_to_ptr.vmem [resolvable:$false] %s6072_s13 }
  0x7e   : > { %s6074_s14 = scalar_lea.vmem %s6073_s13, 512 }
  0x8a   : > { %v6050_v40 = vpop.permute.xlu1 %6049  ;;  %v6045_v41 = vpop.permute.xlu0 %6044 }
  0x8b   : > { %v6047_v44 = vunpack.i.h.bf16 %v6045_v41  ;;  %v6046_v45 = vunpack.i.l.bf16 %v6045_v41  ;;  %v6052_v48 = vunpack.i.h.bf16 %v6050_v40  ;;  %v6051_v49 = vunpack.i.l.bf16 %v6050_v40 }
  0x8d   : > { %v384_v58 = vsel %vm8271_vm1, %v6047_v44, %v6046_v45  ;;  %v339_v5 = vsel %vm8376_vm8, %v6052_v48, %v6051_v49  ;;  %vm8387_vm8 = vcmask 31744   ;;  %v8392_v48 = vmov 0 }
  0x8e   : > { %v333_v56 = vpop.permute.xlu1 %332  ;;  %v378_v57 = vpop.permute.xlu0 %377  ;;  %v392_v17 = vsel %vm6485_vm13, %v384_v58, 0.0  ;;  %vm6555_vm13 = vcmp.eq.s32.totalorder %v4067_v61, 1  ;;  %v347_v39 = vsel %vm6492_vm10, %v339_v5, 0.0 }
  0x8f   : > { %v6507_v62 = vsel %vm8373_vm4, %v6051_v49, %v333_v56  ;;  %v6510_v63 = vsel %vm8271_vm1, %v6046_v45, %v378_v57  ;;  %vm8379_vm4 = vcmask 1043456   ;;  %v8384_v37 = vsel %vm6555_vm13, 4294967295, %v8383_v37  ;;  %v351_v45 = vld [vmem:[%s8258_s2] sm:$0xf] }
  0x90   : > { %v393_v6 = vsel %vm6481_vm5, %v6510_v63, 0.0  ;;  %vm6539_vm5 = vcmp.eq.s32.totalorder %v4063_v55, 1  ;;  %v348_v27 = vsel %vm6477_vm0, %v6507_v62, 0.0  ;;  %8385 = vst [vmem:[#allocation10_spill] sm:$0xff] %v8384_v37  ;;  %vm8386_vm0 = vmmov %vm8379_vm4 }
  0x91   : > { %5792 = vmatprep.subr.msk.mxu0 %vm8379_vm4, %v393_v6  ;;  %v8381_v19 = vsel %vm6539_vm5, 4294967295, %v8380_v19  ;;  %vm8389_vm10 = vmmov %vm8386_vm0 }
  0x92   : > { %8382 = vst [vmem:[#allocation9_spill] sm:$0xff] %v8381_v19  ;;  %v6550_v32 = vpop.permute.xlu1 %381  ;;  %5793 = vmatpush1.msk.msra.mxu0 %vm8379_vm4, %v392_v17  ;;  %v380_v34 = vpop.permute.xlu0 %379  ;;  %vm8388_vm4 = vmand %vm6425_vm12, %vm6311_vm14  ;;  %vm6594_vm12 = vcmp.eq.s32.totalorder %v314_v4, 1 }
  0x93   : > { %v6560_v38 = vsel %vm8271_vm1, %v378_v57, %v380_v34  ;;  %v6564_v33 = vsel %vm8271_vm1, %v380_v34, %v6550_v32  ;;  %5798 = vmatprep.subr.msk.mxu0 %vm8386_vm0, %v348_v27  ;;  %5794 = vmatmul.mubr.msk.f32.vlgmr.msra.gmra.mxu0 %vm8387_vm8, %v5791_v8  ;;  %v719_v40 = vsel %vm8388_vm4, 1, %v8280_v3  ;;  %vm6598_vm8 = vcmp.eq.s32.totalorder %v3871_v23, 1  ;;  %vm8398_vm4 = vmand %vm6292_vm9, %vm6311_vm14 }
  0x94   : > { %5799 = vmatpush1.msk.msra.mxu0 %vm8386_vm0, %v347_v39  ;;  %v395_v44 = vsel %vm6512_vm3, %v6564_v33, 0.0  ;;  %v394_v26 = vsel %vm6528_vm6, %v6560_v38, 0.0  ;;  %636 = vmatprep.mubr.f32.mxu0 %v8285_v0  ;;  %v8393_v48 = vsel %vm6598_vm8, 4294967295, %v8392_v48  ;;  %vm6602_vm3 = vcmp.eq.s32.totalorder %v318_v24, 1  ;;  %vm8397_vm6 = vmmov %vm8386_vm0 }
  0x95   : > { %5795 = vmatprep.subr.msk.mxu1 %vm8389_vm10, %v395_v44  ;;  %8394 = vst [vmem:[#allocation11_spill] sm:$0xff] %v8393_v48  ;;  %v6618_v54 = vsel %vm8398_vm4, 1, %v8280_v3  ;;  %v727_v55 = vrot.slane %v719_v40, %v6442_v31  ;;  %vm926_vm0 = vmand %vm6417_vm2, %vm6276_vm7  ;;  %vm6625_vm10 = vcmp.eq.s32.totalorder %v3875_v36, 1  ;;  %v8400_v57 = vmov 0  ;;  %v5839_v48 = vld [vmem:[%s8258_s2 + $0x1c] sm:$0xf] }
  0x96   : > { %v6609_v52 = vpop.permute.xlu1 %336  ;;  %5796 = vmatpush1.msk.msra.mxu1 %vm8397_vm6, %v394_v26  ;;  %v335_v53 = vpop.permute.xlu0 %334  ;;  %8399 = vst [vmem:[#allocation12_spill] sm:$0xff] %v6618_v54  ;;  %v8401_v57 = vsel %vm6625_vm10, 4294967295, %v8400_v57  ;;  %vm8403_vm6 = vcmask 146432   ;;  %vm8405_vm9 = vcmask 31744   ;;  %vm8273_vm4 = vcmask 113664  }
  0x97   : > { %8402 = vst [vmem:[#allocation13_spill] sm:$0xff] %v8401_v57  ;;  %v6630_v58 = vsel %vm8403_vm6, %v333_v56, %v335_v53  ;;  %vm8404_vm1 = vmmov %vm8403_vm6  ;;  %5797 = vmatmul.mubr.msk.f32.vlgmr.msra.gmra.mxu1 %vm8405_vm9, %v5791_v8  ;;  %v723_v59 = vrot.slane %v719_v40, %v6440_v30  ;;  %v731_v4 = vrot.slane %v719_v40, %v6438_v29  ;;  %v6661_v8 = vsel %vm926_vm0, 1, %v8280_v3  ;;  %v5599_v26 = vld [vmem:[%s8259_s3] sm:$0xf] }
  0x98   : > { %v6634_v16 = vsel %vm8404_vm1, %v335_v53, %v6609_v52  ;;  %vm8406_vm5 = vmmov %vm8405_vm9  ;;  %v349_v61 = vsel %vm6594_vm12, %v6630_v58, 0.0  ;;  %707 = vmatprep.mubr.f32.mxu1 %v8285_v0  ;;  %vm8407_vm1 = vcmask 1043456   ;;  %v4256_v5 = vrot.slane %v6618_v54, %v6440_v30  ;;  %5602 = vperm.xlu0 %6063, %v5599_v26  }
  0x99   : > { %5800 = vmatmul.mubr.msk.f32.vlgmr.msra.gmra.mxu0 %vm8406_vm5, %v351_v45  ;;  %v350_v2 = vsel %vm6602_vm3, %v6634_v16, 0.0  ;;  %v735_v6 = vrot.slane %v719_v40, %v6452_v35  ;;  %vm8408_vm5 = vmmov %vm8407_vm1  ;;  %vm6667_vm12 = vcmp.eq.s32.totalorder %v727_v55, 1  ;;  %vm8411_vm6 = vnez %v8344_v15 }
  0x9a   : > { %844 = vmatprep.mubr.f32.mxu0 %v8285_v0  ;;  %5801 = vmatprep.subr.msk.mxu1 %vm8407_vm1, %v350_v2  ;;  %v745_v17 = vpop.permute.xlu1 %744  ;;  %v6055_v23 = vpop.permute.xlu0 %6054  ;;  %vm8412_vm0 = vmand %vm8411_vm6, %vm6276_vm7  ;;  %v4260_v34 = vrot.slane %v6618_v54, %v6442_v31  ;;  %vm6681_vm9 = vcmp.eq.s32.totalorder %v723_v59, 1  ;;  %vm8416_vm1 = vcmask 31744   ;;  %v6689_v44 = vsel %vm6417_vm2, 1, %v8280_v3 }
  0x9b   : > { %5802 = vmatpush1.msk.msra.mxu1 %vm8408_vm5, %v349_v61  ;;  %v6677_v27 = vsel %vm8412_vm0, 1, %v8280_v3  ;;  %v6057_v36 = vunpack.i.h.bf16 %v6055_v23  ;;  %v6056_v39 = vunpack.i.l.bf16 %v6055_v23  ;;  %vm6694_vm5 = vcmp.eq.s32.totalorder %v731_v4, 1 }
  0x9c   : > { %8413 = vst [vmem:[#allocation14_spill] sm:$0xff] %v6677_v27  ;;  %5803 = vmatmul.mubr.msk.f32.vlgmr.msra.gmra.mxu1 %vm8416_vm1, %v351_v45  ;;  %v939_v49 = vrot.slane %v6661_v8, %v6438_v29  ;;  %v935_v53 = vrot.slane %v6661_v8, %v6442_v31  ;;  %v931_v45 = vrot.slane %v6661_v8, %v6440_v30  ;;  %vm6706_vm0 = vcmp.eq.s32.totalorder %v4256_v5, 1 }
  0x9d   : > { %915 = vmatprep.mubr.f32.mxu1 %v8285_v0  ;;  %v751_v55 = vsel %vm8273_vm4, %v6057_v36, %v6056_v39  ;;  %v8419_v59 = vmov 0  ;;  %v6711_v61 = vsel %vm8273_vm4, %v6056_v39, %v745_v17  ;;  %vm6713_vm1 = vcmp.eq.s32.totalorder %v735_v6, 1  ;;  %v5804_v6 = vld [vmem:[%s8258_s2 + $0x8] sm:$0xf] }
  0x9e   : > { %v8420_v59 = vsel %vm6706_vm0, 4294967295, %v8419_v59  ;;  %v6721_v4 = vpop.permute.xlu1 %748  ;;  %v747_v23 = vpop.permute.xlu0 %746  ;;  %v760_v5 = vsel %vm6667_vm12, %v6711_v61, 0.0  ;;  %v759_v36 = vsel %vm6681_vm9, %v751_v55, 0.0  ;;  %v1142_v39 = vrot.slane %v6689_v44, %v6442_v31 }
  0x9f   : > { %8421 = vst [vmem:[#allocation15_spill] sm:$0xff] %v8420_v59  ;;  %vm6733_vm4 = vcmp.eq.s32.totalorder %v4260_v34, 1  ;;  %v8424_v26 = vmov 0  ;;  %vm8427_vm3 = vcmask 113664   ;;  %vm8429_vm12 = vcmask 1043456  }
  0xa0   : > { %v8425_v26 = vsel %vm6733_vm4, 4294967295, %v8424_v26  ;;  %v6738_v43 = vsel %vm8427_vm3, %v745_v17, %v747_v23  ;;  %vm8428_vm13 = vmmov %vm8427_vm3  ;;  %5805 = vmatprep.subr.msk.mxu0 %vm8429_vm12, %v760_v5  ;;  %v4449_v40 = vrot.slane %v6677_v27, %v6440_v30  ;;  %v943_v55 = vrot.slane %v6661_v8, %v6452_v35 }
  0xa1   : > { %8426 = vst [vmem:[#allocation16_spill] sm:$0xff] %v8425_v26  ;;  %v6742_v24 = vsel %vm8428_vm13, %v747_v23, %v6721_v4  ;;  %v761_v34 = vsel %vm6694_vm5, %v6738_v43, 0.0  ;;  %vm8430_vm3 = vmmov %vm8429_vm12  ;;  %vm6768_vm5 = vcmp.eq.s32.totalorder %v939_v49, 1  ;;  %vm6772_vm12 = vcmp.eq.s32.totalorder %v935_v53, 1 }
  0xa2   : > { %5806 = vmatpush1.msk.msra.mxu0 %vm8430_vm3, %v759_v36  ;;  %v762_v23 = vsel %vm6713_vm1, %v6742_v24, 0.0  ;;  %vm8431_vm13 = vmand %vm6417_vm2, %vm6311_vm14  ;;  %v1138_v2 = vrot.slane %v6689_v44, %v6440_v30  ;;  %v953_v17 = vpop.permute.xlu1 %952  ;;  %v6060_v49 = vpop.permute.xlu0 %6059  ;;  %v1150_v51 = vrot.slane %v6689_v44, %v6452_v35  ;;  %v4453_v36 = vrot.slane %v6677_v27, %v6442_v31 }
  0xa3   : > { %v6765_v8 = vsel %vm8431_vm13, 1, %v8280_v3  ;;  %vm8432_vm9 = vmmov %vm8430_vm3  ;;  %vm8437_vm3 = vcmask 31744   ;;  %vm6783_vm13 = vcmp.eq.s32.totalorder %v931_v45, 1  ;;  %v6062_v56 = vunpack.i.h.bf16 %v6060_v49 }
  0xa4   : > { %5808 = vmatprep.subr.msk.mxu1 %vm8432_vm9, %v762_v23  ;;  %5807 = vmatmul.mubr.msk.f32.vlgmr.msra.gmra.mxu0 %vm8437_vm3, %v5804_v6  ;;  %vm8438_vm1 = vmmov %vm8432_vm9  ;;  %vm6788_vm9 = vcmp.eq.s32.totalorder %v1142_v39, 1  ;;  %v6061_v9 = vunpack.i.l.bf16 %v6060_v49  ;;  %v1333_v45 = vrot.slane %v6765_v8, %v6442_v31  ;;  %v8443_v39 = vmov 0 }
  0xa5   : > { %5809 = vmatpush1.msk.msra.mxu1 %vm8438_vm1, %v761_v34  ;;  %1052 = vmatprep.mubr.f32.mxu0 %v8285_v0  ;;  %v1146_v34 = vrot.slane %v6689_v44, %v6438_v29  ;;  %vm6801_vm1 = vcmp.eq.s32.totalorder %v4449_v40, 1  ;;  %vm6805_vm0 = vcmp.eq.s32.totalorder %v943_v55, 1  ;;  %vm8449_vm8 = vcmask 15360  }
  0xa6   : > { %5810 = vmatmul.mubr.msk.f32.vlgmr.msra.gmra.mxu1 %vm8437_vm3, %v5804_v6  ;;  %v8444_v39 = vsel %vm6801_vm1, 4294967295, %v8443_v39  ;;  %vm8448_vm3 = vmand %vm8411_vm6, %vm6311_vm14  ;;  %v959_v44 = vsel %vm8449_vm8, %v6062_v56, %v6061_v9  ;;  %v1158_v55 = vsel %vm6788_vm9, %v6259_v10, 0.0  ;;  %vm6825_vm4 = vcmp.eq.s32.totalorder %v1138_v2, 1  ;;  %v6829_v7 = vpop.permute.xlu1 %956  ;;  %v955_v59 = vpop.permute.xlu0 %954 }
  0xa7   : > { %8445 = vst [vmem:[#allocation17_spill] sm:$0xff] %v8444_v39  ;;  %v6815_v6 = vsel %vm8448_vm3, 1, %v8280_v3  ;;  %1123 = vmatprep.mubr.f32.mxu1 %v8285_v0  ;;  %vm8450_vm10 = vmmov %vm8449_vm8  ;;  %v967_v56 = vsel %vm6783_vm13, %v959_v44, 0.0  ;;  %vm6836_vm8 = vcmp.eq.s32.totalorder %v1150_v51, 1  ;;  %v8455_v10 = vmov 0 }
  0xa8   : > { %v6820_v40 = vsel %vm8450_vm10, %v6061_v9, %v953_v17  ;;  %vm6840_vm10 = vcmp.eq.s32.totalorder %v4453_v36, 1  ;;  %vm8458_vm9 = vcmask 15360   ;;  %vm8460_vm6 = vcmask 1043456   ;;  %v5811_v51 = vld [vmem:[%s8258_s2 + $0xc] sm:$0xf] }
  0xa9   : > { %v968_v3 = vsel %vm6772_vm12, %v6820_v40, 0.0  ;;  %v8456_v10 = vsel %vm6840_vm10, 4294967295, %v8455_v10  ;;  %v6845_v2 = vsel %vm8458_vm9, %v953_v17, %v955_v59  ;;  %vm8459_vm3 = vmmov %vm8458_vm9  ;;  %vm6852_vm12 = vcmp.eq.s32.totalorder %v1333_v45, 1 }
  0xaa   : > { %8457 = vst [vmem:[#allocation18_spill] sm:$0xff] %v8456_v10  ;;  %v6849_v53 = vsel %vm8459_vm3, %v955_v59, %v6829_v7  ;;  %5812 = vmatprep.subr.msk.mxu0 %vm8460_vm6, %v968_v3  ;;  %vm6859_vm13 = vcmp.eq.s32.totalorder %v1146_v34, 1  ;;  %v969_v17 = vsel %vm6768_vm5, %v6845_v2, 0.0  ;;  %v1157_v23 = vsel %vm6825_vm4, %v6227_v1, 0.0  ;;  %vm8468_vm5 = vmmov %vm8460_vm6  ;;  %v1352_v34 = vpop.permute.xlu1 %1351  ;;  %v1350_v44 = vpop.permute.xlu0 %1349 }
  0xab   : > { %5813 = vmatpush1.msk.msra.mxu0 %vm8460_vm6, %v967_v56  ;;  %v970_v59 = vsel %vm6805_vm0, %v6849_v53, 0.0  ;;  %vm8465_vm9 = vnez %v8351_v20  ;;  %vm8469_vm1 = vmmov %vm8468_vm5  ;;  %v4831_v41 = vrot.slane %v6815_v6, %v6440_v30  ;;  %v1329_v45 = vrot.slane %v6765_v8, %v6440_v30 }
  0xac   : > { %vm6880_vm3 = vmand %vm6417_vm2, %vm8465_vm9  ;;  %5815 = vmatprep.subr.msk.mxu1 %vm8468_vm5, %v970_v59  ;;  %5819 = vmatprep.subr.msk.mxu0 %vm8469_vm1, %v1158_v55  ;;  %v1160_v1 = vsel %vm6836_vm8, %v6270_v12, 0.0  ;;  %vm8471_vm4 = vcmask 31744   ;;  %v1159_v55 = vsel %vm6859_vm13, %v6267_v11, 0.0  ;;  %vm8472_vm0 = vcmask 1031168   ;;  %v5818_v12 = vld [vmem:[%s8258_s2 + $0x10] sm:$0xf] }
  0xad   : > { %vm8470_vm2 = vmmov %vm8469_vm1  ;;  %5814 = vmatmul.mubr.msk.f32.vlgmr.msra.gmra.mxu0 %vm8471_vm4, %v5811_v51  ;;  %v6902_v49 = vsel %vm8472_vm0, %v1350_v44, %v1352_v34  ;;  %v8476_v9 = vmov 0  ;;  %v1341_v5 = vrot.slane %v6765_v8, %v6452_v35  ;;  %v8510_v26 = vmov 0.0  }
  0xae   : > { %5816 = vmatpush1.msk.msra.mxu1 %vm8470_vm2, %v969_v17  ;;  %5820 = vmatpush1.msk.msra.mxu0 %vm8469_vm1, %v1157_v23  ;;  %vm1538_vm8 = vmand %vm6880_vm3, %vm6276_vm7  ;;  %v1367_v56 = vsel %vm6852_vm12, %v6902_v49, 0.0  ;;  %vm6919_vm2 = vcmp.eq.s32.totalorder %v4831_v41, 1  ;;  %v1337_v17 = vrot.slane %v6765_v8, %v6438_v29  ;;  %v1354_v59 = vpop.permute.xlu1 %1353  ;;  %v1348_v23 = vpop.permute.xlu0 %1347  ;;  %v8483_v41 = vmov 0  }
  0xaf   : > { %1242 = vmatprep.mubr.f32.mxu0 %v8285_v0  ;;  %vm8473_vm13 = vmmov %vm8471_vm4  ;;  %v8477_v9 = vsel %vm6919_vm2, 4294967295, %v8476_v9  ;;  %vm6923_vm4 = vcmp.eq.s32.totalorder %v1329_v45, 1  ;;  %v1539_v45 = vsel %vm1538_vm8, 1, %v8483_v41  ;;  %v7009_v36 = vsel %vm6880_vm3, 1, %v8483_v41 }
  0xb0   : > { %5817 = vmatmul.mubr.msk.f32.vlgmr.msra.gmra.mxu1 %vm8473_vm13, %v5811_v51  ;;  %vm8474_vm6 = vmmov %vm8469_vm1  ;;  %8478 = vst [vmem:[#allocation19_spill] sm:$0xff] %v8477_v9  ;;  %v4835_v51 = vrot.slane %v6815_v6, %v6442_v31  ;;  %v1555_v8 = vrot.slane %v1539_v45, %v6452_v35  ;;  %vm8523_vm2 = vcmask 31744   ;;  %vm8524_vm10 = vnez %v8340_v13 }
  0xb1   : > { %5822 = vmatprep.subr.msk.mxu1 %vm8474_vm6, %v1160_v1  ;;  %vm8475_vm5 = vmmov %vm8469_vm1  ;;  %1313 = vmatprep.mubr.f32.mxu1 %v8285_v0  ;;  %v1750_v10 = vrot.slane %v7009_v36, %v6440_v30  ;;  %v1758_v27 = vrot.slane %v7009_v36, %v6438_v29  ;;  %v2362_v57 = vrot.slane %v6436_v28, %v6442_v31 }
  0xb2   : > { %5826 = vmatprep.subr.msk.mxu0 %vm8475_vm5, %v1367_v56  ;;  %vm8481_vm0 = vmmov %vm8469_vm1  ;;  %vm8484_vm1 = vcmask 1031168   ;;  %v5825_v56 = vld [vmem:[%s8258_s2 + $0x14] sm:$0xf]  ;;  %vm6952_vm5 = vcmp.eq.s32.totalorder %v1341_v5, 1 }
  0xb3   : > { %5823 = vmatpush1.msk.msra.mxu1 %vm8481_vm0, %v1159_v55  ;;  %vm8482_vm12 = vmmov %vm8473_vm13  ;;  %v6938_v1 = vsel %vm8484_vm1, %v1352_v34, %v1354_v59 }
  0xb4   : > { %5821 = vmatmul.mubr.msk.f32.vlgmr.msra.gmra.mxu0 %vm8482_vm12, %v5818_v12  ;;  %8485 = vst [vmem:[#allocation20_spill] sm:$0xff] %v6938_v1  ;;  %vm8486_vm13 = vmmov %vm8484_vm1  ;;  %vm8497_vm1 = vnez %v8353_v21 }
  0xb5   : > { %v1358_v55 = vsel %vm8486_vm13, %v1348_v23, %v1350_v44  ;;  %1451 = vmatprep.mubr.f32.mxu0 %v8285_v0  ;;  %vm8487_vm6 = vmmov %vm8482_vm12  ;;  %v1543_v44 = vrot.slane %v1539_v45, %v6440_v30  ;;  %v1547_v23 = vrot.slane %v1539_v45, %v6442_v31  ;;  %vm6963_vm12 = vcmp.eq.s32.totalorder %v1337_v17, 1 }
  0xb6   : > { %v1366_v3 = vsel %vm6923_vm4, %v1358_v55, 0.0  ;;  %5824 = vmatmul.mubr.msk.f32.vlgmr.msra.gmra.mxu1 %vm8487_vm6, %v5818_v12  ;;  %vm8488_vm8 = vmmov %vm8481_vm0  ;;  %vm6959_vm0 = vcmp.eq.s32.totalorder %v4835_v51, 1  ;;  %v1563_v12 = vpop.permute.xlu1 %1562  ;;  %v1551_v55 = vrot.slane %v1539_v45, %v6438_v29 }
  0xb7   : > { %5827 = vmatpush1.msk.msra.mxu0 %vm8488_vm8, %v1366_v3  ;;  %1522 = vmatprep.mubr.f32.mxu1 %v8285_v0  ;;  %v8492_v25 = vsel %vm6959_vm0, 4294967295, %v8491_v25  ;;  %v6967_v3 = vpop.permute.xlu0 %1355  ;;  %vm8496_vm4 = vmmov %vm8487_vm6  ;;  %vm8500_vm6 = vcmask 1031168   ;;  %vm8297_vm8 = vcmask 932864   ;;  %vm8324_vm0 = vcmask 916480  }
  0xb8   : > { %8493 = vst [vmem:[#allocation21_spill] sm:$0xff] %v8492_v25  ;;  %5828 = vmatmul.mubr.msk.f32.vlgmr.msra.gmra.mxu0 %vm8496_vm4, %v5825_v56  ;;  %vm8498_vm13 = vmand %vm8497_vm1, %vm6276_vm7  ;;  %v6980_v51 = vsel %vm8500_vm6, %v1354_v59, %v6967_v3  ;;  %v1368_v59 = vsel %vm6963_vm12, %v6938_v1, 0.0  ;;  %vm8501_vm4 = vcmask 1043456   ;;  %vm6999_vm6 = vcmp.eq.s32.totalorder %v1547_v23, 1 }
  0xb9   : > { %v6976_v5 = vsel %vm8498_vm13, 1, %v8483_v41  ;;  %1664 = vmatprep.mubr.f32.mxu0 %v8285_v0  ;;  %v1369_v17 = vsel %vm6952_vm5, %v6980_v51, 0.0  ;;  %vm6995_vm13 = vcmp.eq.s32.totalorder %v1543_v44, 1  ;;  %vm8506_vm5 = vmmov %vm8501_vm4  ;;  %vm8507_vm12 = vcmask 31744  }
  0xba   : > { %8499 = vst [vmem:[#allocation22_spill] sm:$0xff] %v6976_v5  ;;  %5829 = vmatprep.subr.msk.mxu1 %vm8501_vm4, %v1369_v17  ;;  %v5026_v45 = vrot.slane %v6976_v5, %v6440_v30  ;;  %v1561_v39 = vpop.permute.xlu1 %1560  ;;  %v5030_v44 = vrot.slane %v6976_v5, %v6442_v31  ;;  %vm7023_vm4 = vcmp.eq.s32.totalorder %v1551_v55, 1  ;;  %v7045_v55 = vsel %vm8497_vm1, 1, %v8483_v41  ;;  %vm2161_vm15 = vmand %vm8524_vm10, %vm6276_vm7 }
  0xbb   : > { %v1565_v25 = vpop.permute.xlu0 %1564  ;;  %5830 = vmatpush1.msk.msra.mxu1 %vm8506_vm5, %v1368_v59  ;;  %v1571_v23 = vsel %vm8297_vm8, %v1561_v39, %v1563_v12  ;;  %v5832_v39 = vld [vmem:[%s8258_s2 + $0x18] sm:$0xf]  ;;  %8516 = vst [vmem:[#allocation24_spill] sm:$0xff] %v7045_v55  ;;  %v7090_v0 = vsel %vm2161_vm15, 1, %v8483_v41  ;;  %vm2546_vm15 = vmand %vm8524_vm10, %vm6311_vm14  ;;  %vm8552_vm10 = vcmask 1043456  }
  0xbc   : > { %v7015_v17 = vsel %vm8297_vm8, %v1563_v12, %v1565_v25  ;;  %5831 = vmatmul.mubr.msk.f32.vlgmr.msra.gmra.mxu1 %vm8507_vm12, %v5825_v56  ;;  %v1579_v9 = vsel %vm6995_vm13, %v1571_v23, 0.0  ;;  %vm7032_vm12 = vcmp.eq.s32.totalorder %v5026_v45, 1  ;;  %v8511_v56 = vmov 0 }
  0xbd   : > { %v1580_v59 = vsel %vm6999_vm6, %v7015_v17, 0.0  ;;  %1735 = vmatprep.mubr.f32.mxu1 %v8510_v26  ;;  %v8512_v56 = vsel %vm7032_vm12, 4294967295, %v8511_v56  ;;  %vm7036_vm13 = vcmp.eq.s32.totalorder %v1555_v8, 1  ;;  %v1754_v12 = vrot.slane %v7009_v36, %v6442_v31  ;;  %vm8517_vm6 = vmmov %vm8506_vm5 }
  0xbe   : > { %5833 = vmatprep.subr.msk.mxu0 %vm8506_vm5, %v1580_v59  ;;  %8513 = vst [vmem:[#allocation23_spill] sm:$0xff] %v8512_v56  ;;  %v7047_v34 = vpop.permute.xlu1 %1568  ;;  %vm7050_vm5 = vcmp.eq.s32.totalorder %v5030_v44, 1  ;;  %v8518_v45 = vmov 0  ;;  %v8529_v56 = vmov 0  ;;  %vm7103_vm12 = vcmp.eq.s32.totalorder %v1750_v10, 1 }
  0xbf   : > { %v1567_v23 = vpop.permute.xlu0 %1566  ;;  %5834 = vmatpush1.msk.msra.mxu0 %vm8517_vm6, %v1579_v9  ;;  %v8519_v45 = vsel %vm7050_vm5, 4294967295, %v8518_v45  ;;  %v2170_v21 = vrot.slane %v7090_v0, %v6442_v31 }
  0xc0   : > { %8520 = vst [vmem:[#allocation25_spill] sm:$0xff] %v8519_v45  ;;  %v7055_v8 = vsel %vm8297_vm8, %v1565_v25, %v1567_v23  ;;  %v7059_v59 = vsel %vm8297_vm8, %v1567_v23, %v7047_v34  ;;  %5835 = vmatmul.mubr.msk.f32.vlgmr.msra.gmra.mxu0 %vm8523_vm2, %v5832_v39  ;;  %v5218_v23 = vrot.slane %v7045_v55, %v6440_v30  ;;  %vm8525_vm2 = vmmov %vm8517_vm6  ;;  %vm1764_vm6 = vcmp.eq.s32.totalorder %v1754_v12, 1 }
  0xc1   : > { %8521 = vst [vmem:[#allocation26_spill] sm:$0xff] %v7055_v8  ;;  %8522 = vst [vmem:[#allocation27_spill] sm:$0xff] %v7059_v59  ;;  %v1581_v9 = vsel %vm7023_vm4, %v7055_v8, 0.0  ;;  %v1582_v44 = vsel %vm7036_vm13, %v7059_v59, 0.0  ;;  %1871 = vmatprep.mubr.f32.mxu0 %v8510_v26  ;;  %v4071_v59 = vrot.slane %v6463_v42, %v6438_v29 }
  0xc2   : > { %5836 = vmatprep.subr.msk.mxu1 %vm8525_vm2, %v1582_v44  ;;  %v1772_v25 = vpop.permute.xlu1 %1771  ;;  %vm8526_vm4 = vmmov %vm8525_vm2  ;;  %vm8528_vm2 = vcmask 31744   ;;  %vm7097_vm8 = vcmp.eq.s32.totalorder %v5218_v23, 1  ;;  %v2166_v23 = vrot.slane %v7090_v0, %v6440_v30 }
  0xc3   : > { %v1770_v19 = vpop.permute.xlu0 %1769  ;;  %5837 = vmatpush1.msk.msra.mxu1 %vm8526_vm4, %v1581_v9  ;;  %vm1953_vm13 = vmand %vm6880_vm3, %vm6311_vm14  ;;  %v8530_v56 = vsel %vm7097_vm8, 4294967295, %v8529_v56  ;;  %v1762_v9 = vrot.slane %v7009_v36, %v6452_v35  ;;  %vm8577_vm8 = vcmask 31744  }
  0xc4   : > { %v7093_v12 = vsel %vm8324_vm0, %v1770_v19, %v1772_v25  ;;  %5838 = vmatmul.mubr.msk.f32.vlgmr.msra.gmra.mxu1 %vm8528_vm2, %v5832_v39  ;;  %8531 = vst [vmem:[#allocation29_spill] sm:$0xff] %v8530_v56  ;;  %v1954_v45 = vsel %vm1953_vm13, 1, %v8483_v41  ;;  %v5222_v39 = vrot.slane %v7045_v55, %v6442_v31  ;;  %vm8535_vm3 = vmmov %vm8526_vm4  ;;  %vm7145_vm2 = vcmp.eq.s32.totalorder %v2166_v23, 1 }
  0xc5   : > { %8527 = vst [vmem:[#allocation28_spill] sm:$0xff] %v7093_v12  ;;  %v1787_v44 = vsel %vm1764_vm6, %v7093_v12, 0.0  ;;  %1942 = vmatprep.mubr.f32.mxu1 %v8510_v26  ;;  %vm7134_vm6 = vcmp.eq.s32.totalorder %v1762_v9, 1  ;;  %v8538_v12 = vmov 0  ;;  %v1966_v56 = vrot.slane %v1954_v45, %v6438_v29 }
  0xc6   : > { %5840 = vmatprep.subr.msk.mxu0 %vm8526_vm4, %v1787_v44  ;;  %v1774_v15 = vpop.permute.xlu1 %1773  ;;  %vm7141_vm13 = vcmp.eq.s32.totalorder %v5222_v39, 1  ;;  %vm8546_vm4 = vcmask 31744   ;;  %v2187_v42 = vsel %vm7145_vm2, %v6507_v62, 0.0 }
  0xc7   : > { %v1768_v44 = vpop.permute.xlu0 %1767  ;;  %v7117_v10 = vsel %vm8324_vm0, %v1772_v25, %v1774_v15  ;;  %v1958_v25 = vrot.slane %v1954_v45, %v6440_v30  ;;  %v8539_v12 = vsel %vm7141_vm13, 4294967295, %v8538_v12  ;;  %vm8578_vm13 = vcmask 1043456  }
  0xc8   : > { %8534 = vst [vmem:[#allocation30_spill] sm:$0xff] %v7117_v10  ;;  %v1778_v37 = vsel %vm8324_vm0, %v1768_v44, %v1770_v19  ;;  %v1962_v44 = vrot.slane %v1954_v45, %v6442_v31  ;;  %8540 = vst [vmem:[#allocation31_spill] sm:$0xff] %v8539_v12  ;;  %v1970_v19 = vrot.slane %v1954_v45, %v6452_v35 }
  0xc9   : > { %v1786_v54 = vsel %vm7103_vm12, %v1778_v37, 0.0  ;;  %vm7151_vm12 = vcmp.eq.s32.totalorder %v1758_v27, 1  ;;  %v7172_v27 = vsel %vm2546_vm15, 1, %v8483_v41  ;;  %vm8581_vm2 = vmmov %vm8578_vm13 }
  0xca   : > { %5841 = vmatpush1.msk.msra.mxu0 %vm8535_vm3, %v1786_v54  ;;  %v1978_v9 = vpop.permute.xlu1 %1977  ;;  %vm8547_vm3 = vmand %vm8497_vm1, %vm6311_vm14  ;;  %vm7184_vm1 = vcmp.eq.s32.totalorder %v1958_v25, 1  ;;  %v1788_v60 = vsel %vm7151_vm12, %v7117_v10, 0.0  ;;  %vm7196_vm15 = vcmp.eq.s32.totalorder %v1962_v44, 1  ;;  %v2551_v55 = vrot.slane %v7172_v27, %v6440_v30 }
  0xcb   : > { %v7155_v36 = vpop.permute.xlu0 %1775  ;;  %5842 = vmatmul.mubr.msk.f32.vlgmr.msra.gmra.mxu0 %vm8546_vm4, %v5839_v48  ;;  %v7164_v39 = vsel %vm8547_vm3, 1, %v8483_v41  ;;  %vm8325_vm4 = vcmask 900096   ;;  %v2555_v44 = vrot.slane %v7172_v27, %v6442_v31  ;;  %vm8556_vm12 = vcmask 31744  }
  0xcc   : > { %8545 = vst [vmem:[#allocation32_spill] sm:$0xff] %v7155_v36  ;;  %8548 = vst [vmem:[#allocation33_spill] sm:$0xff] %v7164_v39  ;;  %v7176_v23 = vsel %vm8324_vm0, %v1774_v15, %v7155_v36  ;;  %2079 = vmatprep.mubr.f32.mxu0 %v8510_v26  ;;  %v5411_v25 = vrot.slane %v7164_v39, %v6440_v30  ;;  %v7208_v15 = vsel %vm6276_vm7, 1, %v8483_v41  ;;  %vm7220_vm3 = vcmp.eq.s32.totalorder %v2170_v21, 1 }
  0xcd   : > { %8549 = vst [vmem:[#allocation34_spill] sm:$0xff] %v7176_v23  ;;  %v1789_v37 = vsel %vm7134_vm6, %v7176_v23, 0.0  ;;  %vm8555_vm6 = vmmov %vm8552_vm10  ;;  %v2755_v46 = vrot.slane %v7208_v15, %v6452_v35 }
  0xce   : > { %5843 = vmatprep.subr.msk.mxu1 %vm8552_vm10, %v1789_v37  ;;  %v1976_v54 = vpop.permute.xlu1 %1975  ;;  %v5415_v37 = vrot.slane %v7164_v39, %v6442_v31  ;;  %vm7231_vm10 = vcmp.eq.s32.totalorder %v1966_v56, 1 }
  0xcf   : > { %v1980_v12 = vpop.permute.xlu0 %1979  ;;  %5844 = vmatpush1.msk.msra.mxu1 %vm8555_vm6, %v1788_v60  ;;  %v1986_v45 = vsel %vm8325_vm4, %v1976_v54, %v1978_v9  ;;  %v2370_v60 = vrot.slane %v6436_v28, %v6452_v35  ;;  %vm7238_vm6 = vcmp.eq.s32.totalorder %v2362_v57, 1  ;;  %v8564_v28 = vmov 0 }
  0xd0   : > { %v7217_v23 = vsel %vm8325_vm4, %v1978_v9, %v1980_v12  ;;  %5845 = vmatmul.mubr.msk.f32.vlgmr.msra.gmra.mxu1 %vm8556_vm12, %v5839_v48  ;;  %v1994_v36 = vsel %vm7184_vm1, %v1986_v45, 0.0  ;;  %v5846_v48 = vld [vmem:[%s8258_s2 + $0x20] sm:$0xf]  ;;  %vm8563_vm12 = vcmask 1043456   ;;  %vm7244_vm1 = vcmp.eq.s32.totalorder %v5411_v25, 1 }
  0xd1   : > { %v1995_v39 = vsel %vm7196_vm15, %v7217_v23, 0.0  ;;  %2150 = vmatprep.mubr.f32.mxu1 %v8510_v26  ;;  %v8565_v28 = vsel %vm7244_vm1, 4294967295, %v8564_v28  ;;  %vm7248_vm15 = vcmp.eq.s32.totalorder %v1970_v19, 1  ;;  %v2178_v57 = vrot.slane %v7090_v0, %v6452_v35  ;;  %vm8569_vm0 = vmmov %vm8563_vm12 }
  0xd2   : > { %5847 = vmatprep.subr.msk.mxu0 %vm8563_vm12, %v1995_v39  ;;  %8566 = vst [vmem:[#allocation35_spill] sm:$0xff] %v8565_v28  ;;  %v7256_v21 = vpop.permute.xlu1 %1983  ;;  %v2188_v39 = vsel %vm7220_vm3, %v6630_v58, 0.0  ;;  %vm7262_vm12 = vcmp.eq.s32.totalorder %v2555_v44, 1  ;;  %v2747_v19 = vrot.slane %v7208_v15, %v6442_v31  ;;  %vm7268_vm4 = vcmp.eq.s32.totalorder %v5415_v37, 1  ;;  %v5860_v44 = vld [vmem:[%s8258_s2 + $0x28] sm:$0xf] }
  0xd3   : > { %v1982_v13 = vpop.permute.xlu0 %1981  ;;  %5848 = vmatpush1.msk.msra.mxu0 %vm8569_vm0, %v1994_v36  ;;  %v8572_v45 = vmov 0  ;;  %vm8575_vm0 = vcmask 900096   ;;  %vm7284_vm5 = vcmp.eq.s32.totalorder %v2370_v60, 1  ;;  %v2380_v37 = vsel %vm7238_vm6, %v6560_v38, 0.0  ;;  %v5853_v60 = vld [vmem:[%s8258_s2 + $0x24] sm:$0xf] }
  0xd4   : > { %v8573_v45 = vsel %vm7268_vm4, 4294967295, %v8572_v45  ;;  %v7276_v36 = vsel %vm8575_vm0, %v1980_v12, %v1982_v13  ;;  %vm8576_vm3 = vmmov %vm8575_vm0  ;;  %5849 = vmatmul.mubr.msk.f32.vlgmr.msra.gmra.mxu0 %vm8577_vm8, %v5846_v48  ;;  %5854 = vmatprep.subr.msk.mxu0 %vm8578_vm13, %v2188_v39  ;;  %vm7311_vm0 = vcmp.eq.s32.totalorder %v2178_v57, 1  ;;  %v2563_v9 = vrot.slane %v7172_v27, %v6452_v35 }
  0xd5   : > { %8574 = vst [vmem:[#allocation36_spill] sm:$0xff] %v8573_v45  ;;  %v7280_v10 = vsel %vm8576_vm3, %v1982_v13, %v7256_v21  ;;  %v1996_v47 = vsel %vm7231_vm10, %v7276_v36, 0.0  ;;  %5855 = vmatpush1.msk.msra.mxu0 %vm8581_vm2, %v2187_v42  ;;  %2272 = vmatprep.mubr.f32.mxu0 %v8510_v26  ;;  %vm8582_vm8 = vmmov %vm8581_vm2  ;;  %vm7307_vm10 = vcmp.eq.s32.totalorder %v4071_v59, 1  ;;  %v8588_v13 = vrot.slane %v7090_v0, %v6438_v29  ;;  %v5930_v42 = vld [vmem:[%s8258_s2 + $0x50] sm:$0xf] }
  0xd6   : > { %v1997_v12 = vsel %vm7248_vm15, %v7280_v10, 0.0  ;;  %vm8583_vm13 = vmmov %vm8581_vm2  ;;  %v2743_v59 = vrot.slane %v7208_v15, %v6440_v30  ;;  %v7329_v57 = vpop.permute.xlu1 %2375  ;;  %vm7336_vm3 = vcmp.eq.s32.totalorder %v2551_v55, 1 }
  0xd7   : > { %5850 = vmatprep.subr.msk.mxu1 %vm8582_vm8, %v1997_v12  ;;  %5861 = vmatprep.subr.msk.mxu0 %vm8583_vm13, %v2380_v37  ;;  %vm7323_vm6 = vcmp.eq.s32.totalorder %v8588_v13, 1  ;;  %v7331_v12 = vpop.permute.xlu0 %2183  ;;  %vm8591_vm15 = vmmov %vm8581_vm2  ;;  %v2559_v37 = vrot.slane %v7172_v27, %v6438_v29  ;;  %vm8594_vm2 = vcmask 130048   ;;  %vm8595_vm8 = vcmask 146432  }
  0xd8   : > { %5851 = vmatpush1.msk.msra.mxu1 %vm8591_vm15, %v1996_v47  ;;  %v7343_v0 = vsel %vm8594_vm2, %v6550_v32, %v7329_v57  ;;  %v7348_v13 = vsel %vm8595_vm8, %v6609_v52, %v7331_v12  ;;  %vm8596_vm13 = vcmask 31744   ;;  %v8598_v52 = vsel %vm6467_vm11, %v6510_v63, 0.0 }
  0xd9   : > { %5852 = vmatmul.mubr.msk.f32.vlgmr.msra.gmra.mxu1 %vm8596_vm13, %v5846_v48  ;;  %vm8597_vm15 = vmmov %vm8596_vm13  ;;  %v2382_v55 = vsel %vm7284_vm5, %v7343_v0, 0.0  ;;  %v2190_v32 = vsel %vm7311_vm0, %v7348_v13, 0.0  ;;  %vm8599_vm2 = vcmask 1043456   ;;  %v2573_v48 = vsel %vm7262_vm12, %v6738_v43, 0.0 }
  0xda   : > { %5856 = vmatmul.mubr.msk.f32.vlgmr.msra.gmra.mxu0 %vm8597_vm15, %v5853_v60  ;;  %2343 = vmatprep.mubr.f32.mxu1 %v8510_v26  ;;  %v2189_v47 = vsel %vm7323_vm6, %v6634_v16, 0.0  ;;  %vm8600_vm5 = vmmov %vm8599_vm2  ;;  %vm7380_vm11 = vcmp.eq.s32.totalorder %v2563_v9, 1  ;;  %vm7384_vm12 = vcmp.eq.s32.totalorder %v2747_v19, 1  ;;  %v7388_v54 = vpop.permute.xlu1 %2760  ;;  %v2572_v39 = vsel %vm7336_vm3, %v6711_v61, 0.0 }
  0xdb   : > { %5862 = vmatpush1.msk.msra.mxu0 %vm8599_vm2, %v8598_v52  ;;  %vm8601_vm0 = vmmov %vm8599_vm2  ;;  %v7390_v52 = vpop.permute.xlu0 %2568  ;;  %2464 = vmatprep.mubr.f32.mxu0 %v8510_v26  ;;  %vm8607_vm8 = vcmask 113664   ;;  %vm7404_vm2 = vcmp.eq.s32.totalorder %v2559_v37, 1 }
  0xdc   : > { %5868 = vmatprep.subr.msk.mxu0 %vm8600_vm5, %v2573_v48  ;;  %5857 = vmatprep.subr.msk.mxu1 %vm8601_vm0, %v2190_v32  ;;  %vm8606_vm6 = vmmov %vm8601_vm0  ;;  %v7400_v9 = vsel %vm8607_vm8, %v6721_v4, %v7390_v52  ;;  %v2751_v32 = vrot.slane %v7208_v15, %v6438_v29  ;;  %v2765_v4 = vsel %vm7384_vm12, %v6845_v2, 0.0  ;;  %v3090_v15 = vsel %vm6311_vm14, 1, %v8483_v41 }
  0xdd   : > { %5858 = vmatpush1.msk.msra.mxu1 %vm8606_vm6, %v2189_v47  ;;  %vm8608_vm15 = vmmov %vm8596_vm13  ;;  %v2575_v61 = vsel %vm7380_vm11, %v7400_v9, 0.0  ;;  %vm7422_vm6 = vcmp.eq.s32.totalorder %v2743_v59, 1  ;;  %vm7429_vm8 = vcmp.eq.s32.totalorder %v2755_v46, 1  ;;  %vm8616_vm11 = vcmask 15360  }
  0xde   : > { %5859 = vmatmul.mubr.msk.f32.vlgmr.msra.gmra.mxu1 %vm8596_vm13, %v5853_v60  ;;  %5863 = vmatmul.mubr.msk.f32.vlgmr.msra.gmra.mxu0 %vm8608_vm15, %v5860_v44  ;;  %vm3283_vm3 = vmand %vm8465_vm9, %vm6276_vm7  ;;  %v7436_v37 = vsel %vm8616_vm11, %v6829_v7, %v7388_v54  ;;  %vm8617_vm13 = vnez %v8362_v50  ;;  %v7448_v48 = vpop.permute.xlu1 %3305  ;;  %v3098_v50 = vrot.slane %v3090_v15, %v6442_v31  ;;  %v2574_v7 = vsel %vm7404_vm2, %v6742_v24, 0.0 }
  0xdf   : > { %vm8611_vm5 = vmmov %vm8601_vm0  ;;  %5869 = vmatpush1.msk.msra.mxu0 %vm8601_vm0, %v2572_v39  ;;  %v8618_v59 = vsel %vm8617_vm13, %v6564_v33, 0.0  ;;  %v7450_v47 = vpop.permute.xlu0 %3112  ;;  %2535 = vmatprep.mubr.f32.mxu1 %v8510_v26  ;;  %v3284_v46 = vsel %vm3283_vm3, 1, %v8483_v41  ;;  %vm7465_vm11 = vcmp.eq.s32.totalorder %v2751_v32, 1  ;;  %v2764_v25 = vsel %vm7422_vm6, %v6820_v40, 0.0  ;;  %v5874_v40 = vld [vmem:[%s8258_s2 + $0x30] sm:$0xf] }
  0xe0   : > { %5864 = vmatprep.subr.msk.mxu1 %vm8611_vm5, %v2382_v55  ;;  %vm8619_vm12 = vmmov %vm8601_vm0  ;;  %v5867_v55 = vld [vmem:[%s8258_s2 + $0x2c] sm:$0xf]  ;;  %2657 = vmatprep.mubr.f32.mxu0 %v8510_v26  ;;  %v3094_v39 = vrot.slane %v3090_v15, %v6440_v30  ;;  %v2767_v14 = vsel %vm7429_vm8, %v7436_v37, 0.0  ;;  %v3102_v19 = vrot.slane %v3090_v15, %v6438_v29  ;;  %v3288_v32 = vrot.slane %v3284_v46, %v6440_v30 }
  0xe1   : > { %5865 = vmatpush1.msk.msra.mxu1 %vm8619_vm12, %v8618_v59  ;;  %vm8620_vm15 = vmmov %vm8601_vm0  ;;  %vm7492_vm6 = vcmp.eq.s32.totalorder %v3098_v50, 1  ;;  %v3292_v60 = vrot.slane %v3284_v46, %v6442_v31  ;;  %v3296_v50 = vrot.slane %v3284_v46, %v6438_v29 }
  0xe2   : > { %5875 = vmatprep.subr.msk.mxu0 %vm8620_vm15, %v2765_v4  ;;  %vm8621_vm5 = vmmov %vm8601_vm0  ;;  %vm8622_vm0 = vcmask 31744   ;;  %vm7503_vm15 = vcmp.eq.s32.totalorder %v3094_v39, 1  ;;  %v6066_v39 = vld [vmem:[%s6256_s26] sm:$0xff]  ;;  %s245_s26 = scalar_lea.vmem [#allocation3], %s5784_s17 }
  0xe3   : > { %5871 = vmatprep.subr.msk.mxu1 %vm8621_vm5, %v2575_v61  ;;  %5866 = vmatmul.mubr.msk.f32.vlgmr.msra.gmra.mxu1 %vm8622_vm0, %v5860_v44  ;;  %vm8625_vm7 = vmmov %vm8622_vm0  ;;  %v3106_v44 = vrot.slane %v3090_v15, %v6452_v35  ;;  %v7486_v61 = vpop.permute.xlu1 %3690  ;;  %v7488_v4 = vpop.permute.xlu0 %3497  ;;  %v2766_v15 = vsel %vm7465_vm11, %v6849_v53, 0.0  ;;  %s5667_s19 = sshll.u32 %s245_s26, 4  ;;  %s5668_s19 = int_to_ptr.vmem [resolvable:$true] %s5667_s19 }
  0xe4   : > { %5870 = vmatmul.mubr.msk.f32.vlgmr.msra.gmra.mxu0 %vm8625_vm7, %v5867_v55  ;;  %vm8626_vm2 = vmmov %vm8621_vm5  ;;  %2728 = vmatprep.mubr.f32.mxu1 %v8510_v26  ;;  %s6068_s10 = scalar_lea.vmem %s5668_s19, 256  ;;  %p6075_p0 = scmp.lt.s32.totalorder %s5668_s19, %s6073_s13 }
  0xe5   : > { %5872 = vmatpush1.msk.msra.mxu1 %vm8626_vm2, %v2574_v7  ;;  %vm8627_vm3 = vmmov %vm8626_vm2  ;;  %2849 = vmatprep.mubr.f32.mxu0 %v8510_v26  ;;  %v3476_v7 = vsel %vm8465_vm9, 1, %v8483_v41  ;;  %vm7518_vm7 = vcmp.eq.s32.totalorder %v3106_v44, 1  ;;  %p6069_p11 = scmp.ne.s32.totalorder %s5668_s19, %s6068_s10  ;;  %p6076_p1 = scmp.lt.s32.totalorder %s6074_s14, %s6068_s10 }
  0xe6   : > { %5876 = vmatpush1.msk.msra.mxu0 %vm8627_vm3, %v2764_v25  ;;  %vm8628_vm13 = vmmov %vm8626_vm2  ;;  %v3488_v56 = vrot.slane %v3476_v7, %v6438_v29  ;;  %v3492_v27 = vrot.slane %v3476_v7, %v6452_v35 }
  0xe7   : > { %5878 = vmatprep.subr.msk.mxu1 %vm8628_vm13, %v2767_v14  ;;  %vm8631_vm8 = vmmov %vm8626_vm2  ;;  %v3117_v14 = vsel %vm7492_vm6, %v6938_v1, 0.0  ;;  %vm7536_vm13 = vcmp.eq.s32.totalorder %v3102_v19, 1  ;;  %v7547_v62 = vpop.permute.xlu0 %3888  ;;  %vm7550_vm6 = vcmp.eq.s32.totalorder %v3292_v60, 1  ;;  %v3484_v19 = vrot.slane %v3476_v7, %v6442_v31  ;;  %p6070_p12 = pnand %p6069_p11, %p6215_p5  ;;  %p6077_p2 = por %p6076_p1, %p6075_p0 }
  0xe8   : > { %5882 = vmatprep.subr.msk.mxu0 %vm8631_vm8, %v6267_v11  ;;  %vm8632_vm12 = vmmov %vm8622_vm0  ;;  %5877 = vmatmul.mubr.msk.f32.vlgmr.msra.gmra.mxu0 %vm8622_vm0, %v5874_v40  ;;  %vm7540_vm8 = vcmp.eq.s32.totalorder %v3288_v32, 1  ;;  %v3480_v32 = vrot.slane %v3476_v7, %v6440_v30  ;;  %v3116_v60 = vsel %vm7503_vm15, %v6902_v49, 0.0  ;;  %v5038_v7 = vrot.slane %v6976_v5, %v6452_v35 }
  0xe9   : > { %5873 = vmatmul.mubr.msk.f32.vlgmr.msra.gmra.mxu1 %vm8632_vm12, %v5867_v55  ;;  %vm3668_vm5 = vmand %vm8465_vm9, %vm6311_vm14  ;;  %v3300_v55 = vrot.slane %v3284_v46, %v6452_v35  ;;  %5883 = vmatpush1.msk.msra.mxu0 %vm8627_vm3, %v6066_v39  ;;  %v5881_v46 = vld [vmem:[%s8258_s2 + $0x34] sm:$0xf]  ;;  %vm7585_vm9 = vcmp.eq.s32.totalorder %v3296_v50, 1  ;;  %v3310_v50 = vsel %vm7550_vm6, %v7055_v8, 0.0  ;;  %v3118_v8 = vsel %vm7536_vm13, %v6980_v51, 0.0  ;;  %p6071_p13 = pneg %p6070_p12 }
  0xea   : > { %vm8635_vm11 = vmmov %vm8626_vm2  ;;  %vm8638_vm2 = vcmask 1031168   ;;  %2920 = vmatprep.mubr.f32.mxu1 %v8510_v26  ;;  %3008 = vmatprep.mubr.f32.mxu0 %v8510_v26  ;;  %vm7625_vm6 = vcmp.eq.s32.totalorder %v3480_v32, 1  ;;  %v3309_v44 = vsel %vm7540_vm8, %v7015_v17, 0.0 }
  0xeb   : > { %5879 = vmatpush1.msk.msra.mxu1 %vm8635_vm11, %v2766_v15  ;;  %v7525_v25 = vsel %vm8638_vm2, %v6967_v3, %v7450_v47  ;;  %vm8644_vm12 = vmmov %vm8627_vm3  ;;  %v7545_v15 = vpop.permute.xlu1 %4080  ;;  %vm8648_vm11 = vcmask 31744   ;;  %vm7589_vm15 = vcmp.eq.s32.totalorder %v3300_v55, 1  ;;  %v5888_v55 = vld [vmem:[%s8258_s2 + $0x38] sm:$0xf]  ;;  %v8679_v3 = vld [vmem:[#allocation30_spill] sm:$0xff]  ;;  %p6078_p3 = pnand %p6077_p2, %p6071_p13 }
  0xec   : > { %8639 = vst [vmem:[#allocation37_spill] sm:$0xff] %v7525_v25  ;;  %5889 = vmatprep.subr.msk.mxu0 %vm8644_vm12, %v3117_v14  ;;  %v7563_v14 = vsel %vm3668_vm5, 1, %v8483_v41  ;;  %vm8647_vm0 = vmmov %vm8627_vm3  ;;  %v3119_v20 = vsel %vm7518_vm7, %v7525_v25, 0.0  ;;  %vm8655_vm5 = vcmask 932864  }
  0xed   : > { %5885 = vmatprep.subr.msk.mxu1 %vm8647_vm0, %v6360_v22  ;;  %5880 = vmatmul.mubr.msk.f32.vlgmr.msra.gmra.mxu1 %vm8648_vm11, %v5874_v40  ;;  %vm8649_vm2 = vmmov %vm8648_vm11  ;;  %v4843_v40 = vrot.slane %v6815_v6, %v6452_v35  ;;  %v7596_v63 = vsel %vm8655_vm5, %v7047_v34, %v7448_v48  ;;  %v3673_v28 = vrot.slane %v7563_v14, %v6440_v30  ;;  %vm7629_vm11 = vcmp.eq.s32.totalorder %v3488_v56, 1 }
  0xee   : > { %5884 = vmatmul.mubr.msk.f32.vlgmr.msra.gmra.mxu0 %vm8649_vm2, %v5881_v46  ;;  %vm8650_vm14 = vmmov %vm8647_vm0  ;;  %8656 = vst [vmem:[#allocation38_spill] sm:$0xff] %v7596_v63  ;;  %v3685_v45 = vrot.slane %v7563_v14, %v6452_v35  ;;  %3079 = vmatprep.mubr.f32.mxu1 %v8510_v26  ;;  %vm7633_vm2 = vcmp.eq.s32.totalorder %v3492_v27, 1  ;;  %v3312_v32 = vsel %vm7589_vm15, %v7596_v63, 0.0  ;;  %v8681_v63 = vld [vmem:[#allocation33_spill] sm:$0xff] }
  0xef   : > { %5886 = vmatpush1.msk.msra.mxu1 %vm8650_vm14, %v7577_v18  ;;  %vm8657_vm7 = vmmov %vm8647_vm0  ;;  %v7611_v34 = vpop.permute.xlu1 %4466  ;;  %3201 = vmatprep.mubr.f32.mxu0 %v8510_v26  ;;  %vm8668_vm14 = vcmask 31744   ;;  %v5423_v1 = vrot.slane %v8681_v63, %v6452_v35 }
  0xf0   : > { %5890 = vmatpush1.msk.msra.mxu0 %vm8657_vm7, %v3116_v60  ;;  %vm8658_vm3 = vmmov %vm8647_vm0  ;;  %v7613_v60 = vpop.permute.xlu0 %4273  ;;  %vm7647_vm7 = vcmp.eq.s32.totalorder %v5038_v7, 1  ;;  %v5895_v7 = vld [vmem:[%s8258_s2 + $0x3c] sm:$0xf] }
  0xf1   : > { %5892 = vmatprep.subr.msk.mxu1 %vm8658_vm3, %v3119_v20  ;;  %vm8659_vm12 = vmmov %vm8647_vm0  ;;  %vm7616_vm0 = vcmp.eq.s32.totalorder %v3484_v19, 1  ;;  %v3677_v20 = vrot.slane %v7563_v14, %v6442_v31  ;;  %5887 = vmatmul.mubr.msk.f32.vlgmr.msra.gmra.mxu1 %vm8668_vm14, %v5881_v46  ;;  %v8675_v46 = vld [vmem:[#allocation32_spill] sm:$0xff] }
  0xf2   : > { %5896 = vmatprep.subr.msk.mxu0 %vm8659_vm12, %v3310_v50  ;;  %vm8669_vm13 = vmmov %vm8668_vm14  ;;  %vm8676_vm12 = vcmask 916480   ;;  %vm7672_vm14 = vcmp.eq.s32.totalorder %v3673_v28, 1  ;;  %3272 = vmatprep.mubr.f32.mxu1 %v8510_v26  ;;  %v8689_v28 = vld [vmem:[#allocation27_spill] sm:$0xff] }
  0xf3   : > { %5891 = vmatmul.mubr.msk.f32.vlgmr.msra.gmra.mxu0 %vm8669_vm13, %v5888_v55  ;;  %vm8670_vm5 = vmmov %vm8658_vm3  ;;  %vm7651_vm3 = vcmp.eq.s32.totalorder %v4843_v40, 1  ;;  %v7658_v17 = vsel %vm8676_vm12, %v8675_v46, %v7488_v4  ;;  %v8680_v40 = vld [vmem:[#allocation24_spill] sm:$0xff]  ;;  %vm7678_vm13 = vcmp.eq.s32.totalorder %v3685_v45, 1  ;;  %v3311_v63 = vsel %vm7585_vm9, %v8689_v28, 0.0 }
  0xf4   : > { %5893 = vmatpush1.msk.msra.mxu1 %vm8670_vm5, %v3118_v8  ;;  %vm8677_vm8 = vmmov %vm8670_vm5  ;;  %v3502_v8 = vsel %vm7616_vm0, %v8679_v3, 0.0  ;;  %v5230_v49 = vrot.slane %v8680_v40, %v6452_v35  ;;  %v4850_v3 = vpop.permute.xlu0 %4849  ;;  %vm8691_vm12 = vcmask 932864   ;;  %3394 = vmatprep.mubr.f32.mxu0 %v8510_v26  ;;  %v3504_v28 = vsel %vm7633_vm2, %v7658_v17, 0.0 }
  0xf5   : > { %5897 = vmatpush1.msk.msra.mxu0 %vm8677_vm8, %v3309_v44  ;;  %vm8678_vm15 = vmmov %vm8670_vm5  ;;  %v3681_v44 = vrot.slane %v7563_v14, %v6438_v29  ;;  %v8690_v14 = vld [vmem:[#allocation8_spill] sm:$0xff]  ;;  %vm8692_vm8 = vcmask 1031168   ;;  %v3694_v50 = vsel %vm7672_vm14, %v7217_v23, 0.0 }
  0xf6   : > { %5899 = vmatprep.subr.msk.mxu1 %vm8678_vm15, %v3312_v32  ;;  %vm8686_vm0 = vmmov %vm8670_vm5  ;;  %v5044_v32 = vpop.permute.xlu1 %5043  ;;  %vm7684_vm5 = vcmp.eq.s32.totalorder %v3677_v20, 1  ;;  %v3883_v45 = vrot.slane %v8690_v14, %v6452_v35  ;;  %vm8693_vm15 = vcmask 31744   ;;  %v8694_v20 = vld [vmem:[#allocation28_spill] sm:$0xff] }
  0xf7   : > { %5903 = vmatprep.subr.msk.mxu0 %vm8686_vm0, %v3502_v8  ;;  %v7695_v5 = vsel %vm8691_vm12, %v7448_v48, %v5044_v32  ;;  %v7699_v8 = vsel %vm8692_vm8, %v7450_v47, %v4850_v3  ;;  %5894 = vmatmul.mubr.msk.f32.vlgmr.msra.gmra.mxu1 %vm8693_vm15, %v5888_v55  ;;  %v3501_v59 = vsel %vm7625_vm6, %v8694_v20, 0.0  ;;  %vm8695_vm9 = vmmov %vm8693_vm15  ;;  %vm8696_vm12 = vcmask 900096   ;;  %v8705_v32 = vld [vmem:[#allocation34_spill] sm:$0xff] }
  0xf8   : > { %v5050_v48 = vsel %vm7647_vm7, %v7695_v5, 0.0  ;;  %v4856_v47 = vsel %vm7651_vm3, %v7699_v8, 0.0  ;;  %5898 = vmatmul.mubr.msk.f32.vlgmr.msra.gmra.mxu0 %vm8695_vm9, %v5895_v7  ;;  %5900 = vmatpush1.msk.msra.mxu1 %vm8686_vm0, %v3311_v63  ;;  %v7720_v25 = vsel %vm8696_vm12, %v7256_v21, %v7486_v61  ;;  %vm8697_vm6 = vmmov %vm8686_vm0  ;;  %v3695_v55 = vsel %vm7684_vm5, %v7276_v36, 0.0  ;;  %v5902_v63 = vld [vmem:[%s8258_s2 + $0x40] sm:$0xf]  ;;  %v5236_v40 = vpop.permute.xlu0 %5235  ;;  %v8830_v5 = vld [vmem:[#allocation33_spill] sm:$0xff] }
  0xf9   : > { %5904 = vmatpush1.msk.msra.mxu0 %vm8697_vm6, %v3501_v59  ;;  %vm8698_vm2 = vmmov %vm8686_vm0  ;;  %vm7727_vm8 = vcmp.eq.s32.totalorder %v5230_v49, 1  ;;  %vm7734_vm15 = vcmp.eq.s32.totalorder %v5423_v1, 1  ;;  %vm7738_vm9 = vcmp.eq.s32.totalorder %v3681_v44, 1  ;;  %3465 = vmatprep.mubr.f32.mxu1 %v8510_v26  ;;  %v3879_v1 = vrot.slane %v8690_v14, %v6438_v29  ;;  %v5909_v59 = vld [vmem:[%s8258_s2 + $0x44] sm:$0xf] }
  0xfa   : > { %5906 = vmatprep.subr.msk.mxu1 %vm8698_vm2, %v3504_v28  ;;  %5910 = vmatprep.subr.msk.mxu0 %vm8686_vm0, %v3695_v55  ;;  %v5429_v49 = vpop.permute.xlu1 %5428  ;;  %v3503_v28 = vsel %vm7629_vm11, %v8705_v32, 0.0  ;;  %vm8706_vm5 = vcmask 916480   ;;  %vm8707_vm12 = vcmask 31744   ;;  %vm8708_vm6 = vcmask 900096   ;;  %vm8710_vm2 = vmmov %vm8686_vm0  ;;  %v8716_v55 = vld [vmem:[#allocation13_spill] sm:$0xff] }
  0xfb   : > { %v7751_v20 = vsel %vm8706_vm5, %v7488_v4, %v5236_v40  ;;  %3586 = vmatprep.mubr.f32.mxu0 %v8510_v26  ;;  %5901 = vmatmul.mubr.msk.f32.vlgmr.msra.gmra.mxu1 %vm8707_vm12, %v5895_v7  ;;  %v7757_v44 = vsel %vm8708_vm6, %v7486_v61, %v5429_v49  ;;  %v3697_v14 = vsel %vm7678_vm13, %v7720_v25, 0.0  ;;  %vm8709_vm11 = vmmov %vm8707_vm12  ;;  %v8711_v7 = vld [vmem:[#allocation7_spill] sm:$0xff]  ;;  %vm7775_vm14 = vcmp.eq.s32.totalorder %v3883_v45, 1 }
  0xfc   : > { %v5242_v4 = vsel %vm7727_vm8, %v7751_v20, 0.0  ;;  %5905 = vmatmul.mubr.msk.f32.vlgmr.msra.gmra.mxu0 %vm8709_vm11, %v5902_v63  ;;  %5907 = vmatpush1.msk.msra.mxu1 %vm8710_vm2, %v3503_v28  ;;  %v5435_v61 = vsel %vm7734_vm15, %v7757_v44, 0.0  ;;  %v4075_v46 = vrot.slane %v8711_v7, %v6452_v35  ;;  %vm8714_vm13 = vcmask 146432   ;;  %vm8715_vm5 = vmmov %vm8686_vm0  ;;  %v8727_v28 = vld [vmem:[#allocation11_spill] sm:$0xff] }
  0xfd   : > { %v3890_v39 = vsel %vm8714_vm13, %v7331_v12, %v7547_v62  ;;  %5911 = vmatpush1.msk.msra.mxu0 %vm8686_vm0, %v3694_v50  ;;  %5913 = vmatprep.subr.msk.mxu1 %vm8715_vm5, %v3697_v14  ;;  %vm8717_vm12 = vnez %v8716_v55  ;;  %vm8719_vm6 = vmmov %vm8686_vm0  ;;  %v3696_v12 = vsel %vm7738_vm9, %v7280_v10, 0.0  ;;  %vm7798_vm2 = vcmp.eq.s32.totalorder %v3879_v1, 1  ;;  %v5916_v50 = vld [vmem:[%s8258_s2 + $0x48] sm:$0xf]  ;;  %v8732_v14 = vld [vmem:[#allocation10_spill] sm:$0xff] }
  0xfe   : > { %v8718_v40 = vsel %vm8717_vm12, %v6634_v16, 0.0  ;;  %3657 = vmatprep.mubr.f32.mxu1 %v8510_v26  ;;  %3779 = vmatprep.mubr.f32.mxu0 %v8510_v26  ;;  %v3895_v45 = vsel %vm7775_vm14, %v3890_v39, 0.0  ;;  %vm8722_vm13 = vmmov %vm8709_vm11  ;;  %vm7806_vm5 = vcmp.eq.s32.totalorder %v4075_v46, 1  ;;  %vm8725_vm9 = vcmask 130048   ;;  %v8762_v16 = vld [vmem:[#allocation15_spill] sm:$0xff]  ;;  %v8806_v39 = vld [vmem:[#allocation25_spill] sm:$0xff] }
  0xff   : > { %5917 = vmatprep.subr.msk.mxu0 %vm8719_vm6, %v8718_v40  ;;  %5908 = vmatmul.mubr.msk.f32.vlgmr.msra.gmra.mxu1 %vm8709_vm11, %v5902_v63  ;;  %v4082_v21 = vsel %vm8725_vm9, %v7329_v57, %v7545_v15  ;;  %v8726_v63 = vld [vmem:[#allocation12_spill] sm:$0xff]  ;;  %vm8728_vm12 = vnez %v8727_v28  ;;  %vm8730_vm14 = vmmov %vm8686_vm0  ;;  %vm8733_vm11 = vnez %v8732_v14  ;;  %v8736_v57 = vld [vmem:[#allocation6_spill] sm:$0xff]  ;;  %v3894_v15 = vsel %vm7798_vm2, %v7348_v13, 0.0 }
 0x100   : > { %5912 = vmatmul.mubr.msk.f32.vlgmr.msra.gmra.mxu0 %vm8722_vm13, %v5909_v59  ;;  %5914 = vmatpush1.msk.msra.mxu1 %vm8686_vm0, %v3696_v12  ;;  %v4268_v49 = vrot.slane %v8726_v63, %v6452_v35  ;;  %v8729_v1 = vsel %vm8728_vm12, %v6630_v58, 0.0  ;;  %vm8731_vm6 = vmmov %vm8686_vm0  ;;  %v8734_v7 = vsel %vm8733_vm11, %v6564_v33, 0.0  ;;  %vm8738_vm9 = vcmask 31744   ;;  %v8750_v12 = vld [vmem:[#allocation16_spill] sm:$0xff] }
 0x101   : > { %5918 = vmatpush1.msk.msra.mxu0 %vm8730_vm14, %v8729_v1  ;;  %5920 = vmatprep.subr.msk.mxu1 %vm8731_vm6, %v3895_v45  ;;  %vm8735_vm13 = vmmov %vm8686_vm0  ;;  %vm8737_vm0 = vnez %v8736_v57  ;;  %v4264_v46 = vrot.slane %v8726_v63, %v6438_v29  ;;  %v4087_v33 = vsel %vm7806_vm5, %v4082_v21, 0.0  ;;  %vm8744_vm2 = vcmask 113664   ;;  %v8769_v63 = vld [vmem:[#allocation18_spill] sm:$0xff]  ;;  %v8780_v1 = vld [vmem:[#allocation17_spill] sm:$0xff] }
 0x102   : > { %5924 = vmatprep.subr.msk.mxu0 %vm8735_vm13, %v8734_v7  ;;  %3850 = vmatprep.mubr.f32.mxu1 %v8510_v26  ;;  %v4637_v58 = vsel %vm8737_vm0, 1, %v8483_v41  ;;  %vm8739_vm12 = vmmov %vm8738_vm9  ;;  %v8741_v41 = vld [vmem:[#allocation14_spill] sm:$0xff]  ;;  %v4275_v13 = vsel %vm8744_vm2, %v7390_v52, %v7613_v60  ;;  %vm8751_vm0 = vnez %v8750_v12  ;;  %v5937_v14 = vld [vmem:[%s8258_s2 + $0x54] sm:$0xf]  ;;  %v4839_v57 = vrot.slane %v6815_v6, %v6438_v29 }
 0x103   : > { %3977 = vmatprep.mubr.f32.mxu0 %v8510_v26  ;;  %5915 = vmatmul.mubr.msk.f32.vlgmr.msra.gmra.mxu1 %vm8738_vm9, %v5909_v59  ;;  %vm8740_vm14 = vmmov %vm8731_vm6  ;;  %v4461_v23 = vrot.slane %v8741_v41, %v6452_v35  ;;  %vm7846_vm6 = vcmp.eq.s32.totalorder %v4268_v49, 1  ;;  %v8745_v59 = vld [vmem:[#allocation9_spill] sm:$0xff]  ;;  %v5923_v35 = vld [vmem:[%s8258_s2 + $0x4c] sm:$0xf]  ;;  %v4645_v40 = vrot.slane %v4637_v58, %v6442_v31  ;;  %v8752_v62 = vsel %vm8751_vm0, %v6742_v24, 0.0 }
 0x104   : > { %5919 = vmatmul.mubr.msk.f32.vlgmr.msra.gmra.mxu0 %vm8739_vm12, %v5916_v50  ;;  %5921 = vmatpush1.msk.msra.mxu1 %vm8740_vm14, %v3894_v15  ;;  %vm8746_vm11 = vnez %v8745_v59  ;;  %vm8748_vm5 = vmmov %vm8735_vm13  ;;  %v4457_v52 = vrot.slane %v8741_v41, %v6438_v29  ;;  %vm7874_vm14 = vcmp.eq.s32.totalorder %v4264_v46, 1  ;;  %v4280_v31 = vsel %vm7846_vm6, %v4275_v13, 0.0  ;;  %v8795_v15 = vld [vmem:[#allocation22_spill] sm:$0xff]  ;;  %v8808_v13 = vld [vmem:[#allocation27_spill] sm:$0xff] }
 0x105   : > { %v8747_v55 = vsel %vm8746_vm11, %v6560_v38, 0.0  ;;  %vm8749_vm13 = vmmov %vm8748_vm5  ;;  %4048 = vmatprep.mubr.f32.mxu1 %v8510_v26  ;;  %4169 = vmatprep.mubr.f32.mxu0 %v8510_v26  ;;  %v4641_v38 = vrot.slane %v4637_v58, %v6440_v30  ;;  %v8757_v24 = vsel %vm7307_vm10, %v7343_v0, 0.0  ;;  %vm8763_vm0 = vnez %v8762_v16  ;;  %v8820_v12 = vld [vmem:[#allocation26_spill] sm:$0xff] }
 0x106   : > { %5925 = vmatpush1.msk.msra.mxu0 %vm8748_vm5, %v8747_v55  ;;  %5927 = vmatprep.subr.msk.mxu1 %vm8749_vm13, %v4087_v33  ;;  %vm8753_vm9 = vmmov %vm8748_vm5  ;;  %vm8761_vm13 = vcmask 15360   ;;  %v8764_v21 = vsel %vm8763_vm0, %v6738_v43, 0.0  ;;  %vm7902_vm10 = vcmp.eq.s32.totalorder %v4645_v40, 1  ;;  %v4649_v43 = vrot.slane %v4637_v58, %v6438_v29  ;;  %v8790_v58 = vld [vmem:[#allocation21_spill] sm:$0xff]  ;;  %v8818_v40 = vld [vmem:[#allocation23_spill] sm:$0xff] }
 0x107   : > { %5931 = vmatprep.subr.msk.mxu0 %vm8753_vm9, %v8752_v62  ;;  %5922 = vmatmul.mubr.msk.f32.vlgmr.msra.gmra.mxu1 %vm8739_vm12, %v5916_v50  ;;  %vm8756_vm2 = vmmov %vm8739_vm12  ;;  %v4468_v45 = vsel %vm8761_vm13, %v7388_v54, %v7611_v34  ;;  %vm8770_vm12 = vnez %v8769_v63  ;;  %v4279_v34 = vsel %vm7874_vm14, %v7400_v9, 0.0  ;;  %vm7918_vm13 = vcmp.eq.s32.totalorder %v4641_v38, 1  ;;  %v8811_v55 = vld [vmem:[#allocation37_spill] sm:$0xff]  ;;  %v5958_v38 = vld [vmem:[%s8258_s2 + $0x60] sm:$0xf] }
 0x108   : > { %5926 = vmatmul.mubr.msk.f32.vlgmr.msra.gmra.mxu0 %vm8756_vm2, %v5923_v35  ;;  %vm8758_vm11 = vmmov %vm8748_vm5  ;;  %vm7886_vm5 = vcmp.eq.s32.totalorder %v4461_v23, 1  ;;  %v8771_v54 = vsel %vm8770_vm12, %v6849_v53, 0.0  ;;  %4240 = vmatprep.mubr.f32.mxu1 %v8510_v26  ;;  %vm7922_vm0 = vcmp.eq.s32.totalorder %v4457_v52, 1  ;;  %v4660_v9 = vsel %vm7902_vm10, %v7577_v18, 0.0  ;;  %v5951_v23 = vld [vmem:[%s8258_s2 + $0x5c] sm:$0xf] }
 0x109   : > { %5928 = vmatpush1.msk.msra.mxu1 %vm8758_vm11, %v8757_v24  ;;  %vm8765_vm6 = vmmov %vm8753_vm9  ;;  %4362 = vmatprep.mubr.f32.mxu0 %v8510_v26  ;;  %vm8773_vm11 = vcmask 31744   ;;  %v4473_v28 = vsel %vm7886_vm5, %v4468_v45, 0.0  ;;  %vm8781_vm14 = vnez %v8780_v1  ;;  %v4659_v18 = vsel %vm7918_vm13, %v6267_v11, 0.0  ;;  %v5944_v11 = vld [vmem:[%s8258_s2 + $0x58] sm:$0xf]  ;;  %v8824_v52 = vld [vmem:[#allocation31_spill] sm:$0xff] }
 0x10a   : > { %5932 = vmatpush1.msk.msra.mxu0 %vm8765_vm6, %v8764_v21  ;;  %vm8766_vm9 = vmmov %vm8765_vm6  ;;  %v8782_v50 = vsel %vm8781_vm14, %v6845_v2, 0.0  ;;  %vm7947_vm5 = vcmp.eq.s32.totalorder %v4649_v43, 1  ;;  %v4472_v2 = vsel %vm7922_vm0, %v7436_v37, 0.0  ;;  %vm8791_vm0 = vnez %v8790_v58  ;;  %v8835_v24 = vld [vmem:[#allocation30_spill] sm:$0xff] }
 0x10b   : > { %5934 = vmatprep.subr.msk.mxu1 %vm8766_vm9, %v4280_v31  ;;  %vm8772_vm2 = vmmov %vm8765_vm6  ;;  %5929 = vmatmul.mubr.msk.f32.vlgmr.msra.gmra.mxu1 %vm8773_vm11, %v5923_v35  ;;  %v4661_v37 = vsel %vm7947_vm5, %v6360_v22, 0.0  ;;  %v8792_v6 = vsel %vm8791_vm0, %v6980_v51, 0.0  ;;  %v5034_v46 = vrot.slane %v8795_v15, %v6438_v29  ;;  %v8800_v22 = vld [vmem:[#allocation19_spill] sm:$0xff]  ;;  %v8802_v51 = vld [vmem:[#allocation20_spill] sm:$0xff]  ;;  %v8840_v16 = vsel %vm7268_vm4, %v7280_v10, 0.0 }
 0x10c   : > { %5938 = vmatprep.subr.msk.mxu0 %vm8772_vm2, %v8771_v54  ;;  %vm8778_vm6 = vmmov %vm8773_vm11  ;;  %4433 = vmatprep.mubr.f32.mxu1 %v8510_v26  ;;  %v8828_v31 = vld [vmem:[#allocation38_spill] sm:$0xff]  ;;  %v8846_v20 = vsel %vm7244_vm1, %v7276_v36, 0.0  ;;  %v5972_v10 = vld [vmem:[%s8258_s2 + $0x68] sm:$0xf] }
 0x10d   : > { %5933 = vmatmul.mubr.msk.f32.vlgmr.msra.gmra.mxu0 %vm8778_vm6, %v5930_v42  ;;  %vm8779_vm9 = vmmov %vm8772_vm2 }
 0x10e   : > { %5935 = vmatpush1.msk.msra.mxu1 %vm8779_vm9, %v4279_v34  ;;  %vm8783_vm12 = vmmov %vm8772_vm2  ;;  %4555 = vmatprep.mubr.f32.mxu0 %v8510_v26 }
 0x10f   : > { %5939 = vmatpush1.msk.msra.mxu0 %vm8783_vm12, %v8782_v50  ;;  %5941 = vmatprep.subr.msk.mxu1 %vm8772_vm2, %v4473_v28  ;;  %vm8786_vm10 = vmmov %vm8772_vm2 }
 0x110   : > { %5945 = vmatprep.subr.msk.mxu0 %vm8786_vm10, %v4660_v9  ;;  %vm8787_vm11 = vmmov %vm8778_vm6 }
 0x111   : > { %5936 = vmatmul.mubr.msk.f32.vlgmr.msra.gmra.mxu1 %vm8787_vm11, %v5930_v42  ;;  %5940 = vmatmul.mubr.msk.f32.vlgmr.msra.gmra.mxu0 %vm8778_vm6, %v5937_v14  ;;  %vm8788_vm9 = vmmov %vm8772_vm2  ;;  %vm8801_vm11 = vnez %v8800_v22 }
 0x112   : > { %5942 = vmatpush1.msk.msra.mxu1 %vm8788_vm9, %v4472_v2  ;;  %vm8789_vm13 = vmmov %vm8772_vm2  ;;  %4626 = vmatprep.mubr.f32.mxu1 %v8510_v26  ;;  %v8803_v41 = vsel %vm8801_vm11, %v8802_v51, 0.0  ;;  %vm8819_vm11 = vnez %v8818_v40 }
 0x113   : > { %5946 = vmatpush1.msk.msra.mxu0 %vm8789_vm13, %v4659_v18  ;;  %vm8793_vm14 = vmmov %vm8772_vm2  ;;  %4744 = vmatprep.mubr.f32.mxu0 %v8510_v26  ;;  %vm7978_vm2 = vcmp.eq.s32.totalorder %v4839_v57, 1  ;;  %vm8807_vm13 = vnez %v8806_v39  ;;  %v8821_v62 = vsel %vm8819_vm11, %v8820_v12, 0.0 }
 0x114   : > { %5952 = vmatprep.subr.msk.mxu0 %vm8793_vm14, %v8792_v6  ;;  %5988 = vmatprep.subr.mxu1 %v8510_v26  ;;  %vm8794_vm12 = vmmov %vm8778_vm6  ;;  %v8809_v59 = vsel %vm8807_vm13, %v8808_v13, 0.0  ;;  %vm6140_vm14 = vmmov 0   ;;  %v4855_v27 = vsel %vm7978_vm2, %v8811_v55, 0.0 }
 0x115   : > { %5943 = vmatmul.mubr.msk.f32.vlgmr.msra.gmra.mxu1 %vm8794_vm12, %v5937_v14  ;;  %vm8798_vm5 = vmmov %vm8778_vm6  ;;  %vm8008_vm12 = vcmp.eq.s32.totalorder %v5034_v46, 1 }
 0x116   : > { %5947 = vmatmul.mubr.msk.f32.vlgmr.msra.gmra.mxu0 %vm8798_vm5, %v5944_v11  ;;  %vm8799_vm10 = vmmov %vm8788_vm9  ;;  %5990 = vmatprep.mubr.msk.f32.mxu1 %vm6140_vm14, %v8510_v26  ;;  %v5049_v56 = vsel %vm8008_vm12, %v8828_v31, 0.0 }
 0x117   : > { %5989 = vmatpush3.msk.msra.mxu1 %vm8799_vm10, %v4661_v37  ;;  %vm8804_vm6 = vmmov %vm8788_vm9  ;;  %4938 = vmatprep.mubr.f32.mxu0 %v8510_v26 }
 0x118   : > { %5953 = vmatpush1.msk.msra.mxu0 %vm8804_vm6, %v8803_v41  ;;  %vm8805_vm9 = vmmov %vm8804_vm6 }
 0x119   : > { %5955 = vmatprep.subr.msk.mxu1 %vm8805_vm9, %v4856_v47  ;;  %vm8810_vm0 = vmmov %vm8804_vm6  ;;  %v8815_v47 = vld [vmem:[#allocation24_spill] sm:$0xff]  ;;  %vm8825_vm9 = vnez %v8824_v52 }
 0x11a   : > { %5959 = vmatprep.subr.msk.mxu0 %vm8810_vm0, %v8809_v59  ;;  %vm8812_vm3 = vmmov %vm8798_vm5  ;;  %v5226_v35 = vrot.slane %v8815_v47, %v6438_v29  ;;  %v8826_v60 = vsel %vm8825_vm9, %v8705_v32, 0.0  ;;  %v8833_v32 = vld [vmem:[#allocation29_spill] sm:$0xff] }
 0x11b   : > { %5991 = vmatmul.mubr.msk.f32.vlgmr.msra.gmra.mxu1 %vm8812_vm3, %v5944_v11  ;;  %vm8816_vm5 = vmmov %vm8812_vm3 }
 0x11c   : > { %5954 = vmatmul.mubr.msk.f32.vlgmr.msra.gmra.mxu0 %vm8816_vm5, %v5951_v23  ;;  %vm8817_vm10 = vmmov %vm8810_vm0  ;;  %5009 = vmatprep.mubr.f32.mxu1 %v8510_v26  ;;  %vm8834_vm5 = vnez %v8833_v32 }
 0x11d   : > { %5956 = vmatpush1.msk.msra.mxu1 %vm8817_vm10, %v4855_v27  ;;  %vm8822_vm2 = vmmov %vm8810_vm0  ;;  %5132 = vmatprep.mubr.f32.mxu0 %v8510_v26  ;;  %v8836_v30 = vsel %vm8834_vm5, %v8835_v24, 0.0 }
 0x11e   : > { %5960 = vmatpush1.msk.msra.mxu0 %vm8822_vm2, %v8821_v62  ;;  %vm8823_vm6 = vmmov %vm8810_vm0 }
 0x11f   : > { %5962 = vmatprep.subr.msk.mxu1 %vm8823_vm6, %v5050_v48  ;;  %vm8827_vm13 = vmmov %vm8810_vm0  ;;  %v5419_v48 = vrot.slane %v8830_v5, %v6438_v29  ;;  %vm5233_vm0 = vcmp.eq.s32.totalorder %v5226_v35, 1  ;;  %v5965_v29 = vld [vmem:[%s8258_s2 + $0x64] sm:$0xf] }
 0x120   : > { %5966 = vmatprep.subr.msk.mxu0 %vm8827_vm13, %v8826_v60  ;;  %vm8829_vm7 = vmmov %vm8812_vm3  ;;  %v5241_v21 = vsel %vm5233_vm0, %v7658_v17, 0.0 }
 0x121   : > { %5957 = vmatmul.mubr.msk.f32.vlgmr.msra.gmra.mxu1 %vm8829_vm7, %v5951_v23  ;;  %vm8831_vm14 = vmmov %vm8812_vm3  ;;  %vm5426_vm8 = vcmp.eq.s32.totalorder %v5419_v48, 1 }
 0x122   : > { %5961 = vmatmul.mubr.msk.f32.vlgmr.msra.gmra.mxu0 %vm8831_vm14, %v5958_v38  ;;  %vm8832_vm3 = vmmov %vm8822_vm2  ;;  %5203 = vmatprep.mubr.f32.mxu1 %v8510_v26  ;;  %v5434_v17 = vsel %vm5426_vm8, %v7720_v25, 0.0 }
 0x123   : > { %5963 = vmatpush1.msk.msra.mxu1 %vm8832_vm3, %v5049_v56  ;;  %vm8837_vm10 = vmmov %vm8822_vm2  ;;  %5324 = vmatprep.mubr.f32.mxu0 %v8510_v26 }
 0x124   : > { %5967 = vmatpush1.msk.msra.mxu0 %vm8837_vm10, %v8836_v30  ;;  %vm8838_vm12 = vmmov %vm8822_vm2 }
 0x125   : > { %5969 = vmatprep.subr.msk.mxu1 %vm8838_vm12, %v5242_v4  ;;  %vm8841_vm11 = vmmov %vm8822_vm2 }
 0x126   : > { %5973 = vmatprep.subr.msk.mxu0 %vm8841_vm11, %v8840_v16  ;;  %vm8842_vm2 = vmmov %vm8829_vm7 }
 0x127   : > { %5964 = vmatmul.mubr.msk.f32.vlgmr.msra.gmra.mxu1 %vm8842_vm2, %v5958_v38  ;;  %vm8843_vm6 = vmmov %vm8842_vm2 }
 0x128   : > { %5968 = vmatmul.mubr.msk.f32.vlgmr.msra.gmra.mxu0 %vm8843_vm6, %v5965_v29  ;;  %vm8844_vm9 = vmmov %vm8832_vm3  ;;  %5395 = vmatprep.mubr.f32.mxu1 %v8510_v26 }
 0x129   : > { %5970 = vmatpush1.msk.msra.mxu1 %vm8844_vm9, %v5241_v21  ;;  %vm8847_vm4 = vmmov %vm8832_vm3  ;;  %5517 = vmatprep.mubr.f32.mxu0 %v8510_v26 }
 0x12a   : > { %5974 = vmatpush1.msk.msra.mxu0 %vm8847_vm4, %v8846_v20  ;;  %vm8848_vm13 = vmmov %vm8832_vm3 }
 0x12b   : > { %5976 = vmatprep.subr.msk.mxu1 %vm8848_vm13, %v5435_v61  ;;  %vm8849_vm7 = vmmov %vm8842_vm2 }
 0x12c   : > { %5971 = vmatmul.mubr.msk.f32.vlgmr.msra.gmra.mxu1 %vm8849_vm7, %v5965_v29  ;;  %vm8850_vm1 = vmmov %vm8842_vm2 }
 0x12d   : > { %5975 = vmatmul.mubr.msk.f32.vlgmr.msra.gmra.mxu0 %vm8850_vm1, %v5972_v10  ;;  %vm8851_vm0 = vmmov %vm8832_vm3  ;;  %5588 = vmatprep.mubr.f32.mxu1 %v8510_v26 }
 0x12e   : > { %5977 = vmatpush1.msk.msra.mxu1 %vm8851_vm0, %v5434_v17  ;;  %vm8852_vm15 = vmmov %vm8850_vm1 }
 0x12f   : > { %vm8853_vm14 = vmmov %vm8851_vm0 }
 0x130   : > { %5978 = vmatmul.mubr.msk.f32.vlgmr.msra.gmra.mxu1 %vm8852_vm15, %v5972_v10  ;;  %vm8854_vm3 = vmmov %vm8851_vm0 }
 0x131   : > { %vm8855_vm5 = vmmov %vm8851_vm0 }
 0x132   : > { %vm8856_vm10 = vmmov %vm8851_vm0 }
 0x133   : > { %vm8857_vm12 = vmmov %vm8851_vm0 }
 0x134   : > { %vm8858_vm11 = vmmov %vm8851_vm0 }
 0x135   : > { %vm8859_vm2 = vmmov %vm8851_vm0 }
 0x136   : > { %vm8860_vm8 = vmmov %vm8851_vm0 }
 0x153   : > { %v481_v36 = vpop.f32.mrf.mxu0 }
 0x155   : > { %v483_v3 = vpop.f32.mrf.mxu0 }
 0x157   : > { %v552_v44 = vpop.f32.mrf.mxu1 }
 0x159   : > { %v638_v4 = vpop.f32.mrf.mxu0  ;;  %v554_v61 = vpop.f32.mrf.mxu1 }
 0x15a   : > { %v639_v38 = vadd.f32 %v638_v4, %v481_v36 }
 0x15b   : > { %v640_v42 = vpop.f32.mrf.mxu0 }
 0x15c   : > { %v709_v0 = vpop.f32.mrf.mxu1  ;;  %v641_v31 = vadd.f32 %v640_v42, %v483_v3 }
 0x15d   : > { %v710_v5 = vadd.f32 %v709_v0, %v552_v44 }
 0x15e   : > { %v711_v54 = vpop.f32.mrf.mxu1 }
 0x15f   : > { %v712_v16 = vadd.f32 %v711_v54, %v554_v61 }
 0x164   : > { %v846_v63 = vpop.f32.mrf.mxu0 }
 0x165   : > { %v922_v32 = vadd.f32 %v846_v63, %v639_v38 }
 0x166   : > { %v848_v25 = vpop.f32.mrf.mxu0  ;;  %v917_v43 = vpop.f32.mrf.mxu1 }
 0x167   : > { %v923_v29 = vadd.f32 %v848_v25, %v641_v31  ;;  %v924_v21 = vadd.f32 %v917_v43, %v710_v5 }
 0x168   : > { %v919_v49 = vpop.f32.mrf.mxu1 }
 0x169   : > { %v925_v44 = vadd.f32 %v919_v49, %v712_v16 }
 0x16d   : > { %v1054_v34 = vpop.f32.mrf.mxu0 }
 0x16e   : > { %v1130_v20 = vadd.f32 %v1054_v34, %v922_v32 }
 0x16f   : > { %v1056_v53 = vpop.f32.mrf.mxu0 }
 0x170   : > { %v1125_v28 = vpop.f32.mrf.mxu1  ;;  %v1131_v36 = vadd.f32 %v1056_v53, %v923_v29 }
 0x171   : > { %v1132_v4 = vadd.f32 %v1125_v28, %v924_v21 }
 0x172   : > { %v1127_v1 = vpop.f32.mrf.mxu1 }
 0x173   : > { %v1133_v43 = vadd.f32 %v1127_v1, %v925_v44 }
 0x174   : > { %v1244_v9 = vpop.f32.mrf.mxu0 }
 0x175   : > { %v1320_v0 = vadd.f32 %v1244_v9, %v1130_v20 }
 0x176   : > { %v1246_v26 = vpop.f32.mrf.mxu0  ;;  %v1315_v50 = vpop.f32.mrf.mxu1 }
 0x177   : > { %v1321_v61 = vadd.f32 %v1246_v26, %v1131_v36  ;;  %v1322_v34 = vadd.f32 %v1315_v50, %v1132_v4 }
 0x178   : > { %v1453_v14 = vpop.f32.mrf.mxu0  ;;  %v8089_v18 = vpop.f32.mrf.mxu1 }
 0x179   : > { %v1529_v31 = vadd.f32 %v1453_v14, %v1320_v0  ;;  %v1323_v9 = vadd.f32 %v8089_v18, %v1133_v43 }
 0x17a   : > { %v1455_v7 = vpop.f32.mrf.mxu0 }
 0x17b   : > { %v1530_v49 = vadd.f32 %v1455_v7, %v1321_v61 }
 0x17c   : > { %v1524_v2 = vpop.f32.mrf.mxu1 }
 0x17d   : > { %v1531_v29 = vadd.f32 %v1524_v2, %v1322_v34 }
 0x17e   : > { %v8091_v11 = vpop.f32.mrf.mxu1 }
 0x17f   : > { %v1532_v4 = vadd.f32 %v8091_v11, %v1323_v9 }
 0x180   : > { %v1666_v57 = vpop.f32.mrf.mxu0 }
 0x181   : > { %v1742_v28 = vadd.f32 %v1666_v57, %v1529_v31 }
 0x182   : > { %v1668_v37 = vpop.f32.mrf.mxu0 }
 0x183   : > { %v1743_v21 = vadd.f32 %v1668_v37, %v1530_v49 }
 0x184   : > { %v8093_v58 = vpop.f32.mrf.mxu1 }
 0x185   : > { %v1744_v1 = vadd.f32 %v8093_v58, %v1531_v29 }
 0x186   : > { %v8095_v15 = vpop.f32.mrf.mxu1 }
 0x187   : > { %v1745_v37 = vadd.f32 %v8095_v15, %v1532_v4 }
 0x18b   : > { %v1873_v6 = vpop.f32.mrf.mxu0 }
 0x18c   : > { %v1949_v26 = vadd.f32 %v1873_v6, %v1742_v28 }
 0x18d   : > { %v1875_v46 = vpop.f32.mrf.mxu0 }
 0x18e   : > { %v1950_v36 = vadd.f32 %v1875_v46, %v1743_v21 }
 0x190   : > { %v8097_v33 = vpop.f32.mrf.mxu1 }
 0x191   : > { %v1951_v7 = vadd.f32 %v8097_v33, %v1744_v1 }
 0x192   : > { %v8099_v51 = vpop.f32.mrf.mxu1 }
 0x193   : > { %v1952_v11 = vadd.f32 %v8099_v51, %v1745_v37 }
 0x194   : > { %v2081_v22 = vpop.f32.mrf.mxu0 }
 0x195   : > { %v2157_v44 = vadd.f32 %v2081_v22, %v1949_v26 }
 0x196   : > { %v8101_v41 = vpop.f32.mrf.mxu0 }
 0x197   : > { %v2158_v0 = vadd.f32 %v8101_v41, %v1950_v36 }
 0x199   : > { %v8103_v23 = vpop.f32.mrf.mxu1 }
 0x19a   : > { %v8105_v39 = vpop.f32.mrf.mxu0  ;;  %v2159_v6 = vadd.f32 %v8103_v23, %v1951_v7 }
 0x19b   : > { %v8107_v13 = vpop.f32.mrf.mxu1  ;;  %v2350_v18 = vadd.f32 %v8105_v39, %v2157_v44 }
 0x19c   : > { %v8109_v59 = vpop.f32.mrf.mxu0  ;;  %v2160_v15 = vadd.f32 %v8107_v13, %v1952_v11 }
 0x19d   : > { %v2351_v46 = vadd.f32 %v8109_v59, %v2158_v0 }
 0x19e   : > { %v8111_v55 = vpop.f32.mrf.mxu1  ;;  %v8113_v27 = vpop.f32.mrf.mxu0 }
 0x19f   : > { %v2542_v22 = vadd.f32 %v8113_v27, %v2350_v18  ;;  %v2352_v33 = vadd.f32 %v8111_v55, %v2159_v6 }
 0x1a0   : > { %v8115_v8 = vpop.f32.mrf.mxu1  ;;  %v8117_v47 = vpop.f32.mrf.mxu0 }
 0x1a1   : > { %v2543_v41 = vadd.f32 %v8117_v47, %v2351_v46  ;;  %v2353_v51 = vadd.f32 %v8115_v8, %v2160_v15 }
 0x1a3   : > { %v8119_v35 = vpop.f32.mrf.mxu1 }
 0x1a4   : > { %v8121_v40 = vpop.f32.mrf.mxu0  ;;  %v2544_v23 = vadd.f32 %v8119_v35, %v2352_v33 }
 0x1a5   : > { %v8123_v12 = vpop.f32.mrf.mxu1  ;;  %v2735_v39 = vadd.f32 %v8121_v40, %v2542_v22 }
 0x1a6   : > { %v8125_v62 = vpop.f32.mrf.mxu0  ;;  %v2545_v13 = vadd.f32 %v8123_v12, %v2353_v51 }
 0x1a7   : > { %v2736_v59 = vadd.f32 %v8125_v62, %v2543_v41 }
 0x1a8   : > { %v8129_v60 = vpop.f32.mrf.mxu0 }
 0x1a9   : > { %v8127_v52 = vpop.f32.mrf.mxu1  ;;  %v2927_v27 = vadd.f32 %v8129_v60, %v2735_v39 }
 0x1aa   : > { %v8133_v48 = vpop.f32.mrf.mxu0  ;;  %v2737_v55 = vadd.f32 %v8127_v52, %v2544_v23 }
 0x1ab   : > { %v8131_v56 = vpop.f32.mrf.mxu1  ;;  %v2928_v47 = vadd.f32 %v8133_v48, %v2736_v59 }
 0x1ac   : > { %v2738_v8 = vadd.f32 %v8131_v56, %v2545_v13 }
 0x1ad   : > { %v8135_v24 = vpop.f32.mrf.mxu1 }
 0x1ae   : > { %v8137_v30 = vpop.f32.mrf.mxu0  ;;  %v2929_v35 = vadd.f32 %v8135_v24, %v2737_v55 }
 0x1af   : > { %v8139_v45 = vpop.f32.mrf.mxu1  ;;  %v3086_v40 = vadd.f32 %v8137_v30, %v2927_v27 }
 0x1b0   : > { %v8141_v19 = vpop.f32.mrf.mxu0  ;;  %v2930_v12 = vadd.f32 %v8139_v45, %v2738_v8 }
 0x1b1   : > { %v8143_v10 = vpop.f32.mrf.mxu1  ;;  %v3087_v62 = vadd.f32 %v8141_v19, %v2928_v47 }
 0x1b2   : > { %v3088_v52 = vadd.f32 %v8143_v10, %v2929_v35 }
 0x1b3   : > { %v8145_v17 = vpop.f32.mrf.mxu0  ;;  %v8147_v3 = vpop.f32.mrf.mxu1 }
 0x1b4   : > { %v3279_v60 = vadd.f32 %v8145_v17, %v3086_v40  ;;  %v3089_v4 = vadd.f32 %v8147_v3, %v2930_v12 }
 0x1b5   : > { %v8149_v42 = vpop.f32.mrf.mxu0 }
 0x1b6   : > { %v3280_v48 = vadd.f32 %v8149_v42, %v3087_v62 }
 0x1b7   : > { %v8151_v63 = vpop.f32.mrf.mxu1 }
 0x1b8   : > { %v8153_v25 = vpop.f32.mrf.mxu0  ;;  %v3281_v24 = vadd.f32 %v8151_v63, %v3088_v52 }
 0x1b9   : > { %v8155_v54 = vpop.f32.mrf.mxu1  ;;  %v3472_v30 = vadd.f32 %v8153_v25, %v3279_v60 }
 0x1ba   : > { %v8157_v38 = vpop.f32.mrf.mxu0  ;;  %v3282_v25 = vadd.f32 %v8155_v54, %v3089_v4 }
 0x1bb   : > { %v8159_v53 = vpop.f32.mrf.mxu1  ;;  %v3473_v19 = vadd.f32 %v8157_v38, %v3280_v48 }
 0x1bc   : > { %v3588_v5 = vpop.f32.mrf.mxu0  ;;  %v3474_v56 = vadd.f32 %v8159_v53, %v3281_v24 }
 0x1bd   : > { %v8161_v32 = vpop.f32.mrf.mxu1  ;;  %v3664_v44 = vadd.f32 %v3588_v5, %v3472_v30 }
 0x1be   : > { %v3590_v16 = vpop.f32.mrf.mxu0  ;;  %v3475_v46 = vadd.f32 %v8161_v32, %v3282_v25 }
 0x1bf   : > { %v3659_v20 = vpop.f32.mrf.mxu1  ;;  %v3665_v7 = vadd.f32 %v3590_v16, %v3473_v19 }
 0x1c0   : > { %v3781_v50 = vpop.f32.mrf.mxu0  ;;  %v3666_v18 = vadd.f32 %v3659_v20, %v3474_v56 }
 0x1c1   : > { %v8165_v14 = vpop.f32.mrf.mxu1  ;;  %v3857_v0 = vadd.f32 %v3781_v50, %v3664_v44 }
 0x1c2   : > { %v3783_v57 = vpop.f32.mrf.mxu0  ;;  %v3667_v53 = vadd.f32 %v8165_v14, %v3475_v46 }
 0x1c3   : > { %v3852_v2 = vpop.f32.mrf.mxu1  ;;  %v3858_v45 = vadd.f32 %v3783_v57, %v3665_v7 }
 0x1c4   : > { %v3979_v58 = vpop.f32.mrf.mxu0  ;;  %v3859_v38 = vadd.f32 %v3852_v2, %v3666_v18 }
 0x1c5   : > { %v3854_v61 = vpop.f32.mrf.mxu1  ;;  %v4055_v6 = vadd.f32 %v3979_v58, %v3857_v0 }
 0x1c6   : > { %v3981_v43 = vpop.f32.mrf.mxu0  ;;  %v3860_v54 = vadd.f32 %v3854_v61, %v3667_v53 }
 0x1c7   : > { %v4050_v34 = vpop.f32.mrf.mxu1  ;;  %v4056_v22 = vadd.f32 %v3981_v43, %v3858_v45 }
 0x1c8   : > { %v4171_v31 = vpop.f32.mrf.mxu0  ;;  %v4057_v33 = vadd.f32 %v4050_v34, %v3859_v38 }
 0x1c9   : > { %v4052_v49 = vpop.f32.mrf.mxu1  ;;  %v4247_v11 = vadd.f32 %v4171_v31, %v4055_v6 }
 0x1ca   : > { %v4173_v28 = vpop.f32.mrf.mxu0  ;;  %v4058_v59 = vadd.f32 %v4052_v49, %v3860_v54 }
 0x1cb   : > { %v4242_v9 = vpop.f32.mrf.mxu1  ;;  %v4248_v50 = vadd.f32 %v4173_v28, %v4056_v22 }
 0x1cc   : > { %v4249_v20 = vadd.f32 %v4242_v9, %v4057_v33 }
 0x1cd   : > { %v4364_v29 = vpop.f32.mrf.mxu0  ;;  %v4244_v21 = vpop.f32.mrf.mxu1 }
 0x1ce   : > { %v4440_v41 = vadd.f32 %v4364_v29, %v4247_v11  ;;  %v4250_v51 = vadd.f32 %v4244_v21, %v4058_v59 }
 0x1cf   : > { %v4366_v26 = vpop.f32.mrf.mxu0 }
 0x1d0   : > { %v4441_v57 = vadd.f32 %v4366_v26, %v4248_v50 }
 0x1d1   : > { %v4435_v1 = vpop.f32.mrf.mxu1  ;;  %v4557_v36 = vpop.f32.mrf.mxu0 }
 0x1d2   : > { %v4633_v58 = vadd.f32 %v4557_v36, %v4440_v41  ;;  %v4442_v32 = vadd.f32 %v4435_v1, %v4249_v20  ;;  %v5603_v1 = vpop.permute.xlu0 %5602 }
 0x1d3   : > { %v4437_v17 = vpop.f32.mrf.mxu1  ;;  %v4559_v10 = vpop.f32.mrf.mxu0 }
 0x1d4   : > { %v4634_v27 = vadd.f32 %v4559_v10, %v4441_v57  ;;  %v4443_v40 = vadd.f32 %v4437_v17, %v4250_v51 }
 0x1d5   : > { %v4628_v42 = vpop.f32.mrf.mxu1 }
 0x1d6   : > { %v4746_v37 = vpop.f32.mrf.mxu0  ;;  %v4635_v55 = vadd.f32 %v4628_v42, %v4442_v32 }
 0x1d7   : > { %v4630_v63 = vpop.f32.mrf.mxu1  ;;  %v4822_v43 = vadd.f32 %v4746_v37, %v4633_v58 }
 0x1d8   : > { %v4748_v5 = vpop.f32.mrf.mxu0  ;;  %v4636_v62 = vadd.f32 %v4630_v63, %v4443_v40 }
 0x1d9   : > { %v4823_v34 = vadd.f32 %v4748_v5, %v4634_v27 }
 0x1db   : > { %v4817_v3 = vpop.f32.mrf.mxu1 }
 0x1dc   : > { %v4940_v16 = vpop.f32.mrf.mxu0  ;;  %v4824_v61 = vadd.f32 %v4817_v3, %v4635_v55 }
 0x1dd   : > { %v5992_v39 = vpop.f32.mrf.mxu1  ;;  %v5016_v47 = vadd.f32 %v4940_v16, %v4822_v43 }
 0x1de   : > { %v4942_v15 = vpop.f32.mrf.mxu0 }
 0x1df   : > { %v5017_v13 = vadd.f32 %v4942_v15, %v4823_v34 }
 0x1e1   : > { %v5011_v23 = vpop.f32.mrf.mxu1 }
 0x1e2   : > { %v5134_v2 = vpop.f32.mrf.mxu0  ;;  %v5018_v49 = vadd.f32 %v5011_v23, %v4824_v61 }
 0x1e3   : > { %v5013_v31 = vpop.f32.mrf.mxu1  ;;  %v5210_v35 = vadd.f32 %v5134_v2, %v5016_v47 }
 0x1e4   : > { %v5136_v14 = vpop.f32.mrf.mxu0  ;;  %v5019_v21 = vadd.f32 %v5013_v31, %v4636_v62 }
 0x1e5   : > { %v5211_v8 = vadd.f32 %v5136_v14, %v5017_v13 }
 0x1e7   : > { %v5205_v28 = vpop.f32.mrf.mxu1 }
 0x1e8   : > { %v5326_v9 = vpop.f32.mrf.mxu0  ;;  %v5212_v48 = vadd.f32 %v5205_v28, %v5018_v49 }
 0x1e9   : > { %v5207_v29 = vpop.f32.mrf.mxu1  ;;  %v5402_v52 = vadd.f32 %v5326_v9, %v5210_v35 }
 0x1ea   : > { %v5328_v60 = vpop.f32.mrf.mxu0  ;;  %v5213_v19 = vadd.f32 %v5207_v29, %v5019_v21 }
 0x1eb   : > { %v5403_v12 = vadd.f32 %v5328_v60, %v5211_v8 }
 0x1ec   : > { %v5397_v26 = vpop.f32.mrf.mxu1 }
 0x1ed   : > { %v5519_v30 = vpop.f32.mrf.mxu0  ;;  %v5404_v44 = vadd.f32 %v5397_v26, %v5212_v48 }
 0x1ee   : > { %v5595_v24 = vadd.f32 %v5519_v30, %v5402_v52  ;;  %v5399_v36 = vpop.f32.mrf.mxu1 }
 0x1ef   : > { %v5521_v17 = vpop.f32.mrf.mxu0  ;;  %v5405_v7 = vadd.f32 %v5399_v36, %v5213_v19 }
 0x1f0   : > { %v5605_v4 = vadd.f32 %v5603_v1, %v5595_v24  ;;  %v5596_v56 = vadd.f32 %v5521_v17, %v5403_v12  ;;  %v5590_v10 = vpop.f32.mrf.mxu1 }
 0x1f1   : > { %v5597_v0 = vadd.f32 %v5590_v10, %v5404_v44 }
 0x1f2   : > { %v5606_v42 = vadd.f32 %v5603_v1, %v5596_v56  ;;  %v5592_v25 = vpop.f32.mrf.mxu1  ;;  %v5630_v18 = vmul.f32 %v5605_v4, %v5605_v4  ;;  %v5619_v46 = vsel %vm8853_vm14, %v5605_v4, 0.0 }
 0x1f3   : > { %v5607_v37 = vadd.f32 %v5603_v1, %v5597_v0  ;;  %v5598_v45 = vadd.f32 %v5592_v25, %v5405_v7 }
 0x1f4   : > { %v5613_v6 = vcombine.low %v5605_v4, %v5606_v42  ;;  %v5631_v63 = vmul.f32 %v5606_v42, %v5606_v42  ;;  %v5620_v38 = vsel %vm8854_vm3, %v5606_v42, 0.0  ;;  %v5634_v53 = vsel %vm8856_vm10, %v5630_v18, 0.0 }
 0x1f5   : > { %v5608_v5 = vadd.f32 %v5603_v1, %v5598_v45  ;;  %v5621_v22 = vadd.f32 %v5620_v38, %v5619_v46  ;;  %v5622_v11 = vsel %vm8855_vm5, %v5607_v37, 0.0  ;;  %v5632_v3 = vmul.f32 %v5607_v37, %v5607_v37 }
 0x1f6   : > { %v5635_v33 = vsel %vm8857_vm12, %v5631_v63, 0.0  ;;  %5617 = vst [vmem:[%s245_s26] sm:$0xff] %v5613_v6 }
 0x1f7   : > { %v5614_v16 = vcombine.low %v5607_v37, %v5608_v5  ;;  %v5623_v50 = vadd.f32 %v5622_v11, %v5621_v22  ;;  %v5624_v41 = vsel %vm8858_vm11, %v5608_v5, 0.0  ;;  %v5633_v39 = vmul.f32 %v5608_v5, %v5608_v5 }
 0x1f8   : > { %v5636_v54 = vadd.f32 %v5635_v33, %v5634_v53  ;;  %v5637_v20 = vsel %vm8859_vm2, %v5632_v3, 0.0 }
 0x1f9   : > { %v5625_v15 = vadd.f32 %v5624_v41, %v5623_v50  ;;  %v5639_v57 = vsel %vm8860_vm8, %v5633_v39, 0.0  ;;  %5618 = vst [vmem:[%s245_s26 + $0x8] sm:$0xff] %v5614_v16 }
 0x1fa   : > { %v5638_v58 = vadd.f32 %v5637_v20, %v5636_v54 }
 0x1fb   : > { %5626 = vadd.xlane.f32.xlu1 %v5625_v15 }
 0x1fc   : > { %v5640_v23 = vadd.f32 %v5639_v57, %v5638_v58 }
 0x1fe   : > { %5641 = vadd.xlane.f32.xlu0 %v5640_v23 }
 0x1ff   : > { %6081 = shalt.err (!%p6078_p3)
}
 0x200   : > { %s6082_s25 = scalar_lea.hbm %s5665_s29, 256  ;;  %s6086_s17 = scalar_lea.hbm %s8260_s4, 512 }
 0x201   : > { %p6083_p4 = scmp.ne.s32.totalorder %s5665_s29, %s6082_s25  ;;  %p6087_p9 = scmp.lt.s32.totalorder %s5665_s29, %s8260_s4 }
 0x202   : > { %p6088_p10 = scmp.lt.s32.totalorder %s6086_s17, %s6082_s25 }
 0x203   : > { %p6084_p7 = pnand %p6083_p4, %p6215_p5 }
 0x204   : > { %p6089_p11 = por %p6088_p10, %p6087_p9 }
 0x205   : > { %p6085_p8 = pneg %p6084_p7 }
 0x207   : > { %p6090_p12 = pnand %p6089_p11, %p6085_p8 }
 0x209   : > { %6093 = shalt.err (!%p6090_p12)
}
 0x20a   : > { %5993 = dma.vmem_to_hbm [thread:$0]  (%p6215_p5), %s5668_s19, 256, %s5665_s29, %s5645_s9   ;;  %vm5628_vm6 = vcmask 3072  }
 0x20b   : > { %s5787_s20 = sshll.u32 %s6239_s11, 2 }
 0x20c   : > { %s266_s12 = scalar_lea.vmem %s8261_s5, %s5787_s20  ;;  %s270_s15 = scalar_lea.vmem %s8262_s6, %s5787_s20 }
 0x284   : > { %v5627_v59 = vpop.xlane.xlu1 %5626 }
 0x285   : > { %5629 = vst.msk [vmem:[%s266_s12] sm:$0xf] %vm5628_vm6, %v5627_v59 }
 0x287   : > { %v5642_v32 = vpop.xlane.xlu0 %5641 }
 0x288   : > { %5643 = vst.msk [vmem:[%s270_s15] sm:$0xf] %vm5628_vm6, %v5642_v32 }
 0x289 PF: > { %p5999_p13 = scmp.ge.s32.totalorder %s6128_s24, 2  ;;  %s5685_s7 = sand.u32 1, %s6116_s21  }
 0x28a   : > { %s5686_s11 = scalar_lea.sflag [#allocation4], %s5685_s7 }
 0x28b   : > { %p5996_p5 = pnand %p5999_p13, %p6219_p6 }
 0x28d   : > { %p5997_p0 = pneg %p5996_p5 }
 0x28f   : > { %6111 = dma.done.wait (%p5997_p0), %s5686_s11, 256  }
 0x290   : > { %6113 = vsyncadd (%p5997_p0), %s5686_s11, 4294967040  ;;  %p17_p1 = scmp.ge.s32.totalorder %s6202_s27, 4   ;;  %s8861_s21 = smov %s6120_s22 }
 0x291   : > { %s8862_s22 = smov %s6124_s23  ;;  %s8863_s23 = smov %s6213_s30 }
 0x292   : > { %s8864_s24 = smov %s6202_s27  ;;  %19 = sbr.rel (!%p17_p1) target bundleno = 3 (0x3), region = 123 }
 0x297   :  { %5705 = vsyncpa [#allocation4], 1 }
 0x298   :  { %5707 = vsyncpa [#allocation4 + $0x1], 1 }

</bundles_post_ra>
